<compile_context>
chip_gen: v7x
topology: tpu7x:2x2x1
jax: 0.10.0
libtpu: 0.0.40
codegen_flags: <defaults>
</compile_context>

<pallas_src>
import functools

import jax
import jax.numpy as jnp
from jax.experimental import pallas as pl
from jax.experimental.pallas import tpu as pltpu


# ----------------------------------------------------------------------------
# Fused forward kernel (one batch element per grid step)
# ----------------------------------------------------------------------------
def fused_forward_kernel(*refs, n_layers, emb):
    (cons_ref, edge_ref, mask_ref,
     csh_ref, csc_ref, vsh_ref, vsc_ref, esh_ref, esc_ref,
     cw1_ref, cb1_ref, cw2_ref, cb2_ref,
     vw1_ref, vb1_ref, vw2_ref, vb2_ref,
     wlr_ref, bl_ref, we_ref, wr_ref, wf_ref, bf_ref,
     wo1m_ref, bo1_ref, wo2_ref, bo2_ref,
     pw1_ref, pb1_ref, pw2_ref, pb2_ref,
     o_ref) = refs

    f32 = jnp.float32
    E = emb

    cons_raw = cons_ref[0]                       # [Nc, Cf]
    A_raw = edge_ref[0]                          # [Nc, Nv] raw edge coefficients

    # Edge PreNorm (identity at init) in both source-major layouts; the single
    # in-kernel transpose replaces any wrapper-level HBM transpose pass.
    e_sh = esh_ref[...]                          # [1, 1]
    e_sc = esc_ref[...]
    A_rawT = A_raw.T                             # [Nv, Nc]
    A_cv = (A_raw + e_sh) * e_sc                 # c2v source-major: [Nc(src), Nv(tgt)]
    A_vc = (A_rawT + e_sh) * e_sc                # v2c source-major: [Nv(src), Nc(tgt)]

    # TODO(synk): lp_to_graph is not provided in the reference; variable node features
    # are synthesized from per-variable statistics of the raw edge coefficients.
    s_mean = jnp.mean(A_rawT, axis=1, keepdims=True)   # [Nv, 1]
    s_max = jnp.max(A_rawT, axis=1, keepdims=True)
    s_min = jnp.min(A_rawT, axis=1, keepdims=True)
    s_sum = jnp.sum(A_rawT, axis=1, keepdims=True)
    vf_raw = jnp.concatenate([s_mean, s_max, s_min, s_sum], axis=1)   # [Nv, 4]

    # Node PreNorm (identity at init, explicit buffers).
    cons_in = (cons_raw + csh_ref[...]) * csc_ref[...]   # [Nc, Cf]
    var_in = (vf_raw + vsh_ref[...]) * vsc_ref[...]      # [Nv, Vf]

    def mlp2(x, w1, b1, w2, b2, final_relu):
        h = jnp.maximum(jnp.dot(x, w1, preferred_element_type=f32) + b1, 0.0)
        y = jnp.dot(h, w2, preferred_element_type=f32) + b2
        return jnp.maximum(y, 0.0) if final_relu else y

    cf = mlp2(cons_in, cw1_ref[...], cb1_ref[...], cw2_ref[...], cb2_ref[...], True)  # [Nc, E]
    vf = mlp2(var_in, vw1_ref[...], vb1_ref[...], vw2_ref[...], vb2_ref[...], True)   # [Nv, E]

    def conv(L, R, A_sm, idx):
        """One BipartiteGraphConvolution on a dense bipartite graph.

        L: [Nl, E] source nodes, R: [Nr, E] target nodes, A_sm: [Nl, Nr] source-major.
        message(l->r) = Linear_f(ReLU(W_left R[r] + b_left + A[l,r] * w_edge + W_right L[l]))
        out[r] = output_module(concat([sum_l message, R[r]]))
        (feature_module_final's and post_conv_module's PreNormLayers are identity at init.)
        """
        Nl = L.shape[0]
        # Fused R-operand matmul: R @ [wl | wo1r] gives pre_r and r_proj in one pass.
        RW = jnp.dot(R, wlr_ref[idx], preferred_element_type=f32)      # [Nr, 2E]
        pre_r = RW[:, :E] + bl_ref[idx]                                # [Nr, E]
        r_proj = RW[:, E:]                                             # [Nr, E]
        pre_l = jnp.dot(L, wr_ref[idx], preferred_element_type=f32)    # [Nl, E]
        we_b = we_ref[idx].reshape(1, 1, E)                            # hoisted broadcast
        pre_r3 = pre_r[None, :, :]                                     # [1, Nr, E]

        # Dense 'add' aggregation over source nodes, vectorized in sublane-sized
        # chunks; reduction over the leading axis = cheap vreg adds.
        CH = min(8, Nl)
        agg = None
        for start in range(0, Nl, CH):
            size = min(CH, Nl - start)
            pl_c = pre_l[start:start + size]                           # [size, E]
            A_c = A_sm[start:start + size]                             # [size, Nr] (sublane rows)
            contrib = pre_r3 + pl_c[:, None, :] + A_c[:, :, None] * we_b   # [size, Nr, E]
            part = jnp.sum(jnp.maximum(contrib, 0.0), axis=0)          # [Nr, E]
            agg = part if agg is None else agg + part

        # feature_module_final Linear applied per-message then summed:
        #   sum_l (ReLU(.) @ Wf + bf) = (sum_l ReLU(.)) @ Wf + Nl * bf
        msg = jnp.dot(agg, wf_ref[idx], preferred_element_type=f32) + float(Nl) * bf_ref[idx]
        # post_conv_module = PreNormLayer(1, shift=False) -> identity at init (scale=1).
        h1 = jnp.maximum(
            jnp.dot(msg, wo1m_ref[idx], preferred_element_type=f32) + r_proj + bo1_ref[idx],
            0.0)
        return jnp.dot(h1, wo2_ref[idx], preferred_element_type=f32) + bo2_ref[idx]

    for layer in range(n_layers):
        # literal: variable_features = conv_v_to_c(vf, reversed_edges, e, cf)
        vf_new = conv(vf, cf, A_vc, 2 * layer)            # [Nc, E]
        # literal: constraint_features = conv_c_to_v(cf_old, edges, e, vf_new)
        cf_new = conv(cf, vf_new, A_cv, 2 * layer + 1)    # [Nv, E]
        vf, cf = vf_new, cf_new

    # policy head: Linear -> ReLU -> Linear(., 1), then masked_fill(mask, -inf) fused here.
    ph = jnp.maximum(jnp.dot(cf, pw1_ref[...], preferred_element_type=f32) + pb1_ref[...], 0.0)
    logits = jnp.dot(ph, pw2_ref[...], preferred_element_type=f32) + pb2_ref[...]     # [Nc, 1]
    masked = jnp.where(mask_ref[0] > 0.5, -jnp.inf, logits)                            # [Nc, 1]
    o_ref[0] = masked


# ----------------------------------------------------------------------------
# pallas_call wrapper (single launch for the whole forward, mask fused in)
# ----------------------------------------------------------------------------
def fused_forward(params, constraint_features, A_raw, mask):
    B, Nc, Cf = constraint_features.shape
    Nv = A_raw.shape[2]
    conv = params["conv"]
    L2, E, _ = conv["wr"].shape
    n_layers = L2 // 2

    mask3 = mask.reshape(B, Nc, 1).astype(jnp.float32)

    inputs = [
        constraint_features, A_raw, mask3,
        params["cons_shift"], params["cons_scale"],
        params["var_shift"], params["var_scale"],
        params["edge_shift"], params["edge_scale"],
        *params["cons_emb"], *params["var_emb"],
        conv["wl_o1r"], conv["bl"], conv["we"], conv["wr"], conv["wf"],
        conv["bf"], conv["wo1m"], conv["bo1"], conv["wo2"], conv["bo2"],
        *params["policy"],
    ]

    def bcast_spec(arr):
        nd = arr.ndim
        return pl.BlockSpec(arr.shape, lambda b, _nd=nd: (0,) * _nd)

    in_specs = [
        pl.BlockSpec((1, Nc, Cf), lambda b: (b, 0, 0)),
        pl.BlockSpec((1, Nc, Nv), lambda b: (b, 0, 0)),
        pl.BlockSpec((1, Nc, 1), lambda b: (b, 0, 0)),
    ] + [bcast_spec(x) for x in inputs[3:]]

    kernel = functools.partial(fused_forward_kernel, n_layers=n_layers, emb=E)

    return pl.pallas_call(
        kernel,
        out_shape=jax.ShapeDtypeStruct((B, Nc, 1), jnp.float32),
        grid_spec=pltpu.PrefetchScalarGridSpec(
            num_scalar_prefetch=0,
            grid=(B,),                               # batch axis shards across v7x's 2 TCs
            in_specs=in_specs,
            out_specs=pl.BlockSpec((1, Nc, 1), lambda b: (b, 0, 0)),
        ),
        compiler_params=pltpu.CompilerParams(
            dimension_semantics=("parallel",),
            vmem_limit_bytes=32 * 1024 * 1024,       # explicit, safe on v5e/v6e/v7x
        ),
    )(*inputs)


# ----------------------------------------------------------------------------
# Parameters (deterministic synthetic init; PreNorm buffers at their init values)
# ----------------------------------------------------------------------------
def init_params(key, cons_nfeats, var_nfeats, emb, n_layers):
    keys = iter(jax.random.split(key, 512))

    def lin_w(din, dout, s=0.2):
        return jax.random.normal(next(keys), (din, dout), jnp.float32) * s

    def lin_b(dout, s=0.05):
        return jax.random.normal(next(keys), (1, dout), jnp.float32) * s

    convs = []
    for _ in range(2 * n_layers):               # order: v2c_0, c2v_0, v2c_1, c2v_1, ...
        wl, bl = lin_w(emb, emb), lin_b(emb)    # feature_module_left
        we = lin_w(1, emb)                      # feature_module_edge (no bias)
        wr = lin_w(emb, emb)                    # feature_module_right (no bias)
        wf, bf = lin_w(emb, emb), lin_b(emb)    # feature_module_final Linear
        wo1m, wo1r = lin_w(emb, emb), lin_w(emb, emb)   # output_module Linear(2E,E), split
        bo1 = lin_b(emb)
        wo2, bo2 = lin_w(emb, emb), lin_b(emb)
        convs.append(dict(
            wl_o1r=jnp.concatenate([wl, wo1r], axis=1),  # fused R-operand weight [E, 2E]
            bl=bl, we=we, wr=wr, wf=wf, bf=bf, wo1m=wo1m, bo1=bo1, wo2=wo2, bo2=bo2))
    conv_stack = {k: jnp.stack([c[k] for c in convs], axis=0) for k in convs[0]}

    return dict(
        cons_shift=jnp.zeros((1, cons_nfeats), jnp.float32),
        cons_scale=jnp.ones((1, cons_nfeats), jnp.float32),
        var_shift=jnp.zeros((1, var_nfeats), jnp.float32),
        var_scale=jnp.ones((1, var_nfeats), jnp.float32),
        edge_shift=jnp.zeros((1, 1), jnp.float32),
        edge_scale=jnp.ones((1, 1), jnp.float32),
        cons_emb=(lin_w(cons_nfeats, emb), lin_b(emb), lin_w(emb, emb), lin_b(emb)),
        var_emb=(lin_w(var_nfeats, emb), lin_b(emb), lin_w(emb, emb), lin_b(emb)),
        policy=(lin_w(emb, emb), lin_b(emb), lin_w(emb, 1), lin_b(1)),
        conv=conv_stack,
    )


# ----------------------------------------------------------------------------
# BipartiteAgent.forward
# ----------------------------------------------------------------------------
def agent_forward(params, constraint_features, edge_features, mask):
    B, Nc, _ = constraint_features.shape
    Nv = edge_features.shape[2]
    assert Nc == Nv, "literal reference encoder semantics require n_cons == n_var"
    assert params["var_shift"].shape[1] == 4, "synthesized variable features have 4 stats"

    A_raw = edge_features[..., 0]                                 # [B, Nc, Nv] (edge_nfeats == 1)
    # masked_fill(mask, -inf) is applied inside the kernel.
    return fused_forward(params, constraint_features, A_raw, mask)[..., 0]   # [B, Nc]


# ----------------------------------------------------------------------------
if __name__ == "__main__":
    key = jax.random.PRNGKey(0)
    B, Nc, Nv = 2, 8, 8
    cons_nfeats, edge_nfeats, var_nfeats, emb, n_layers = 4, 1, 4, 32, 2

    k1, k2, k3, kp = jax.random.split(key, 4)
    constraint_features = jax.random.normal(k1, (B, Nc, cons_nfeats), jnp.float32)
    edge_features = jax.random.normal(k2, (B, Nc, Nv, edge_nfeats), jnp.float32)
    mask = (jax.random.uniform(k3, (B, Nc)) < 0.25).astype(jnp.float32)

    params = init_params(kp, cons_nfeats, var_nfeats, emb, n_layers)

    logits = jax.jit(agent_forward)(params, constraint_features, edge_features, mask)
    jax.block_until_ready(logits)
    assert logits.shape == (B, Nc)
    print("KERNEL_OK")
</pallas_src>

<mosaic_0001>
module attributes {stable_mosaic.version = 11 : i64} {
  func.func @fused_forward_kernel(%arg0: i32, %arg1: memref<1x8x4xf32, #tpu.memory_space<vmem>>, %arg2: memref<1x8x8xf32, #tpu.memory_space<vmem>>, %arg3: memref<1x8x1xf32, #tpu.memory_space<vmem>>, %arg4: memref<1x4xf32, #tpu.memory_space<vmem>>, %arg5: memref<1x4xf32, #tpu.memory_space<vmem>>, %arg6: memref<1x4xf32, #tpu.memory_space<vmem>>, %arg7: memref<1x4xf32, #tpu.memory_space<vmem>>, %arg8: memref<1x1xf32, #tpu.memory_space<vmem>>, %arg9: memref<1x1xf32, #tpu.memory_space<vmem>>, %arg10: memref<4x32xf32, #tpu.memory_space<vmem>>, %arg11: memref<1x32xf32, #tpu.memory_space<vmem>>, %arg12: memref<32x32xf32, #tpu.memory_space<vmem>>, %arg13: memref<1x32xf32, #tpu.memory_space<vmem>>, %arg14: memref<4x32xf32, #tpu.memory_space<vmem>>, %arg15: memref<1x32xf32, #tpu.memory_space<vmem>>, %arg16: memref<32x32xf32, #tpu.memory_space<vmem>>, %arg17: memref<1x32xf32, #tpu.memory_space<vmem>>, %arg18: memref<4x32x64xf32, #tpu.memory_space<vmem>>, %arg19: memref<4x1x32xf32, #tpu.memory_space<vmem>>, %arg20: memref<4x1x32xf32, #tpu.memory_space<vmem>>, %arg21: memref<4x32x32xf32, #tpu.memory_space<vmem>>, %arg22: memref<4x32x32xf32, #tpu.memory_space<vmem>>, %arg23: memref<4x1x32xf32, #tpu.memory_space<vmem>>, %arg24: memref<4x32x32xf32, #tpu.memory_space<vmem>>, %arg25: memref<4x1x32xf32, #tpu.memory_space<vmem>>, %arg26: memref<4x32x32xf32, #tpu.memory_space<vmem>>, %arg27: memref<4x1x32xf32, #tpu.memory_space<vmem>>, %arg28: memref<32x32xf32, #tpu.memory_space<vmem>>, %arg29: memref<1x32xf32, #tpu.memory_space<vmem>>, %arg30: memref<32x1xf32, #tpu.memory_space<vmem>>, %arg31: memref<1x1xf32, #tpu.memory_space<vmem>>, %arg32: memref<1x8x1xf32, #tpu.memory_space<vmem>>) attributes {dimension_semantics = [#tpu.dimension_semantics<parallel>], iteration_bounds = array<i64: 2>, scalar_prefetch = 0 : i64, scratch_operands = 0 : i64, tpu.core_type = #tpu.core_type<tc>, window_params = [{transform_indices = @transform_0, window_bounds = array<i64: 1, 8, 4>}, {transform_indices = @transform_1, window_bounds = array<i64: 1, 8, 8>}, {transform_indices = @transform_2, window_bounds = array<i64: 1, 8, 1>}, {pipeline_mode = #tpu.pipeline_mode<synchronous>, transform_indices = @transform_3, window_bounds = array<i64: 1, 4>}, {pipeline_mode = #tpu.pipeline_mode<synchronous>, transform_indices = @transform_4, window_bounds = array<i64: 1, 4>}, {pipeline_mode = #tpu.pipeline_mode<synchronous>, transform_indices = @transform_5, window_bounds = array<i64: 1, 4>}, {pipeline_mode = #tpu.pipeline_mode<synchronous>, transform_indices = @transform_6, window_bounds = array<i64: 1, 4>}, {pipeline_mode = #tpu.pipeline_mode<synchronous>, transform_indices = @transform_7, window_bounds = array<i64: 1, 1>}, {pipeline_mode = #tpu.pipeline_mode<synchronous>, transform_indices = @transform_8, window_bounds = array<i64: 1, 1>}, {pipeline_mode = #tpu.pipeline_mode<synchronous>, transform_indices = @transform_9, window_bounds = array<i64: 4, 32>}, {pipeline_mode = #tpu.pipeline_mode<synchronous>, transform_indices = @transform_10, window_bounds = array<i64: 1, 32>}, {pipeline_mode = #tpu.pipeline_mode<synchronous>, transform_indices = @transform_11, window_bounds = array<i64: 32, 32>}, {pipeline_mode = #tpu.pipeline_mode<synchronous>, transform_indices = @transform_12, window_bounds = array<i64: 1, 32>}, {pipeline_mode = #tpu.pipeline_mode<synchronous>, transform_indices = @transform_13, window_bounds = array<i64: 4, 32>}, {pipeline_mode = #tpu.pipeline_mode<synchronous>, transform_indices = @transform_14, window_bounds = array<i64: 1, 32>}, {pipeline_mode = #tpu.pipeline_mode<synchronous>, transform_indices = @transform_15, window_bounds = array<i64: 32, 32>}, {pipeline_mode = #tpu.pipeline_mode<synchronous>, transform_indices = @transform_16, window_bounds = array<i64: 1, 32>}, {pipeline_mode = #tpu.pipeline_mode<synchronous>, transform_indices = @transform_17, window_bounds = array<i64: 4, 32, 64>}, {pipeline_mode = #tpu.pipeline_mode<synchronous>, transform_indices = @transform_18, window_bounds = array<i64: 4, 1, 32>}, {pipeline_mode = #tpu.pipeline_mode<synchronous>, transform_indices = @transform_19, window_bounds = array<i64: 4, 1, 32>}, {pipeline_mode = #tpu.pipeline_mode<synchronous>, transform_indices = @transform_20, window_bounds = array<i64: 4, 32, 32>}, {pipeline_mode = #tpu.pipeline_mode<synchronous>, transform_indices = @transform_21, window_bounds = array<i64: 4, 32, 32>}, {pipeline_mode = #tpu.pipeline_mode<synchronous>, transform_indices = @transform_22, window_bounds = array<i64: 4, 1, 32>}, {pipeline_mode = #tpu.pipeline_mode<synchronous>, transform_indices = @transform_23, window_bounds = array<i64: 4, 32, 32>}, {pipeline_mode = #tpu.pipeline_mode<synchronous>, transform_indices = @transform_24, window_bounds = array<i64: 4, 1, 32>}, {pipeline_mode = #tpu.pipeline_mode<synchronous>, transform_indices = @transform_25, window_bounds = array<i64: 4, 32, 32>}, {pipeline_mode = #tpu.pipeline_mode<synchronous>, transform_indices = @transform_26, window_bounds = array<i64: 4, 1, 32>}, {pipeline_mode = #tpu.pipeline_mode<synchronous>, transform_indices = @transform_27, window_bounds = array<i64: 32, 32>}, {pipeline_mode = #tpu.pipeline_mode<synchronous>, transform_indices = @transform_28, window_bounds = array<i64: 1, 32>}, {pipeline_mode = #tpu.pipeline_mode<synchronous>, transform_indices = @transform_29, window_bounds = array<i64: 32, 1>}, {pipeline_mode = #tpu.pipeline_mode<synchronous>, transform_indices = @transform_30, window_bounds = array<i64: 1, 1>}, {transform_indices = @transform_31, window_bounds = array<i64: 1, 8, 1>}]} {
    %c0 = arith.constant 0 : index
    %c0_0 = arith.constant 0 : index
    %c0_1 = arith.constant 0 : index
    %0 = vector.load %arg1[%c0, %c0_0, %c0_1] : memref<1x8x4xf32, #tpu.memory_space<vmem>>, vector<1x8x4xf32>
    %1 = vector.shape_cast %0 : vector<1x8x4xf32> to vector<8x4xf32>
    %c0_2 = arith.constant 0 : index
    %c0_3 = arith.constant 0 : index
    %c0_4 = arith.constant 0 : index
    %2 = vector.load %arg2[%c0_2, %c0_3, %c0_4] : memref<1x8x8xf32, #tpu.memory_space<vmem>>, vector<1x8x8xf32>
    %3 = vector.shape_cast %2 : vector<1x8x8xf32> to vector<8x8xf32>
    %c0_5 = arith.constant 0 : index
    %c0_6 = arith.constant 0 : index
    %4 = vector.load %arg8[%c0_5, %c0_6] : memref<1x1xf32, #tpu.memory_space<vmem>>, vector<1x1xf32>
    %c0_7 = arith.constant 0 : index
    %c0_8 = arith.constant 0 : index
    %5 = vector.load %arg9[%c0_7, %c0_8] : memref<1x1xf32, #tpu.memory_space<vmem>>, vector<1x1xf32>
    %6 = tpu.transpose %3, [1, 0] : vector<8x8xf32> -> vector<8x8xf32>
    %7 = vector.broadcast %4 : vector<1x1xf32> to vector<8x8xf32>
    %8 = arith.addf %3, %7 : vector<8x8xf32>
    %9 = vector.broadcast %5 : vector<1x1xf32> to vector<8x8xf32>
    %10 = arith.mulf %8, %9 : vector<8x8xf32>
    %11 = vector.broadcast %4 : vector<1x1xf32> to vector<8x8xf32>
    %12 = arith.addf %6, %11 : vector<8x8xf32>
    %13 = vector.broadcast %5 : vector<1x1xf32> to vector<8x8xf32>
    %14 = arith.mulf %12, %13 : vector<8x8xf32>
    %cst = arith.constant dense<0.000000e+00> : vector<8xf32>
    %15 = vector.multi_reduction <add>, %6, %cst [1] : vector<8x8xf32> to vector<8xf32>
    %16 = vector.shape_cast %15 : vector<8xf32> to vector<8x1xf32>
    %cst_9 = arith.constant 8.000000e+00 : f32
    %17 = vector.broadcast %cst_9 : f32 to vector<8x1xf32>
    %18 = arith.divf %16, %17 : vector<8x1xf32>
    %cst_10 = arith.constant dense<0xFF800000> : vector<8xf32>
    %19 = vector.multi_reduction <maximumf>, %6, %cst_10 [1] : vector<8x8xf32> to vector<8xf32>
    %20 = vector.shape_cast %19 : vector<8xf32> to vector<8x1xf32>
    %cst_11 = arith.constant dense<0x7F800000> : vector<8xf32>
    %21 = vector.multi_reduction <minimumf>, %6, %cst_11 [1] : vector<8x8xf32> to vector<8xf32>
    %22 = vector.shape_cast %21 : vector<8xf32> to vector<8x1xf32>
    %cst_12 = arith.constant dense<0.000000e+00> : vector<8xf32>
    %23 = vector.multi_reduction <add>, %6, %cst_12 [1] : vector<8x8xf32> to vector<8xf32>
    %24 = vector.shape_cast %23 : vector<8xf32> to vector<8x1xf32>
    %25 = tpu.concatenate %18, %20, %22, %24 in 1 : vector<8x1xf32>, vector<8x1xf32>, vector<8x1xf32>, vector<8x1xf32> -> vector<8x4xf32>
    %c0_13 = arith.constant 0 : index
    %c0_14 = arith.constant 0 : index
    %26 = vector.load %arg4[%c0_13, %c0_14] : memref<1x4xf32, #tpu.memory_space<vmem>>, vector<1x4xf32>
    %27 = vector.broadcast %26 : vector<1x4xf32> to vector<8x4xf32>
    %28 = arith.addf %1, %27 : vector<8x4xf32>
    %c0_15 = arith.constant 0 : index
    %c0_16 = arith.constant 0 : index
    %29 = vector.load %arg5[%c0_15, %c0_16] : memref<1x4xf32, #tpu.memory_space<vmem>>, vector<1x4xf32>
    %30 = vector.broadcast %29 : vector<1x4xf32> to vector<8x4xf32>
    %31 = arith.mulf %28, %30 : vector<8x4xf32>
    %c0_17 = arith.constant 0 : index
    %c0_18 = arith.constant 0 : index
    %32 = vector.load %arg6[%c0_17, %c0_18] : memref<1x4xf32, #tpu.memory_space<vmem>>, vector<1x4xf32>
    %33 = vector.broadcast %32 : vector<1x4xf32> to vector<8x4xf32>
    %34 = arith.addf %25, %33 : vector<8x4xf32>
    %c0_19 = arith.constant 0 : index
    %c0_20 = arith.constant 0 : index
    %35 = vector.load %arg7[%c0_19, %c0_20] : memref<1x4xf32, #tpu.memory_space<vmem>>, vector<1x4xf32>
    %36 = vector.broadcast %35 : vector<1x4xf32> to vector<8x4xf32>
    %37 = arith.mulf %34, %36 : vector<8x4xf32>
    %c0_21 = arith.constant 0 : index
    %c0_22 = arith.constant 0 : index
    %38 = vector.load %arg10[%c0_21, %c0_22] : memref<4x32xf32, #tpu.memory_space<vmem>>, vector<4x32xf32>
    %c0_23 = arith.constant 0 : index
    %c0_24 = arith.constant 0 : index
    %39 = vector.load %arg11[%c0_23, %c0_24] : memref<1x32xf32, #tpu.memory_space<vmem>>, vector<1x32xf32>
    %c0_25 = arith.constant 0 : index
    %c0_26 = arith.constant 0 : index
    %40 = vector.load %arg12[%c0_25, %c0_26] : memref<32x32xf32, #tpu.memory_space<vmem>>, vector<32x32xf32>
    %c0_27 = arith.constant 0 : index
    %c0_28 = arith.constant 0 : index
    %41 = vector.load %arg13[%c0_27, %c0_28] : memref<1x32xf32, #tpu.memory_space<vmem>>, vector<1x32xf32>
    %cst_29 = arith.constant dense<0.000000e+00> : vector<8x32xf32>
    %42 = tpu.matmul %31, %38, %cst_29 {dimension_numbers = #tpu.dot_dimension_numbers<[1], [0], [0], [1], [0, 0, 1, 1], [], []>} : vector<8x4xf32>, vector<4x32xf32>, vector<8x32xf32> -> vector<8x32xf32>
    %43 = vector.broadcast %39 : vector<1x32xf32> to vector<8x32xf32>
    %44 = arith.addf %42, %43 : vector<8x32xf32>
    %cst_30 = arith.constant 0.000000e+00 : f32
    %45 = vector.broadcast %cst_30 : f32 to vector<8x32xf32>
    %46 = arith.maximumf %44, %45 : vector<8x32xf32>
    %cst_31 = arith.constant dense<0.000000e+00> : vector<8x32xf32>
    %47 = tpu.matmul %46, %40, %cst_31 {dimension_numbers = #tpu.dot_dimension_numbers<[1], [0], [0], [1], [0, 0, 1, 1], [], []>} : vector<8x32xf32>, vector<32x32xf32>, vector<8x32xf32> -> vector<8x32xf32>
    %48 = vector.broadcast %41 : vector<1x32xf32> to vector<8x32xf32>
    %49 = arith.addf %47, %48 : vector<8x32xf32>
    %cst_32 = arith.constant 0.000000e+00 : f32
    %50 = vector.broadcast %cst_32 : f32 to vector<8x32xf32>
    %51 = arith.maximumf %49, %50 : vector<8x32xf32>
    %c0_33 = arith.constant 0 : index
    %c0_34 = arith.constant 0 : index
    %52 = vector.load %arg14[%c0_33, %c0_34] : memref<4x32xf32, #tpu.memory_space<vmem>>, vector<4x32xf32>
    %c0_35 = arith.constant 0 : index
    %c0_36 = arith.constant 0 : index
    %53 = vector.load %arg15[%c0_35, %c0_36] : memref<1x32xf32, #tpu.memory_space<vmem>>, vector<1x32xf32>
    %c0_37 = arith.constant 0 : index
    %c0_38 = arith.constant 0 : index
    %54 = vector.load %arg16[%c0_37, %c0_38] : memref<32x32xf32, #tpu.memory_space<vmem>>, vector<32x32xf32>
    %c0_39 = arith.constant 0 : index
    %c0_40 = arith.constant 0 : index
    %55 = vector.load %arg17[%c0_39, %c0_40] : memref<1x32xf32, #tpu.memory_space<vmem>>, vector<1x32xf32>
    %cst_41 = arith.constant dense<0.000000e+00> : vector<8x32xf32>
    %56 = tpu.matmul %37, %52, %cst_41 {dimension_numbers = #tpu.dot_dimension_numbers<[1], [0], [0], [1], [0, 0, 1, 1], [], []>} : vector<8x4xf32>, vector<4x32xf32>, vector<8x32xf32> -> vector<8x32xf32>
    %57 = vector.broadcast %53 : vector<1x32xf32> to vector<8x32xf32>
    %58 = arith.addf %56, %57 : vector<8x32xf32>
    %cst_42 = arith.constant 0.000000e+00 : f32
    %59 = vector.broadcast %cst_42 : f32 to vector<8x32xf32>
    %60 = arith.maximumf %58, %59 : vector<8x32xf32>
    %cst_43 = arith.constant dense<0.000000e+00> : vector<8x32xf32>
    %61 = tpu.matmul %60, %54, %cst_43 {dimension_numbers = #tpu.dot_dimension_numbers<[1], [0], [0], [1], [0, 0, 1, 1], [], []>} : vector<8x32xf32>, vector<32x32xf32>, vector<8x32xf32> -> vector<8x32xf32>
    %62 = vector.broadcast %55 : vector<1x32xf32> to vector<8x32xf32>
    %63 = arith.addf %61, %62 : vector<8x32xf32>
    %cst_44 = arith.constant 0.000000e+00 : f32
    %64 = vector.broadcast %cst_44 : f32 to vector<8x32xf32>
    %65 = arith.maximumf %63, %64 : vector<8x32xf32>
    %c0_45 = arith.constant 0 : index
    %c0_46 = arith.constant 0 : index
    %c0_47 = arith.constant 0 : index
    %66 = vector.load %arg18[%c0_45, %c0_46, %c0_47] : memref<4x32x64xf32, #tpu.memory_space<vmem>>, vector<1x32x64xf32>
    %67 = vector.shape_cast %66 : vector<1x32x64xf32> to vector<32x64xf32>
    %cst_48 = arith.constant dense<0.000000e+00> : vector<8x64xf32>
    %68 = tpu.matmul %51, %67, %cst_48 {dimension_numbers = #tpu.dot_dimension_numbers<[1], [0], [0], [1], [0, 0, 1, 1], [], []>} : vector<8x32xf32>, vector<32x64xf32>, vector<8x64xf32> -> vector<8x64xf32>
    %69 = vector.extract_strided_slice %68 {offsets = [0, 0], sizes = [8, 32], strides = [1, 1]} : vector<8x64xf32> to vector<8x32xf32>
    %c0_49 = arith.constant 0 : index
    %c0_50 = arith.constant 0 : index
    %c0_51 = arith.constant 0 : index
    %70 = vector.load %arg19[%c0_49, %c0_50, %c0_51] : memref<4x1x32xf32, #tpu.memory_space<vmem>>, vector<1x1x32xf32>
    %71 = vector.shape_cast %70 : vector<1x1x32xf32> to vector<1x32xf32>
    %72 = vector.broadcast %71 : vector<1x32xf32> to vector<8x32xf32>
    %73 = arith.addf %69, %72 : vector<8x32xf32>
    %74 = vector.extract_strided_slice %68 {offsets = [0, 32], sizes = [8, 32], strides = [1, 1]} : vector<8x64xf32> to vector<8x32xf32>
    %c0_52 = arith.constant 0 : index
    %c0_53 = arith.constant 0 : index
    %c0_54 = arith.constant 0 : index
    %75 = vector.load %arg21[%c0_52, %c0_53, %c0_54] : memref<4x32x32xf32, #tpu.memory_space<vmem>>, vector<1x32x32xf32>
    %76 = vector.shape_cast %75 : vector<1x32x32xf32> to vector<32x32xf32>
    %cst_55 = arith.constant dense<0.000000e+00> : vector<8x32xf32>
    %77 = tpu.matmul %65, %76, %cst_55 {dimension_numbers = #tpu.dot_dimension_numbers<[1], [0], [0], [1], [0, 0, 1, 1], [], []>} : vector<8x32xf32>, vector<32x32xf32>, vector<8x32xf32> -> vector<8x32xf32>
    %c0_56 = arith.constant 0 : index
    %c0_57 = arith.constant 0 : index
    %c0_58 = arith.constant 0 : index
    %78 = vector.load %arg20[%c0_56, %c0_57, %c0_58] : memref<4x1x32xf32, #tpu.memory_space<vmem>>, vector<1x1x32xf32>
    %79 = vector.shape_cast %78 : vector<1x1x32xf32> to vector<1x32xf32>
    %80 = vector.shape_cast %79 : vector<1x32xf32> to vector<1x1x32xf32>
    %81 = vector.shape_cast %73 : vector<8x32xf32> to vector<1x8x32xf32>
    %82 = vector.shape_cast %77 : vector<8x32xf32> to vector<8x1x32xf32>
    %83 = vector.broadcast %81 : vector<1x8x32xf32> to vector<8x8x32xf32>
    %84 = vector.broadcast %82 : vector<8x1x32xf32> to vector<8x8x32xf32>
    %85 = arith.addf %83, %84 : vector<8x8x32xf32>
    %86 = vector.shape_cast %14 : vector<8x8xf32> to vector<8x8x1xf32>
    %87 = vector.broadcast %86 : vector<8x8x1xf32> to vector<8x8x32xf32>
    %88 = vector.broadcast %80 : vector<1x1x32xf32> to vector<8x8x32xf32>
    %89 = arith.mulf %87, %88 : vector<8x8x32xf32>
    %90 = arith.addf %85, %89 : vector<8x8x32xf32>
    %cst_59 = arith.constant 0.000000e+00 : f32
    %91 = vector.broadcast %cst_59 : f32 to vector<8x8x32xf32>
    %92 = arith.maximumf %90, %91 : vector<8x8x32xf32>
    %cst_60 = arith.constant dense<0.000000e+00> : vector<8x32xf32>
    %93 = vector.multi_reduction <add>, %92, %cst_60 [0] : vector<8x8x32xf32> to vector<8x32xf32>
    %c0_61 = arith.constant 0 : index
    %c0_62 = arith.constant 0 : index
    %c0_63 = arith.constant 0 : index
    %94 = vector.load %arg22[%c0_61, %c0_62, %c0_63] : memref<4x32x32xf32, #tpu.memory_space<vmem>>, vector<1x32x32xf32>
    %95 = vector.shape_cast %94 : vector<1x32x32xf32> to vector<32x32xf32>
    %cst_64 = arith.constant dense<0.000000e+00> : vector<8x32xf32>
    %96 = tpu.matmul %93, %95, %cst_64 {dimension_numbers = #tpu.dot_dimension_numbers<[1], [0], [0], [1], [0, 0, 1, 1], [], []>} : vector<8x32xf32>, vector<32x32xf32>, vector<8x32xf32> -> vector<8x32xf32>
    %c0_65 = arith.constant 0 : index
    %c0_66 = arith.constant 0 : index
    %c0_67 = arith.constant 0 : index
    %97 = vector.load %arg23[%c0_65, %c0_66, %c0_67] : memref<4x1x32xf32, #tpu.memory_space<vmem>>, vector<1x1x32xf32>
    %98 = vector.shape_cast %97 : vector<1x1x32xf32> to vector<1x32xf32>
    %cst_68 = arith.constant 8.000000e+00 : f32
    %99 = vector.broadcast %cst_68 : f32 to vector<1x32xf32>
    %100 = arith.mulf %99, %98 : vector<1x32xf32>
    %101 = vector.broadcast %100 : vector<1x32xf32> to vector<8x32xf32>
    %102 = arith.addf %96, %101 : vector<8x32xf32>
    %c0_69 = arith.constant 0 : index
    %c0_70 = arith.constant 0 : index
    %c0_71 = arith.constant 0 : index
    %103 = vector.load %arg24[%c0_69, %c0_70, %c0_71] : memref<4x32x32xf32, #tpu.memory_space<vmem>>, vector<1x32x32xf32>
    %104 = vector.shape_cast %103 : vector<1x32x32xf32> to vector<32x32xf32>
    %cst_72 = arith.constant dense<0.000000e+00> : vector<8x32xf32>
    %105 = tpu.matmul %102, %104, %cst_72 {dimension_numbers = #tpu.dot_dimension_numbers<[1], [0], [0], [1], [0, 0, 1, 1], [], []>} : vector<8x32xf32>, vector<32x32xf32>, vector<8x32xf32> -> vector<8x32xf32>
    %106 = arith.addf %105, %74 : vector<8x32xf32>
    %c0_73 = arith.constant 0 : index
    %c0_74 = arith.constant 0 : index
    %c0_75 = arith.constant 0 : index
    %107 = vector.load %arg25[%c0_73, %c0_74, %c0_75] : memref<4x1x32xf32, #tpu.memory_space<vmem>>, vector<1x1x32xf32>
    %108 = vector.shape_cast %107 : vector<1x1x32xf32> to vector<1x32xf32>
    %109 = vector.broadcast %108 : vector<1x32xf32> to vector<8x32xf32>
    %110 = arith.addf %106, %109 : vector<8x32xf32>
    %cst_76 = arith.constant 0.000000e+00 : f32
    %111 = vector.broadcast %cst_76 : f32 to vector<8x32xf32>
    %112 = arith.maximumf %110, %111 : vector<8x32xf32>
    %c0_77 = arith.constant 0 : index
    %c0_78 = arith.constant 0 : index
    %c0_79 = arith.constant 0 : index
    %113 = vector.load %arg26[%c0_77, %c0_78, %c0_79] : memref<4x32x32xf32, #tpu.memory_space<vmem>>, vector<1x32x32xf32>
    %114 = vector.shape_cast %113 : vector<1x32x32xf32> to vector<32x32xf32>
    %cst_80 = arith.constant dense<0.000000e+00> : vector<8x32xf32>
    %115 = tpu.matmul %112, %114, %cst_80 {dimension_numbers = #tpu.dot_dimension_numbers<[1], [0], [0], [1], [0, 0, 1, 1], [], []>} : vector<8x32xf32>, vector<32x32xf32>, vector<8x32xf32> -> vector<8x32xf32>
    %c0_81 = arith.constant 0 : index
    %c0_82 = arith.constant 0 : index
    %c0_83 = arith.constant 0 : index
    %116 = vector.load %arg27[%c0_81, %c0_82, %c0_83] : memref<4x1x32xf32, #tpu.memory_space<vmem>>, vector<1x1x32xf32>
    %117 = vector.shape_cast %116 : vector<1x1x32xf32> to vector<1x32xf32>
    %118 = vector.broadcast %117 : vector<1x32xf32> to vector<8x32xf32>
    %119 = arith.addf %115, %118 : vector<8x32xf32>
    %c1 = arith.constant 1 : index
    %c0_84 = arith.constant 0 : index
    %c0_85 = arith.constant 0 : index
    %120 = vector.load %arg18[%c1, %c0_84, %c0_85] : memref<4x32x64xf32, #tpu.memory_space<vmem>>, vector<1x32x64xf32>
    %121 = vector.shape_cast %120 : vector<1x32x64xf32> to vector<32x64xf32>
    %cst_86 = arith.constant dense<0.000000e+00> : vector<8x64xf32>
    %122 = tpu.matmul %119, %121, %cst_86 {dimension_numbers = #tpu.dot_dimension_numbers<[1], [0], [0], [1], [0, 0, 1, 1], [], []>} : vector<8x32xf32>, vector<32x64xf32>, vector<8x64xf32> -> vector<8x64xf32>
    %123 = vector.extract_strided_slice %122 {offsets = [0, 0], sizes = [8, 32], strides = [1, 1]} : vector<8x64xf32> to vector<8x32xf32>
    %c1_87 = arith.constant 1 : index
    %c0_88 = arith.constant 0 : index
    %c0_89 = arith.constant 0 : index
    %124 = vector.load %arg19[%c1_87, %c0_88, %c0_89] : memref<4x1x32xf32, #tpu.memory_space<vmem>>, vector<1x1x32xf32>
    %125 = vector.shape_cast %124 : vector<1x1x32xf32> to vector<1x32xf32>
    %126 = vector.broadcast %125 : vector<1x32xf32> to vector<8x32xf32>
    %127 = arith.addf %123, %126 : vector<8x32xf32>
    %128 = vector.extract_strided_slice %122 {offsets = [0, 32], sizes = [8, 32], strides = [1, 1]} : vector<8x64xf32> to vector<8x32xf32>
    %c1_90 = arith.constant 1 : index
    %c0_91 = arith.constant 0 : index
    %c0_92 = arith.constant 0 : index
    %129 = vector.load %arg21[%c1_90, %c0_91, %c0_92] : memref<4x32x32xf32, #tpu.memory_space<vmem>>, vector<1x32x32xf32>
    %130 = vector.shape_cast %129 : vector<1x32x32xf32> to vector<32x32xf32>
    %cst_93 = arith.constant dense<0.000000e+00> : vector<8x32xf32>
    %131 = tpu.matmul %51, %130, %cst_93 {dimension_numbers = #tpu.dot_dimension_numbers<[1], [0], [0], [1], [0, 0, 1, 1], [], []>} : vector<8x32xf32>, vector<32x32xf32>, vector<8x32xf32> -> vector<8x32xf32>
    %c1_94 = arith.constant 1 : index
    %c0_95 = arith.constant 0 : index
    %c0_96 = arith.constant 0 : index
    %132 = vector.load %arg20[%c1_94, %c0_95, %c0_96] : memref<4x1x32xf32, #tpu.memory_space<vmem>>, vector<1x1x32xf32>
    %133 = vector.shape_cast %132 : vector<1x1x32xf32> to vector<1x32xf32>
    %134 = vector.shape_cast %133 : vector<1x32xf32> to vector<1x1x32xf32>
    %135 = vector.shape_cast %127 : vector<8x32xf32> to vector<1x8x32xf32>
    %136 = vector.shape_cast %131 : vector<8x32xf32> to vector<8x1x32xf32>
    %137 = vector.broadcast %135 : vector<1x8x32xf32> to vector<8x8x32xf32>
    %138 = vector.broadcast %136 : vector<8x1x32xf32> to vector<8x8x32xf32>
    %139 = arith.addf %137, %138 : vector<8x8x32xf32>
    %140 = vector.shape_cast %10 : vector<8x8xf32> to vector<8x8x1xf32>
    %141 = vector.broadcast %140 : vector<8x8x1xf32> to vector<8x8x32xf32>
    %142 = vector.broadcast %134 : vector<1x1x32xf32> to vector<8x8x32xf32>
    %143 = arith.mulf %141, %142 : vector<8x8x32xf32>
    %144 = arith.addf %139, %143 : vector<8x8x32xf32>
    %cst_97 = arith.constant 0.000000e+00 : f32
    %145 = vector.broadcast %cst_97 : f32 to vector<8x8x32xf32>
    %146 = arith.maximumf %144, %145 : vector<8x8x32xf32>
    %cst_98 = arith.constant dense<0.000000e+00> : vector<8x32xf32>
    %147 = vector.multi_reduction <add>, %146, %cst_98 [0] : vector<8x8x32xf32> to vector<8x32xf32>
    %c1_99 = arith.constant 1 : index
    %c0_100 = arith.constant 0 : index
    %c0_101 = arith.constant 0 : index
    %148 = vector.load %arg22[%c1_99, %c0_100, %c0_101] : memref<4x32x32xf32, #tpu.memory_space<vmem>>, vector<1x32x32xf32>
    %149 = vector.shape_cast %148 : vector<1x32x32xf32> to vector<32x32xf32>
    %cst_102 = arith.constant dense<0.000000e+00> : vector<8x32xf32>
    %150 = tpu.matmul %147, %149, %cst_102 {dimension_numbers = #tpu.dot_dimension_numbers<[1], [0], [0], [1], [0, 0, 1, 1], [], []>} : vector<8x32xf32>, vector<32x32xf32>, vector<8x32xf32> -> vector<8x32xf32>
    %c1_103 = arith.constant 1 : index
    %c0_104 = arith.constant 0 : index
    %c0_105 = arith.constant 0 : index
    %151 = vector.load %arg23[%c1_103, %c0_104, %c0_105] : memref<4x1x32xf32, #tpu.memory_space<vmem>>, vector<1x1x32xf32>
    %152 = vector.shape_cast %151 : vector<1x1x32xf32> to vector<1x32xf32>
    %cst_106 = arith.constant 8.000000e+00 : f32
    %153 = vector.broadcast %cst_106 : f32 to vector<1x32xf32>
    %154 = arith.mulf %153, %152 : vector<1x32xf32>
    %155 = vector.broadcast %154 : vector<1x32xf32> to vector<8x32xf32>
    %156 = arith.addf %150, %155 : vector<8x32xf32>
    %c1_107 = arith.constant 1 : index
    %c0_108 = arith.constant 0 : index
    %c0_109 = arith.constant 0 : index
    %157 = vector.load %arg24[%c1_107, %c0_108, %c0_109] : memref<4x32x32xf32, #tpu.memory_space<vmem>>, vector<1x32x32xf32>
    %158 = vector.shape_cast %157 : vector<1x32x32xf32> to vector<32x32xf32>
    %cst_110 = arith.constant dense<0.000000e+00> : vector<8x32xf32>
    %159 = tpu.matmul %156, %158, %cst_110 {dimension_numbers = #tpu.dot_dimension_numbers<[1], [0], [0], [1], [0, 0, 1, 1], [], []>} : vector<8x32xf32>, vector<32x32xf32>, vector<8x32xf32> -> vector<8x32xf32>
    %160 = arith.addf %159, %128 : vector<8x32xf32>
    %c1_111 = arith.constant 1 : index
    %c0_112 = arith.constant 0 : index
    %c0_113 = arith.constant 0 : index
    %161 = vector.load %arg25[%c1_111, %c0_112, %c0_113] : memref<4x1x32xf32, #tpu.memory_space<vmem>>, vector<1x1x32xf32>
    %162 = vector.shape_cast %161 : vector<1x1x32xf32> to vector<1x32xf32>
    %163 = vector.broadcast %162 : vector<1x32xf32> to vector<8x32xf32>
    %164 = arith.addf %160, %163 : vector<8x32xf32>
    %cst_114 = arith.constant 0.000000e+00 : f32
    %165 = vector.broadcast %cst_114 : f32 to vector<8x32xf32>
    %166 = arith.maximumf %164, %165 : vector<8x32xf32>
    %c1_115 = arith.constant 1 : index
    %c0_116 = arith.constant 0 : index
    %c0_117 = arith.constant 0 : index
    %167 = vector.load %arg26[%c1_115, %c0_116, %c0_117] : memref<4x32x32xf32, #tpu.memory_space<vmem>>, vector<1x32x32xf32>
    %168 = vector.shape_cast %167 : vector<1x32x32xf32> to vector<32x32xf32>
    %cst_118 = arith.constant dense<0.000000e+00> : vector<8x32xf32>
    %169 = tpu.matmul %166, %168, %cst_118 {dimension_numbers = #tpu.dot_dimension_numbers<[1], [0], [0], [1], [0, 0, 1, 1], [], []>} : vector<8x32xf32>, vector<32x32xf32>, vector<8x32xf32> -> vector<8x32xf32>
    %c1_119 = arith.constant 1 : index
    %c0_120 = arith.constant 0 : index
    %c0_121 = arith.constant 0 : index
    %170 = vector.load %arg27[%c1_119, %c0_120, %c0_121] : memref<4x1x32xf32, #tpu.memory_space<vmem>>, vector<1x1x32xf32>
    %171 = vector.shape_cast %170 : vector<1x1x32xf32> to vector<1x32xf32>
    %172 = vector.broadcast %171 : vector<1x32xf32> to vector<8x32xf32>
    %173 = arith.addf %169, %172 : vector<8x32xf32>
    %c2 = arith.constant 2 : index
    %c0_122 = arith.constant 0 : index
    %c0_123 = arith.constant 0 : index
    %174 = vector.load %arg18[%c2, %c0_122, %c0_123] : memref<4x32x64xf32, #tpu.memory_space<vmem>>, vector<1x32x64xf32>
    %175 = vector.shape_cast %174 : vector<1x32x64xf32> to vector<32x64xf32>
    %cst_124 = arith.constant dense<0.000000e+00> : vector<8x64xf32>
    %176 = tpu.matmul %173, %175, %cst_124 {dimension_numbers = #tpu.dot_dimension_numbers<[1], [0], [0], [1], [0, 0, 1, 1], [], []>} : vector<8x32xf32>, vector<32x64xf32>, vector<8x64xf32> -> vector<8x64xf32>
    %177 = vector.extract_strided_slice %176 {offsets = [0, 0], sizes = [8, 32], strides = [1, 1]} : vector<8x64xf32> to vector<8x32xf32>
    %c2_125 = arith.constant 2 : index
    %c0_126 = arith.constant 0 : index
    %c0_127 = arith.constant 0 : index
    %178 = vector.load %arg19[%c2_125, %c0_126, %c0_127] : memref<4x1x32xf32, #tpu.memory_space<vmem>>, vector<1x1x32xf32>
    %179 = vector.shape_cast %178 : vector<1x1x32xf32> to vector<1x32xf32>
    %180 = vector.broadcast %179 : vector<1x32xf32> to vector<8x32xf32>
    %181 = arith.addf %177, %180 : vector<8x32xf32>
    %182 = vector.extract_strided_slice %176 {offsets = [0, 32], sizes = [8, 32], strides = [1, 1]} : vector<8x64xf32> to vector<8x32xf32>
    %c2_128 = arith.constant 2 : index
    %c0_129 = arith.constant 0 : index
    %c0_130 = arith.constant 0 : index
    %183 = vector.load %arg21[%c2_128, %c0_129, %c0_130] : memref<4x32x32xf32, #tpu.memory_space<vmem>>, vector<1x32x32xf32>
    %184 = vector.shape_cast %183 : vector<1x32x32xf32> to vector<32x32xf32>
    %cst_131 = arith.constant dense<0.000000e+00> : vector<8x32xf32>
    %185 = tpu.matmul %119, %184, %cst_131 {dimension_numbers = #tpu.dot_dimension_numbers<[1], [0], [0], [1], [0, 0, 1, 1], [], []>} : vector<8x32xf32>, vector<32x32xf32>, vector<8x32xf32> -> vector<8x32xf32>
    %c2_132 = arith.constant 2 : index
    %c0_133 = arith.constant 0 : index
    %c0_134 = arith.constant 0 : index
    %186 = vector.load %arg20[%c2_132, %c0_133, %c0_134] : memref<4x1x32xf32, #tpu.memory_space<vmem>>, vector<1x1x32xf32>
    %187 = vector.shape_cast %186 : vector<1x1x32xf32> to vector<1x32xf32>
    %188 = vector.shape_cast %187 : vector<1x32xf32> to vector<1x1x32xf32>
    %189 = vector.shape_cast %181 : vector<8x32xf32> to vector<1x8x32xf32>
    %190 = vector.shape_cast %185 : vector<8x32xf32> to vector<8x1x32xf32>
    %191 = vector.broadcast %189 : vector<1x8x32xf32> to vector<8x8x32xf32>
    %192 = vector.broadcast %190 : vector<8x1x32xf32> to vector<8x8x32xf32>
    %193 = arith.addf %191, %192 : vector<8x8x32xf32>
    %194 = vector.shape_cast %14 : vector<8x8xf32> to vector<8x8x1xf32>
    %195 = vector.broadcast %194 : vector<8x8x1xf32> to vector<8x8x32xf32>
    %196 = vector.broadcast %188 : vector<1x1x32xf32> to vector<8x8x32xf32>
    %197 = arith.mulf %195, %196 : vector<8x8x32xf32>
    %198 = arith.addf %193, %197 : vector<8x8x32xf32>
    %cst_135 = arith.constant 0.000000e+00 : f32
    %199 = vector.broadcast %cst_135 : f32 to vector<8x8x32xf32>
    %200 = arith.maximumf %198, %199 : vector<8x8x32xf32>
    %cst_136 = arith.constant dense<0.000000e+00> : vector<8x32xf32>
    %201 = vector.multi_reduction <add>, %200, %cst_136 [0] : vector<8x8x32xf32> to vector<8x32xf32>
    %c2_137 = arith.constant 2 : index
    %c0_138 = arith.constant 0 : index
    %c0_139 = arith.constant 0 : index
    %202 = vector.load %arg22[%c2_137, %c0_138, %c0_139] : memref<4x32x32xf32, #tpu.memory_space<vmem>>, vector<1x32x32xf32>
    %203 = vector.shape_cast %202 : vector<1x32x32xf32> to vector<32x32xf32>
    %cst_140 = arith.constant dense<0.000000e+00> : vector<8x32xf32>
    %204 = tpu.matmul %201, %203, %cst_140 {dimension_numbers = #tpu.dot_dimension_numbers<[1], [0], [0], [1], [0, 0, 1, 1], [], []>} : vector<8x32xf32>, vector<32x32xf32>, vector<8x32xf32> -> vector<8x32xf32>
    %c2_141 = arith.constant 2 : index
    %c0_142 = arith.constant 0 : index
    %c0_143 = arith.constant 0 : index
    %205 = vector.load %arg23[%c2_141, %c0_142, %c0_143] : memref<4x1x32xf32, #tpu.memory_space<vmem>>, vector<1x1x32xf32>
    %206 = vector.shape_cast %205 : vector<1x1x32xf32> to vector<1x32xf32>
    %cst_144 = arith.constant 8.000000e+00 : f32
    %207 = vector.broadcast %cst_144 : f32 to vector<1x32xf32>
    %208 = arith.mulf %207, %206 : vector<1x32xf32>
    %209 = vector.broadcast %208 : vector<1x32xf32> to vector<8x32xf32>
    %210 = arith.addf %204, %209 : vector<8x32xf32>
    %c2_145 = arith.constant 2 : index
    %c0_146 = arith.constant 0 : index
    %c0_147 = arith.constant 0 : index
    %211 = vector.load %arg24[%c2_145, %c0_146, %c0_147] : memref<4x32x32xf32, #tpu.memory_space<vmem>>, vector<1x32x32xf32>
    %212 = vector.shape_cast %211 : vector<1x32x32xf32> to vector<32x32xf32>
    %cst_148 = arith.constant dense<0.000000e+00> : vector<8x32xf32>
    %213 = tpu.matmul %210, %212, %cst_148 {dimension_numbers = #tpu.dot_dimension_numbers<[1], [0], [0], [1], [0, 0, 1, 1], [], []>} : vector<8x32xf32>, vector<32x32xf32>, vector<8x32xf32> -> vector<8x32xf32>
    %214 = arith.addf %213, %182 : vector<8x32xf32>
    %c2_149 = arith.constant 2 : index
    %c0_150 = arith.constant 0 : index
    %c0_151 = arith.constant 0 : index
    %215 = vector.load %arg25[%c2_149, %c0_150, %c0_151] : memref<4x1x32xf32, #tpu.memory_space<vmem>>, vector<1x1x32xf32>
    %216 = vector.shape_cast %215 : vector<1x1x32xf32> to vector<1x32xf32>
    %217 = vector.broadcast %216 : vector<1x32xf32> to vector<8x32xf32>
    %218 = arith.addf %214, %217 : vector<8x32xf32>
    %cst_152 = arith.constant 0.000000e+00 : f32
    %219 = vector.broadcast %cst_152 : f32 to vector<8x32xf32>
    %220 = arith.maximumf %218, %219 : vector<8x32xf32>
    %c2_153 = arith.constant 2 : index
    %c0_154 = arith.constant 0 : index
    %c0_155 = arith.constant 0 : index
    %221 = vector.load %arg26[%c2_153, %c0_154, %c0_155] : memref<4x32x32xf32, #tpu.memory_space<vmem>>, vector<1x32x32xf32>
    %222 = vector.shape_cast %221 : vector<1x32x32xf32> to vector<32x32xf32>
    %cst_156 = arith.constant dense<0.000000e+00> : vector<8x32xf32>
    %223 = tpu.matmul %220, %222, %cst_156 {dimension_numbers = #tpu.dot_dimension_numbers<[1], [0], [0], [1], [0, 0, 1, 1], [], []>} : vector<8x32xf32>, vector<32x32xf32>, vector<8x32xf32> -> vector<8x32xf32>
    %c2_157 = arith.constant 2 : index
    %c0_158 = arith.constant 0 : index
    %c0_159 = arith.constant 0 : index
    %224 = vector.load %arg27[%c2_157, %c0_158, %c0_159] : memref<4x1x32xf32, #tpu.memory_space<vmem>>, vector<1x1x32xf32>
    %225 = vector.shape_cast %224 : vector<1x1x32xf32> to vector<1x32xf32>
    %226 = vector.broadcast %225 : vector<1x32xf32> to vector<8x32xf32>
    %227 = arith.addf %223, %226 : vector<8x32xf32>
    %c3 = arith.constant 3 : index
    %c0_160 = arith.constant 0 : index
    %c0_161 = arith.constant 0 : index
    %228 = vector.load %arg18[%c3, %c0_160, %c0_161] : memref<4x32x64xf32, #tpu.memory_space<vmem>>, vector<1x32x64xf32>
    %229 = vector.shape_cast %228 : vector<1x32x64xf32> to vector<32x64xf32>
    %cst_162 = arith.constant dense<0.000000e+00> : vector<8x64xf32>
    %230 = tpu.matmul %227, %229, %cst_162 {dimension_numbers = #tpu.dot_dimension_numbers<[1], [0], [0], [1], [0, 0, 1, 1], [], []>} : vector<8x32xf32>, vector<32x64xf32>, vector<8x64xf32> -> vector<8x64xf32>
    %231 = vector.extract_strided_slice %230 {offsets = [0, 0], sizes = [8, 32], strides = [1, 1]} : vector<8x64xf32> to vector<8x32xf32>
    %c3_163 = arith.constant 3 : index
    %c0_164 = arith.constant 0 : index
    %c0_165 = arith.constant 0 : index
    %232 = vector.load %arg19[%c3_163, %c0_164, %c0_165] : memref<4x1x32xf32, #tpu.memory_space<vmem>>, vector<1x1x32xf32>
    %233 = vector.shape_cast %232 : vector<1x1x32xf32> to vector<1x32xf32>
    %234 = vector.broadcast %233 : vector<1x32xf32> to vector<8x32xf32>
    %235 = arith.addf %231, %234 : vector<8x32xf32>
    %236 = vector.extract_strided_slice %230 {offsets = [0, 32], sizes = [8, 32], strides = [1, 1]} : vector<8x64xf32> to vector<8x32xf32>
    %c3_166 = arith.constant 3 : index
    %c0_167 = arith.constant 0 : index
    %c0_168 = arith.constant 0 : index
    %237 = vector.load %arg21[%c3_166, %c0_167, %c0_168] : memref<4x32x32xf32, #tpu.memory_space<vmem>>, vector<1x32x32xf32>
    %238 = vector.shape_cast %237 : vector<1x32x32xf32> to vector<32x32xf32>
    %cst_169 = arith.constant dense<0.000000e+00> : vector<8x32xf32>
    %239 = tpu.matmul %173, %238, %cst_169 {dimension_numbers = #tpu.dot_dimension_numbers<[1], [0], [0], [1], [0, 0, 1, 1], [], []>} : vector<8x32xf32>, vector<32x32xf32>, vector<8x32xf32> -> vector<8x32xf32>
    %c3_170 = arith.constant 3 : index
    %c0_171 = arith.constant 0 : index
    %c0_172 = arith.constant 0 : index
    %240 = vector.load %arg20[%c3_170, %c0_171, %c0_172] : memref<4x1x32xf32, #tpu.memory_space<vmem>>, vector<1x1x32xf32>
    %241 = vector.shape_cast %240 : vector<1x1x32xf32> to vector<1x32xf32>
    %242 = vector.shape_cast %241 : vector<1x32xf32> to vector<1x1x32xf32>
    %243 = vector.shape_cast %235 : vector<8x32xf32> to vector<1x8x32xf32>
    %244 = vector.shape_cast %239 : vector<8x32xf32> to vector<8x1x32xf32>
    %245 = vector.broadcast %243 : vector<1x8x32xf32> to vector<8x8x32xf32>
    %246 = vector.broadcast %244 : vector<8x1x32xf32> to vector<8x8x32xf32>
    %247 = arith.addf %245, %246 : vector<8x8x32xf32>
    %248 = vector.shape_cast %10 : vector<8x8xf32> to vector<8x8x1xf32>
    %249 = vector.broadcast %248 : vector<8x8x1xf32> to vector<8x8x32xf32>
    %250 = vector.broadcast %242 : vector<1x1x32xf32> to vector<8x8x32xf32>
    %251 = arith.mulf %249, %250 : vector<8x8x32xf32>
    %252 = arith.addf %247, %251 : vector<8x8x32xf32>
    %cst_173 = arith.constant 0.000000e+00 : f32
    %253 = vector.broadcast %cst_173 : f32 to vector<8x8x32xf32>
    %254 = arith.maximumf %252, %253 : vector<8x8x32xf32>
    %cst_174 = arith.constant dense<0.000000e+00> : vector<8x32xf32>
    %255 = vector.multi_reduction <add>, %254, %cst_174 [0] : vector<8x8x32xf32> to vector<8x32xf32>
    %c3_175 = arith.constant 3 : index
    %c0_176 = arith.constant 0 : index
    %c0_177 = arith.constant 0 : index
    %256 = vector.load %arg22[%c3_175, %c0_176, %c0_177] : memref<4x32x32xf32, #tpu.memory_space<vmem>>, vector<1x32x32xf32>
    %257 = vector.shape_cast %256 : vector<1x32x32xf32> to vector<32x32xf32>
    %cst_178 = arith.constant dense<0.000000e+00> : vector<8x32xf32>
    %258 = tpu.matmul %255, %257, %cst_178 {dimension_numbers = #tpu.dot_dimension_numbers<[1], [0], [0], [1], [0, 0, 1, 1], [], []>} : vector<8x32xf32>, vector<32x32xf32>, vector<8x32xf32> -> vector<8x32xf32>
    %c3_179 = arith.constant 3 : index
    %c0_180 = arith.constant 0 : index
    %c0_181 = arith.constant 0 : index
    %259 = vector.load %arg23[%c3_179, %c0_180, %c0_181] : memref<4x1x32xf32, #tpu.memory_space<vmem>>, vector<1x1x32xf32>
    %260 = vector.shape_cast %259 : vector<1x1x32xf32> to vector<1x32xf32>
    %cst_182 = arith.constant 8.000000e+00 : f32
    %261 = vector.broadcast %cst_182 : f32 to vector<1x32xf32>
    %262 = arith.mulf %261, %260 : vector<1x32xf32>
    %263 = vector.broadcast %262 : vector<1x32xf32> to vector<8x32xf32>
    %264 = arith.addf %258, %263 : vector<8x32xf32>
    %c3_183 = arith.constant 3 : index
    %c0_184 = arith.constant 0 : index
    %c0_185 = arith.constant 0 : index
    %265 = vector.load %arg24[%c3_183, %c0_184, %c0_185] : memref<4x32x32xf32, #tpu.memory_space<vmem>>, vector<1x32x32xf32>
    %266 = vector.shape_cast %265 : vector<1x32x32xf32> to vector<32x32xf32>
    %cst_186 = arith.constant dense<0.000000e+00> : vector<8x32xf32>
    %267 = tpu.matmul %264, %266, %cst_186 {dimension_numbers = #tpu.dot_dimension_numbers<[1], [0], [0], [1], [0, 0, 1, 1], [], []>} : vector<8x32xf32>, vector<32x32xf32>, vector<8x32xf32> -> vector<8x32xf32>
    %268 = arith.addf %267, %236 : vector<8x32xf32>
    %c3_187 = arith.constant 3 : index
    %c0_188 = arith.constant 0 : index
    %c0_189 = arith.constant 0 : index
    %269 = vector.load %arg25[%c3_187, %c0_188, %c0_189] : memref<4x1x32xf32, #tpu.memory_space<vmem>>, vector<1x1x32xf32>
    %270 = vector.shape_cast %269 : vector<1x1x32xf32> to vector<1x32xf32>
    %271 = vector.broadcast %270 : vector<1x32xf32> to vector<8x32xf32>
    %272 = arith.addf %268, %271 : vector<8x32xf32>
    %cst_190 = arith.constant 0.000000e+00 : f32
    %273 = vector.broadcast %cst_190 : f32 to vector<8x32xf32>
    %274 = arith.maximumf %272, %273 : vector<8x32xf32>
    %c3_191 = arith.constant 3 : index
    %c0_192 = arith.constant 0 : index
    %c0_193 = arith.constant 0 : index
    %275 = vector.load %arg26[%c3_191, %c0_192, %c0_193] : memref<4x32x32xf32, #tpu.memory_space<vmem>>, vector<1x32x32xf32>
    %276 = vector.shape_cast %275 : vector<1x32x32xf32> to vector<32x32xf32>
    %cst_194 = arith.constant dense<0.000000e+00> : vector<8x32xf32>
    %277 = tpu.matmul %274, %276, %cst_194 {dimension_numbers = #tpu.dot_dimension_numbers<[1], [0], [0], [1], [0, 0, 1, 1], [], []>} : vector<8x32xf32>, vector<32x32xf32>, vector<8x32xf32> -> vector<8x32xf32>
    %c3_195 = arith.constant 3 : index
    %c0_196 = arith.constant 0 : index
    %c0_197 = arith.constant 0 : index
    %278 = vector.load %arg27[%c3_195, %c0_196, %c0_197] : memref<4x1x32xf32, #tpu.memory_space<vmem>>, vector<1x1x32xf32>
    %279 = vector.shape_cast %278 : vector<1x1x32xf32> to vector<1x32xf32>
    %280 = vector.broadcast %279 : vector<1x32xf32> to vector<8x32xf32>
    %281 = arith.addf %277, %280 : vector<8x32xf32>
    %c0_198 = arith.constant 0 : index
    %c0_199 = arith.constant 0 : index
    %282 = vector.load %arg28[%c0_198, %c0_199] : memref<32x32xf32, #tpu.memory_space<vmem>>, vector<32x32xf32>
    %cst_200 = arith.constant dense<0.000000e+00> : vector<8x32xf32>
    %283 = tpu.matmul %281, %282, %cst_200 {dimension_numbers = #tpu.dot_dimension_numbers<[1], [0], [0], [1], [0, 0, 1, 1], [], []>} : vector<8x32xf32>, vector<32x32xf32>, vector<8x32xf32> -> vector<8x32xf32>
    %c0_201 = arith.constant 0 : index
    %c0_202 = arith.constant 0 : index
    %284 = vector.load %arg29[%c0_201, %c0_202] : memref<1x32xf32, #tpu.memory_space<vmem>>, vector<1x32xf32>
    %285 = vector.broadcast %284 : vector<1x32xf32> to vector<8x32xf32>
    %286 = arith.addf %283, %285 : vector<8x32xf32>
    %cst_203 = arith.constant 0.000000e+00 : f32
    %287 = vector.broadcast %cst_203 : f32 to vector<8x32xf32>
    %288 = arith.maximumf %286, %287 : vector<8x32xf32>
    %c0_204 = arith.constant 0 : index
    %c0_205 = arith.constant 0 : index
    %289 = vector.load %arg30[%c0_204, %c0_205] : memref<32x1xf32, #tpu.memory_space<vmem>>, vector<32x1xf32>
    %cst_206 = arith.constant dense<0.000000e+00> : vector<8x1xf32>
    %290 = tpu.matmul %288, %289, %cst_206 {dimension_numbers = #tpu.dot_dimension_numbers<[1], [0], [0], [1], [0, 0, 1, 1], [], []>} : vector<8x32xf32>, vector<32x1xf32>, vector<8x1xf32> -> vector<8x1xf32>
    %c0_207 = arith.constant 0 : index
    %c0_208 = arith.constant 0 : index
    %291 = vector.load %arg31[%c0_207, %c0_208] : memref<1x1xf32, #tpu.memory_space<vmem>>, vector<1x1xf32>
    %292 = vector.broadcast %291 : vector<1x1xf32> to vector<8x1xf32>
    %293 = arith.addf %290, %292 : vector<8x1xf32>
    %c0_209 = arith.constant 0 : index
    %c0_210 = arith.constant 0 : index
    %c0_211 = arith.constant 0 : index
    %294 = vector.load %arg3[%c0_209, %c0_210, %c0_211] : memref<1x8x1xf32, #tpu.memory_space<vmem>>, vector<1x8x1xf32>
    %295 = vector.shape_cast %294 : vector<1x8x1xf32> to vector<8x1xf32>
    %cst_212 = arith.constant 5.000000e-01 : f32
    %296 = vector.broadcast %cst_212 : f32 to vector<8x1xf32>
    %297 = arith.cmpf ogt, %295, %296 : vector<8x1xf32>
    %cst_213 = arith.constant 0xFF800000 : f32
    %298 = vector.broadcast %cst_213 : f32 to vector<8x1xf32>
    %299 = arith.select %297, %298, %293 : vector<8x1xi1>, vector<8x1xf32>
    %c0_214 = arith.constant 0 : index
    %c0_215 = arith.constant 0 : index
    %c0_216 = arith.constant 0 : index
    %300 = vector.load %arg32[%c0_214, %c0_215, %c0_216] : memref<1x8x1xf32, #tpu.memory_space<vmem>>, vector<1x8x1xf32>
    %301 = vector.shape_cast %300 : vector<1x8x1xf32> to vector<8x1xf32>
    %302 = vector.shape_cast %299 : vector<8x1xf32> to vector<1x8x1xf32>
    tpu.vector_store %arg32[%c0_214, %c0_215, %c0_216], %302 {strides = array<i32>} : memref<1x8x1xf32, #tpu.memory_space<vmem>>, vector<1x8x1xf32>,
    return
  }
  func.func @transform_0(%arg0: i32) -> (i32, i32, i32) {
    %c0_i32 = arith.constant 0 : i32
    %c0_i32_0 = arith.constant 0 : i32
    %c0_i32_1 = arith.constant 0 : i32
    return %arg0, %c0_i32, %c0_i32_0 : i32, i32, i32
  }
  func.func @transform_1(%arg0: i32) -> (i32, i32, i32) {
    %c0_i32 = arith.constant 0 : i32
    %c0_i32_0 = arith.constant 0 : i32
    %c0_i32_1 = arith.constant 0 : i32
    return %arg0, %c0_i32, %c0_i32_0 : i32, i32, i32
  }
  func.func @transform_2(%arg0: i32) -> (i32, i32, i32) {
    %c0_i32 = arith.constant 0 : i32
    %c0_i32_0 = arith.constant 0 : i32
    %c0_i32_1 = arith.constant 0 : i32
    return %arg0, %c0_i32, %c0_i32_0 : i32, i32, i32
  }
  func.func @transform_3(%arg0: i32) -> (i32, i32) {
    %c0_i32 = arith.constant 0 : i32
    %c0_i32_0 = arith.constant 0 : i32
    %c0_i32_1 = arith.constant 0 : i32
    return %c0_i32, %c0_i32_0 : i32, i32
  }
  func.func @transform_4(%arg0: i32) -> (i32, i32) {
    %c0_i32 = arith.constant 0 : i32
    %c0_i32_0 = arith.constant 0 : i32
    %c0_i32_1 = arith.constant 0 : i32
    return %c0_i32, %c0_i32_0 : i32, i32
  }
  func.func @transform_5(%arg0: i32) -> (i32, i32) {
    %c0_i32 = arith.constant 0 : i32
    %c0_i32_0 = arith.constant 0 : i32
    %c0_i32_1 = arith.constant 0 : i32
    return %c0_i32, %c0_i32_0 : i32, i32
  }
  func.func @transform_6(%arg0: i32) -> (i32, i32) {
    %c0_i32 = arith.constant 0 : i32
    %c0_i32_0 = arith.constant 0 : i32
    %c0_i32_1 = arith.constant 0 : i32
    return %c0_i32, %c0_i32_0 : i32, i32
  }
  func.func @transform_7(%arg0: i32) -> (i32, i32) {
    %c0_i32 = arith.constant 0 : i32
    %c0_i32_0 = arith.constant 0 : i32
    %c0_i32_1 = arith.constant 0 : i32
    return %c0_i32, %c0_i32_0 : i32, i32
  }
  func.func @transform_8(%arg0: i32) -> (i32, i32) {
    %c0_i32 = arith.constant 0 : i32
    %c0_i32_0 = arith.constant 0 : i32
    %c0_i32_1 = arith.constant 0 : i32
    return %c0_i32, %c0_i32_0 : i32, i32
  }
  func.func @transform_9(%arg0: i32) -> (i32, i32) {
    %c0_i32 = arith.constant 0 : i32
    %c0_i32_0 = arith.constant 0 : i32
    %c0_i32_1 = arith.constant 0 : i32
    return %c0_i32, %c0_i32_0 : i32, i32
  }
  func.func @transform_10(%arg0: i32) -> (i32, i32) {
    %c0_i32 = arith.constant 0 : i32
    %c0_i32_0 = arith.constant 0 : i32
    %c0_i32_1 = arith.constant 0 : i32
    return %c0_i32, %c0_i32_0 : i32, i32
  }
  func.func @transform_11(%arg0: i32) -> (i32, i32) {
    %c0_i32 = arith.constant 0 : i32
    %c0_i32_0 = arith.constant 0 : i32
    %c0_i32_1 = arith.constant 0 : i32
    return %c0_i32, %c0_i32_0 : i32, i32
  }
  func.func @transform_12(%arg0: i32) -> (i32, i32) {
    %c0_i32 = arith.constant 0 : i32
    %c0_i32_0 = arith.constant 0 : i32
    %c0_i32_1 = arith.constant 0 : i32
    return %c0_i32, %c0_i32_0 : i32, i32
  }
  func.func @transform_13(%arg0: i32) -> (i32, i32) {
    %c0_i32 = arith.constant 0 : i32
    %c0_i32_0 = arith.constant 0 : i32
    %c0_i32_1 = arith.constant 0 : i32
    return %c0_i32, %c0_i32_0 : i32, i32
  }
  func.func @transform_14(%arg0: i32) -> (i32, i32) {
    %c0_i32 = arith.constant 0 : i32
    %c0_i32_0 = arith.constant 0 : i32
    %c0_i32_1 = arith.constant 0 : i32
    return %c0_i32, %c0_i32_0 : i32, i32
  }
  func.func @transform_15(%arg0: i32) -> (i32, i32) {
    %c0_i32 = arith.constant 0 : i32
    %c0_i32_0 = arith.constant 0 : i32
    %c0_i32_1 = arith.constant 0 : i32
    return %c0_i32, %c0_i32_0 : i32, i32
  }
  func.func @transform_16(%arg0: i32) -> (i32, i32) {
    %c0_i32 = arith.constant 0 : i32
    %c0_i32_0 = arith.constant 0 : i32
    %c0_i32_1 = arith.constant 0 : i32
    return %c0_i32, %c0_i32_0 : i32, i32
  }
  func.func @transform_17(%arg0: i32) -> (i32, i32, i32) {
    %c0_i32 = arith.constant 0 : i32
    %c0_i32_0 = arith.constant 0 : i32
    %c0_i32_1 = arith.constant 0 : i32
    %c0_i32_2 = arith.constant 0 : i32
    return %c0_i32, %c0_i32_0, %c0_i32_1 : i32, i32, i32
  }
  func.func @transform_18(%arg0: i32) -> (i32, i32, i32) {
    %c0_i32 = arith.constant 0 : i32
    %c0_i32_0 = arith.constant 0 : i32
    %c0_i32_1 = arith.constant 0 : i32
    %c0_i32_2 = arith.constant 0 : i32
    return %c0_i32, %c0_i32_0, %c0_i32_1 : i32, i32, i32
  }
  func.func @transform_19(%arg0: i32) -> (i32, i32, i32) {
    %c0_i32 = arith.constant 0 : i32
    %c0_i32_0 = arith.constant 0 : i32
    %c0_i32_1 = arith.constant 0 : i32
    %c0_i32_2 = arith.constant 0 : i32
    return %c0_i32, %c0_i32_0, %c0_i32_1 : i32, i32, i32
  }
  func.func @transform_20(%arg0: i32) -> (i32, i32, i32) {
    %c0_i32 = arith.constant 0 : i32
    %c0_i32_0 = arith.constant 0 : i32
    %c0_i32_1 = arith.constant 0 : i32
    %c0_i32_2 = arith.constant 0 : i32
    return %c0_i32, %c0_i32_0, %c0_i32_1 : i32, i32, i32
  }
  func.func @transform_21(%arg0: i32) -> (i32, i32, i32) {
    %c0_i32 = arith.constant 0 : i32
    %c0_i32_0 = arith.constant 0 : i32
    %c0_i32_1 = arith.constant 0 : i32
    %c0_i32_2 = arith.constant 0 : i32
    return %c0_i32, %c0_i32_0, %c0_i32_1 : i32, i32, i32
  }
  func.func @transform_22(%arg0: i32) -> (i32, i32, i32) {
    %c0_i32 = arith.constant 0 : i32
    %c0_i32_0 = arith.constant 0 : i32
    %c0_i32_1 = arith.constant 0 : i32
    %c0_i32_2 = arith.constant 0 : i32
    return %c0_i32, %c0_i32_0, %c0_i32_1 : i32, i32, i32
  }
  func.func @transform_23(%arg0: i32) -> (i32, i32, i32) {
    %c0_i32 = arith.constant 0 : i32
    %c0_i32_0 = arith.constant 0 : i32
    %c0_i32_1 = arith.constant 0 : i32
    %c0_i32_2 = arith.constant 0 : i32
    return %c0_i32, %c0_i32_0, %c0_i32_1 : i32, i32, i32
  }
  func.func @transform_24(%arg0: i32) -> (i32, i32, i32) {
    %c0_i32 = arith.constant 0 : i32
    %c0_i32_0 = arith.constant 0 : i32
    %c0_i32_1 = arith.constant 0 : i32
    %c0_i32_2 = arith.constant 0 : i32
    return %c0_i32, %c0_i32_0, %c0_i32_1 : i32, i32, i32
  }
  func.func @transform_25(%arg0: i32) -> (i32, i32, i32) {
    %c0_i32 = arith.constant 0 : i32
    %c0_i32_0 = arith.constant 0 : i32
    %c0_i32_1 = arith.constant 0 : i32
    %c0_i32_2 = arith.constant 0 : i32
    return %c0_i32, %c0_i32_0, %c0_i32_1 : i32, i32, i32
  }
  func.func @transform_26(%arg0: i32) -> (i32, i32, i32) {
    %c0_i32 = arith.constant 0 : i32
    %c0_i32_0 = arith.constant 0 : i32
    %c0_i32_1 = arith.constant 0 : i32
    %c0_i32_2 = arith.constant 0 : i32
    return %c0_i32, %c0_i32_0, %c0_i32_1 : i32, i32, i32
  }
  func.func @transform_27(%arg0: i32) -> (i32, i32) {
    %c0_i32 = arith.constant 0 : i32
    %c0_i32_0 = arith.constant 0 : i32
    %c0_i32_1 = arith.constant 0 : i32
    return %c0_i32, %c0_i32_0 : i32, i32
  }
  func.func @transform_28(%arg0: i32) -> (i32, i32) {
    %c0_i32 = arith.constant 0 : i32
    %c0_i32_0 = arith.constant 0 : i32
    %c0_i32_1 = arith.constant 0 : i32
    return %c0_i32, %c0_i32_0 : i32, i32
  }
  func.func @transform_29(%arg0: i32) -> (i32, i32) {
    %c0_i32 = arith.constant 0 : i32
    %c0_i32_0 = arith.constant 0 : i32
    %c0_i32_1 = arith.constant 0 : i32
    return %c0_i32, %c0_i32_0 : i32, i32
  }
  func.func @transform_30(%arg0: i32) -> (i32, i32) {
    %c0_i32 = arith.constant 0 : i32
    %c0_i32_0 = arith.constant 0 : i32
    %c0_i32_1 = arith.constant 0 : i32
    return %c0_i32, %c0_i32_0 : i32, i32
  }
  func.func @transform_31(%arg0: i32) -> (i32, i32, i32) {
    %c0_i32 = arith.constant 0 : i32
    %c0_i32_0 = arith.constant 0 : i32
    %c0_i32_1 = arith.constant 0 : i32
    return %arg0, %c0_i32, %c0_i32_0 : i32, i32, i32
  }
}

</mosaic_0001>

<bundles_post_ra>
// kernel: agent_forward.1
= control target key start
LH: loop header
LB: loop body
LE: loop exit
PB: predicated region body
PF: predicated region fallthrough
CT: control target
= control target key end

     0   :  { %s6238_s6 = smov 1   ;;  %s6239_s10 = smov 2   ;;  %s7219_s0 = inlined_call_operand.smem [shape: u32[32], index: -1, kind: input, shape index: {}] }
   0x1   :  { %s6309_s5 = sld [smem:[%s7219_s0]]   ;;  %s6240_s14 = smov 3  }
   0x2   :  { %s6314_s9 = sld [smem:[%s7219_s0 + %s6238_s6]]   ;;  %s6241_s18 = smov 4  }
   0x3   :  { %s6319_s13 = sld [smem:[%s7219_s0 + %s6239_s10]]   ;;  %s6242_s22 = smov 5  }
   0x4   :  { %s6324_s17 = sld [smem:[%s7219_s0 + %s6240_s14]]   ;;  %s6243_s26 = smov 6  }
   0x5   :  { %s6329_s21 = sld [smem:[%s7219_s0 + %s6241_s18]]   ;;  %s6244_s30 = smov 7  }
   0x6   :  { %s6334_s25 = sld [smem:[%s7219_s0 + %s6242_s22]]   ;;  %s6245_s4 = smov 9  }
   0x7   :  { %7244 = sst [smem:[#allocation51_spill]] %s6309_s5  ;;  %s6246_s10 = smov 10  }
   0x8   :  { %7245 = sst [smem:[#allocation52_spill]] %s6314_s9  ;;  %s6247_s15 = smov 11  }
   0x9   :  { %7246 = sst [smem:[#allocation53_spill]] %s6319_s13  ;;  %s6248_s20 = smov 12  }
   0xa   :  { %s6339_s29 = sld [smem:[%s7219_s0 + %s6243_s26]]   ;;  %s6249_s26 = smov 13  }
   0xb   :  { %s4604_s3 = sld [smem:[%s7219_s0 + %s6244_s30]]   ;;  %s6250_s1 = smov 14  }
   0xc   :  { %s6347_s8 = sld [smem:[%s7219_s0 + %s6245_s4]]   ;;  %s6251_s7 = smov 15  }
   0xd   :  { %s6352_s14 = sld [smem:[%s7219_s0 + %s6246_s10]]   ;;  %s6253_s22 = smov 17  }
   0xe   :  { %s6357_s19 = sld [smem:[%s7219_s0 + %s6247_s15]]   ;;  %s6252_s15 = smov 16  }
   0xf   :  { %s6362_s24 = sld [smem:[%s7219_s0 + %s6248_s20]]   ;;  %s6255_s4 = smov 19  }
  0x10   :  { %s6367_s30 = sld [smem:[%s7219_s0 + %s6249_s26]]   ;;  %s6268_s16 = smov 30  }
  0x11   :  { %s6372_s6 = sld [smem:[%s7219_s0 + %s6250_s1]]   ;;  %v68_v0 = vstv %s4604_s3  ;;  %s6254_s3 = smov 18  }
  0x12   :  { %7247 = sst [smem:[#allocation54_spill]] %s6347_s8  ;;  %69 = vst [vmem:[#allocation2] sm:$0x1] %v68_v0 }
  0x13   :  { %s6377_s12 = sld [smem:[%s7219_s0 + %s6251_s7]]  }
  0x14   :  { %s6382_s20 = sld [smem:[%s7219_s0 + %s6252_s15]]   ;;  %s6256_s15 = smov 20  }
  0x15   :  { %s6387_s27 = sld [smem:[%s7219_s0 + %s6253_s22]]   ;;  %s6257_s22 = smov 21  }
  0x16   :  { %7248 = sst [smem:[#allocation55_spill]] %s6367_s30 }
  0x17   :  { %7249 = sst [smem:[#allocation56_spill]] %s6372_s6 }
  0x18   :  { %s6392_s2 = sld [smem:[%s7219_s0 + %s6254_s3]]   ;;  %s6258_s3 = smov 22  }
  0x19   :  { %7250 = sst [smem:[#allocation57_spill]] %s6377_s12 }
  0x1a   :  { %7251 = sst [smem:[#allocation58_spill]] %s6382_s20 }
  0x1b   :  { %7252 = sst [smem:[#allocation59_spill]] %s6387_s27 }
  0x1c   :  { %s6397_s11 = sld [smem:[%s7219_s0 + %s6255_s4]]   ;;  %s6259_s4 = smov 23  }
  0x1d   :  { %s6402_s13 = sld [smem:[%s7219_s0 + %s6256_s15]]   ;;  %s6260_s15 = smov 24  }
  0x1e   :  { %7253 = sst [smem:[#allocation60_spill]] %s6392_s2 }
  0x1f   :  { %s6407_s27 = sld [smem:[%s7219_s0 + %s6257_s22]]   ;;  %s6261_s22 = smov 25  }
  0x20   :  { %s6412_s12 = sld [smem:[%s7219_s0 + %s6258_s3]]   ;;  %s6262_s3 = smov 26  }
  0x21   :  { %s6417_s5 = sld [smem:[%s7219_s0 + %s6259_s4]]   ;;  %s6263_s4 = smov 27  }
  0x22   :  { %7254 = sst [smem:[#allocation61_spill]] %s6397_s11 }
  0x23   :  { %s6422_s9 = sld [smem:[%s7219_s0 + %s6260_s15]]   ;;  %s6264_s15 = smov 28  }
  0x24   :  { %s6432_s11 = sld [smem:[%s7219_s0 + %s6262_s3]]   ;;  %s6266_s3 = smov 31  }
  0x25   :  { %7255 = sst [smem:[#allocation62_spill]] %s6407_s27 }
  0x26   :  { %s6427_s27 = sld [smem:[%s7219_s0 + %s6261_s22]]   ;;  %s6265_s22 = smov 29  }
  0x27   :  { %7256 = sst [smem:[#allocation63_spill]] %s6417_s5 }
  0x28   :  { %s6437_s5 = sld [smem:[%s7219_s0 + %s6263_s4]]   ;;  %s6267_s4 = smov 8  }
  0x29   :  { %s6442_s20 = sld [smem:[%s7219_s0 + %s6264_s15]]  }
  0x2a   :  { %s6452_s30 = sld [smem:[%s7219_s0 + %s6266_s3]]  }
  0x2c   :  { %7257 = sst [smem:[#allocation64_spill]] %s6427_s27 }
  0x2d   :  { %s6447_s27 = sld [smem:[%s7219_s0 + %s6265_s22]]  }
  0x2e   :  { %7258 = sst [smem:[#allocation65_spill]] %s6437_s5 }
  0x2f   :  { %7259 = sst [smem:[#allocation66_spill]] %s6442_s20 }
  0x30   :  { %s4605_s5 = sld [smem:[%s7219_s0 + %s6267_s4]]  }
  0x31   :  { %s4627_s20 = sld [smem:[%s7219_s0 + %s6268_s16]]  }
  0x36   :  { %v70_v1 = vstv %s4605_s5 }
  0x37   :  { %71 = vst [vmem:[#allocation3] sm:$0x1] %v70_v1  ;;  %v72_v2 = vstv %s4627_s20 }
  0x38   :  { %73 = vst [vmem:[#allocation4] sm:$0x1] %v72_v2 }
  0x39   :  { %74 = vsyncpa [#allocation6], 0 }
  0x3a   :  { %75 = vsyncpa [#allocation8], 0 }
  0x3b   :  { %76 = vsyncpa [#allocation11], 0 }
  0x3c   :  { %77 = vsyncpa [#allocation14], 0 }
  0x3d   :  { %78 = vsyncpa [#allocation17], 0 }
  0x3e   :  { %79 = vsyncpa [#allocation20], 0 }
  0x3f   :  { %80 = vsyncpa [#allocation23], 0 }
  0x40   :  { %81 = vsyncpa [#allocation26], 0 }
  0x41   :  { %82 = vsyncpa [#allocation29], 0 }
  0x42   :  { %83 = vsyncpa [#allocation32], 0 }
  0x43   :  { %84 = vsyncpa [#allocation35], 0 }
  0x44   :  { %85 = vsyncpa [#allocation38], 0  ;;  %s6460_s22 = smov 0  }
  0x45 LB: > { %s7260_s8 = sld [smem:[#allocation54_spill]]  ;;  %s7261_s6 = sld [smem:[#allocation56_spill]]  ;;  %s6236_s22 = sphi %s6460_s22, %s91_s22  }
  0x46   : > { %s7262_s2 = sld [smem:[#allocation60_spill]]  ;;  %s6269_s0 = smov [#allocation7]  }
  0x47   : > { %s812_s5 = sshll.u32 %s6269_s0, 4  ;;  %s6466_s20 = sadd.s32 4294967295, %s6236_s22   ;;  %s6471_s5 = int_to_ptr.vmem [resolvable:$true] %s812_s5 }
  0x48   : > { %p4631_p0 = scmp.ge.s32.totalorder %s6236_s22, 1  ;;  %p788_p1 = scmp.lt.s32.totalorder %s6236_s22, 3 }
  0x49   : > { %p7230_p2 = scmp.eq.s32.totalorder %s6466_s20, 0  ;;  %s6270_s26 = smov [#allocation10]  }
  0x4a   : > { %p6473_p3 = pnand %p4631_p0, %p788_p1  ;;  %s834_s3 = sshll.u32 %s6270_s26, 4  ;;  %s6479_s3 = int_to_ptr.vmem [resolvable:$true] %s834_s3 }
  0x4b   : > { %s6271_s28 = smov [#allocation13]   ;;  %s6272_s7 = smov [#allocation16]  }
  0x4c   : > { %s7263_s23 = scalar_select %p6473_p3, 1, 0 }
  0x4d   : > { %p5382_p4 = pneg %p6473_p3  ;;  %s862_s1 = sshll.u32 %s6271_s28, 4  ;;  %s6487_s1 = int_to_ptr.vmem [resolvable:$true] %s862_s1 }
  0x4e   : > { %s886_s10 = sshll.u32 %s6272_s7, 4  ;;  %s5566_s16 = scalar_lea.hbm %s6329_s21, 16  ;;  %s6489_s10 = int_to_ptr.vmem [resolvable:$true] %s886_s10 }
  0x4f   : > { %p6483_p5 = pnand %p7230_p2, %p5382_p4  ;;  %p5567_p6 = scmp.ne.s32.totalorder %s6329_s21, %s5566_s16 }
  0x50   : > { %p5573_p10 = scmp.lt.u32.totalorder %s5566_s16, %s6329_s21 }
  0x51   : > { %p6495_p7 = pneg %p6483_p5 }
  0x53   : > { %p5569_p8 = pnand %p6495_p7, %p5567_p6 }
  0x55   : > { %p5570_p9 = pneg %p5569_p8 }
  0x57   : > { %p5575_p11 = pnand %p5573_p10, %p5570_p9 }
  0x59   : > { %5578 = shalt.err (!%p5575_p11)
}
  0x5a   : > { %s5579_s18 = scalar_lea.vmem %s6471_s5, 16  ;;  %s5586_s0 = scalar_lea.vmem %s6471_s5, 32 }
  0x5b   : > { %p5580_p12 = scmp.ne.s32.totalorder %s6471_s5, %s5579_s18  ;;  %p5587_p1 = scmp.lt.s32.totalorder %s6471_s5, %s6471_s5 }
  0x5c   : > { %p5588_p4 = scmp.lt.s32.totalorder %s5586_s0, %s5579_s18 }
  0x5d   : > { %p5582_p13 = pnand %p5580_p12, %p6495_p7 }
  0x5e   : > { %p5589_p2 = por %p5588_p4, %p5587_p1 }
  0x5f   : > { %p5583_p0 = pneg %p5582_p13 }
  0x61   : > { %p5590_p6 = pnand %p5589_p2, %p5583_p0 }
  0x63   : > { %5593 = shalt.err (!%p5590_p6)
}
  0x64   : > { %5388 = dma.hbm_to_vmem [thread:$0]  (!%p6483_p5), %s6329_s21, 16, %s6471_s5, [#allocation8]  }
  0x65   : > { %s5594_s26 = scalar_lea.hbm %s6339_s29, 16 }
  0x66   : > { %p5595_p8 = scmp.ne.s32.totalorder %s6339_s29, %s5594_s26  ;;  %p5601_p11 = scmp.lt.u32.totalorder %s5594_s26, %s6339_s29 }
  0x68   : > { %p5597_p9 = pnand %p5595_p8, %p6495_p7 }
  0x6a   : > { %p5598_p10 = pneg %p5597_p9 }
  0x6c   : > { %p5603_p12 = pnand %p5601_p11, %p5598_p10 }
  0x6e   : > { %5606 = shalt.err (!%p5603_p12)
}
  0x6f   : > { %s5607_s28 = scalar_lea.vmem %s6479_s3, 16  ;;  %s5614_s7 = scalar_lea.vmem %s6479_s3, 32 }
  0x70   : > { %p5608_p2 = scmp.ne.s32.totalorder %s6479_s3, %s5607_s28  ;;  %p5615_p1 = scmp.lt.s32.totalorder %s6479_s3, %s6479_s3 }
  0x71   : > { %p5616_p4 = scmp.lt.s32.totalorder %s5614_s7, %s5607_s28 }
  0x72   : > { %p5610_p13 = pnand %p5608_p2, %p6495_p7 }
  0x73   : > { %p5617_p6 = por %p5616_p4, %p5615_p1 }
  0x74   : > { %p5611_p0 = pneg %p5610_p13 }
  0x76   : > { %p5618_p8 = pnand %p5617_p6, %p5611_p0 }
  0x78   : > { %5621 = shalt.err (!%p5618_p8)
}
  0x79   : > { %5394 = dma.hbm_to_vmem [thread:$0]  (!%p6483_p5), %s6339_s29, 16, %s6479_s3, [#allocation11]  }
  0x7a   : > { %s5622_s5 = scalar_lea.hbm %s6352_s14, 16 }
  0x7b   : > { %p5623_p9 = scmp.ne.s32.totalorder %s6352_s14, %s5622_s5  ;;  %p5629_p12 = scmp.lt.u32.totalorder %s5622_s5, %s6352_s14 }
  0x7d   : > { %p5625_p10 = pnand %p5623_p9, %p6495_p7 }
  0x7f   : > { %p5626_p11 = pneg %p5625_p10 }
  0x81   : > { %p5631_p2 = pnand %p5629_p12, %p5626_p11 }
  0x83   : > { %5634 = shalt.err (!%p5631_p2)
}
  0x84   : > { %s5635_s16 = scalar_lea.vmem %s6487_s1, 16  ;;  %s5642_s18 = scalar_lea.vmem %s6487_s1, 32 }
  0x85   : > { %p5636_p13 = scmp.ne.s32.totalorder %s6487_s1, %s5635_s16  ;;  %p5643_p4 = scmp.lt.s32.totalorder %s6487_s1, %s6487_s1 }
  0x86   : > { %p5644_p6 = scmp.lt.s32.totalorder %s5642_s18, %s5635_s16 }
  0x87   : > { %p5638_p0 = pnand %p5636_p13, %p6495_p7 }
  0x88   : > { %p5645_p8 = por %p5644_p6, %p5643_p4 }
  0x89   : > { %p5639_p1 = pneg %p5638_p0 }
  0x8b   : > { %p5646_p9 = pnand %p5645_p8, %p5639_p1 }
  0x8d   : > { %5649 = shalt.err (!%p5646_p9)
}
  0x8e   : > { %5400 = dma.hbm_to_vmem [thread:$0]  (!%p6483_p5), %s6352_s14, 16, %s6487_s1, [#allocation14]  }
  0x8f   : > { %s5650_s3 = scalar_lea.hbm %s6362_s24, 16 }
  0x90   : > { %p5651_p10 = scmp.ne.s32.totalorder %s6362_s24, %s5650_s3  ;;  %p5657_p2 = scmp.lt.u32.totalorder %s5650_s3, %s6362_s24 }
  0x92   : > { %p5653_p11 = pnand %p5651_p10, %p6495_p7 }
  0x94   : > { %p5654_p12 = pneg %p5653_p11 }
  0x96   : > { %p5659_p13 = pnand %p5657_p2, %p5654_p12 }
  0x98   : > { %5662 = shalt.err (!%p5659_p13)
}
  0x99   : > { %s5663_s0 = scalar_lea.vmem %s6489_s10, 16  ;;  %s5670_s26 = scalar_lea.vmem %s6489_s10, 32 }
  0x9a   : > { %p5664_p0 = scmp.ne.s32.totalorder %s6489_s10, %s5663_s0  ;;  %p5671_p6 = scmp.lt.s32.totalorder %s6489_s10, %s6489_s10 }
  0x9b   : > { %p5672_p8 = scmp.lt.s32.totalorder %s5670_s26, %s5663_s0 }
  0x9c   : > { %p5666_p1 = pnand %p5664_p0, %p6495_p7 }
  0x9d   : > { %p5673_p9 = por %p5672_p8, %p5671_p6 }
  0x9e   : > { %p5667_p4 = pneg %p5666_p1 }
  0xa0   : > { %p5674_p10 = pnand %p5673_p9, %p5667_p4 }
  0xa2   : > { %5677 = shalt.err (!%p5674_p10)
}
  0xa3   : > { %5406 = dma.hbm_to_vmem [thread:$0]  (!%p6483_p5), %s6362_s24, 16, %s6489_s10, [#allocation17]  }
  0xa4   : > { %s6273_s1 = smov [#allocation19]   ;;  %s6274_s7 = smov [#allocation22]  }
  0xa5   : > { %s908_s28 = sshll.u32 %s6273_s1, 4  ;;  %s935_s5 = sshll.u32 %s6274_s7, 4  ;;  %s909_s28 = int_to_ptr.vmem [resolvable:$true] %s908_s28  ;;  %s936_s5 = int_to_ptr.vmem [resolvable:$true] %s935_s5 }
  0xa6   : > { %s5678_s16 = scalar_lea.hbm %s7261_s6, 16 }
  0xa7   : > { %p5679_p11 = scmp.ne.s32.totalorder %s7261_s6, %s5678_s16  ;;  %p5685_p13 = scmp.lt.u32.totalorder %s5678_s16, %s7261_s6 }
  0xa9   : > { %p5681_p12 = pnand %p5679_p11, %p6495_p7 }
  0xab   : > { %p5682_p2 = pneg %p5681_p12 }
  0xad   : > { %p5687_p0 = pnand %p5685_p13, %p5682_p2 }
  0xaf   : > { %5690 = shalt.err (!%p5687_p0)
}
  0xb0   : > { %s5691_s18 = scalar_lea.vmem %s909_s28, 16  ;;  %s5698_s10 = scalar_lea.vmem %s909_s28, 32 }
  0xb1   : > { %p5692_p1 = scmp.ne.s32.totalorder %s909_s28, %s5691_s18  ;;  %p5699_p8 = scmp.lt.s32.totalorder %s909_s28, %s909_s28 }
  0xb2   : > { %p5700_p9 = scmp.lt.s32.totalorder %s5698_s10, %s5691_s18 }
  0xb3   : > { %p5694_p4 = pnand %p5692_p1, %p6495_p7 }
  0xb4   : > { %p5701_p10 = por %p5700_p9, %p5699_p8 }
  0xb5   : > { %p5695_p6 = pneg %p5694_p4 }
  0xb7   : > { %p5702_p3 = pnand %p5701_p10, %p5695_p6 }
  0xb9   : > { %5705 = shalt.err (!%p5702_p3)
}
  0xba   : > { %5412 = dma.hbm_to_vmem [thread:$0]  (!%p6483_p5), %s7261_s6, 16, %s909_s28, [#allocation20]  }
  0xbb   : > { %s5706_s3 = scalar_lea.hbm %s7262_s2, 64 }
  0xbc   : > { %p5707_p11 = scmp.ne.s32.totalorder %s7262_s2, %s5706_s3  ;;  %p5713_p13 = scmp.lt.u32.totalorder %s5706_s3, %s7262_s2 }
  0xbe   : > { %p5709_p12 = pnand %p5707_p11, %p6495_p7 }
  0xc0   : > { %p5710_p2 = pneg %p5709_p12 }
  0xc2   : > { %p5715_p0 = pnand %p5713_p13, %p5710_p2 }
  0xc4   : > { %5718 = shalt.err (!%p5715_p0)
}
  0xc5   : > { %s5719_s0 = scalar_lea.vmem %s936_s5, 64  ;;  %p5727_p6 = scmp.lt.s32.totalorder %s936_s5, %s936_s5 }
  0xc6   : > { %p5720_p3 = scmp.ne.s32.totalorder %s936_s5, %s5719_s0  ;;  %p5728_p8 = scmp.lt.s32.totalorder %s5719_s0, %s5719_s0 }
  0xc8   : > { %p5722_p1 = pnand %p5720_p3, %p6495_p7  ;;  %p5729_p9 = por %p5728_p8, %p5727_p6 }
  0xca   : > { %p5723_p4 = pneg %p5722_p1 }
  0xcc   : > { %p5730_p10 = pnand %p5729_p9, %p5723_p4 }
  0xce   : > { %5733 = shalt.err (!%p5730_p10)
}
  0xcf   : > { %s7234_s26 = smov 16   ;;  %s7235_s1 = smov 1  }
  0xd0   : > { %5418 = dma.hbm_to_vmem [thread:$0]  (!%p6483_p5), %s7262_s2, 64, %s936_s5, [#allocation23], %s7234_s26, %s7234_s26, %s7235_s1  }
  0xd1   : > { %s6277_s28 = smov [#allocation25]   ;;  %s6278_s16 = smov [#allocation28]  }
  0xd2   : > { %s961_s7 = sshll.u32 %s6277_s28, 4  ;;  %s987_s18 = sshll.u32 %s6278_s16, 4  ;;  %s962_s7 = int_to_ptr.vmem [resolvable:$true] %s961_s7  ;;  %s988_s18 = int_to_ptr.vmem [resolvable:$true] %s987_s18 }
  0xd3   : > { %s5734_s10 = scalar_lea.hbm %s6402_s13, 2048 }
  0xd4   : > { %p5735_p11 = scmp.ne.s32.totalorder %s6402_s13, %s5734_s10  ;;  %p5741_p13 = scmp.lt.u32.totalorder %s5734_s10, %s6402_s13 }
  0xd6   : > { %p5737_p12 = pnand %p5735_p11, %p6495_p7 }
  0xd8   : > { %p5738_p2 = pneg %p5737_p12 }
  0xda   : > { %p5743_p0 = pnand %p5741_p13, %p5738_p2 }
  0xdc   : > { %5746 = shalt.err (!%p5743_p0)
}
  0xdd   : > { %s5747_s3 = scalar_lea.vmem %s962_s7, 2048  ;;  %p5755_p6 = scmp.lt.s32.totalorder %s962_s7, %s962_s7 }
  0xde   : > { %p5748_p3 = scmp.ne.s32.totalorder %s962_s7, %s5747_s3  ;;  %p5756_p8 = scmp.lt.s32.totalorder %s5747_s3, %s5747_s3 }
  0xe0   : > { %p5750_p1 = pnand %p5748_p3, %p6495_p7  ;;  %p5757_p9 = por %p5756_p8, %p5755_p6 }
  0xe2   : > { %p5751_p4 = pneg %p5750_p1 }
  0xe4   : > { %p5758_p10 = pnand %p5757_p9, %p5751_p4 }
  0xe6   : > { %5761 = shalt.err (!%p5758_p10)
}
  0xe7   : > { %s7232_s5 = smov 128   ;;  %s7236_s0 = smov 8  }
  0xe8   : > { %5424 = dma.hbm_to_vmem [thread:$0]  (!%p6483_p5), %s6402_s13, 2048, %s962_s7, [#allocation26], %s7232_s5, %s7232_s5, %s7236_s0  }
  0xe9   : > { %s5762_s28 = scalar_lea.hbm %s6412_s12, 64 }
  0xea   : > { %p5763_p11 = scmp.ne.s32.totalorder %s6412_s12, %s5762_s28  ;;  %p5769_p13 = scmp.lt.u32.totalorder %s5762_s28, %s6412_s12 }
  0xec   : > { %p5765_p12 = pnand %p5763_p11, %p6495_p7 }
  0xee   : > { %p5766_p2 = pneg %p5765_p12 }
  0xf0   : > { %p5771_p0 = pnand %p5769_p13, %p5766_p2 }
  0xf2   : > { %5774 = shalt.err (!%p5771_p0)
}
  0xf3   : > { %s5775_s16 = scalar_lea.vmem %s988_s18, 64  ;;  %p5783_p6 = scmp.lt.s32.totalorder %s988_s18, %s988_s18 }
  0xf4   : > { %p5776_p3 = scmp.ne.s32.totalorder %s988_s18, %s5775_s16  ;;  %p5784_p8 = scmp.lt.s32.totalorder %s5775_s16, %s5775_s16 }
  0xf6   : > { %p5778_p1 = pnand %p5776_p3, %p6495_p7  ;;  %p5785_p9 = por %p5784_p8, %p5783_p6 }
  0xf8   : > { %p5779_p4 = pneg %p5778_p1 }
  0xfa   : > { %p5786_p10 = pnand %p5785_p9, %p5779_p4 }
  0xfc   : > { %5789 = shalt.err (!%p5786_p10)
}
  0xfd   : > { %5430 = dma.hbm_to_vmem [thread:$0]  (!%p6483_p5), %s6412_s12, 64, %s988_s18, [#allocation29], %s7234_s26, %s7234_s26, %s7235_s1  }
  0xfe   : > { %s6281_s7 = smov [#allocation31]   ;;  %s6282_s3 = smov [#allocation34]  }
  0xff   : > { %s1013_s10 = sshll.u32 %s6281_s7, 4  ;;  %s1039_s28 = sshll.u32 %s6282_s3, 4  ;;  %s1014_s10 = int_to_ptr.vmem [resolvable:$true] %s1013_s10  ;;  %s1040_s28 = int_to_ptr.vmem [resolvable:$true] %s1039_s28 }
 0x100   : > { %s5790_s16 = scalar_lea.hbm %s6422_s9, 64 }
 0x101   : > { %p5791_p11 = scmp.ne.s32.totalorder %s6422_s9, %s5790_s16  ;;  %p5797_p13 = scmp.lt.u32.totalorder %s5790_s16, %s6422_s9 }
 0x103   : > { %p5793_p12 = pnand %p5791_p11, %p6495_p7 }
 0x105   : > { %p5794_p2 = pneg %p5793_p12 }
 0x107   : > { %p5799_p0 = pnand %p5797_p13, %p5794_p2 }
 0x109   : > { %5802 = shalt.err (!%p5799_p0)
}
 0x10a   : > { %s5803_s5 = scalar_lea.vmem %s1014_s10, 64  ;;  %p5811_p6 = scmp.lt.s32.totalorder %s1014_s10, %s1014_s10 }
 0x10b   : > { %p5804_p3 = scmp.ne.s32.totalorder %s1014_s10, %s5803_s5  ;;  %p5812_p8 = scmp.lt.s32.totalorder %s5803_s5, %s5803_s5 }
 0x10d   : > { %p5806_p1 = pnand %p5804_p3, %p6495_p7  ;;  %p5813_p9 = por %p5812_p8, %p5811_p6 }
 0x10f   : > { %p5807_p4 = pneg %p5806_p1 }
 0x111   : > { %p5814_p10 = pnand %p5813_p9, %p5807_p4 }
 0x113   : > { %5817 = shalt.err (!%p5814_p10)
}
 0x114   : > { %5436 = dma.hbm_to_vmem [thread:$0]  (!%p6483_p5), %s6422_s9, 64, %s1014_s10, [#allocation32], %s7234_s26, %s7234_s26, %s7235_s1  }
 0x115   : > { %s5818_s18 = scalar_lea.hbm %s6432_s11, 64 }
 0x116   : > { %p5819_p11 = scmp.ne.s32.totalorder %s6432_s11, %s5818_s18  ;;  %p5825_p13 = scmp.lt.u32.totalorder %s5818_s18, %s6432_s11 }
 0x118   : > { %p5821_p12 = pnand %p5819_p11, %p6495_p7 }
 0x11a   : > { %p5822_p2 = pneg %p5821_p12 }
 0x11c   : > { %p5827_p0 = pnand %p5825_p13, %p5822_p2 }
 0x11e   : > { %5830 = shalt.err (!%p5827_p0)
}
 0x11f   : > { %s5831_s5 = scalar_lea.vmem %s1040_s28, 64  ;;  %p5839_p6 = scmp.lt.s32.totalorder %s1040_s28, %s1040_s28 }
 0x120   : > { %p5832_p3 = scmp.ne.s32.totalorder %s1040_s28, %s5831_s5  ;;  %p5840_p8 = scmp.lt.s32.totalorder %s5831_s5, %s5831_s5 }
 0x122   : > { %p5834_p1 = pnand %p5832_p3, %p6495_p7  ;;  %p5841_p9 = por %p5840_p8, %p5839_p6 }
 0x124   : > { %p5835_p4 = pneg %p5834_p1 }
 0x126   : > { %p5842_p10 = pnand %p5841_p9, %p5835_p4 }
 0x128   : > { %5845 = shalt.err (!%p5842_p10)
}
 0x129   : > { %5442 = dma.hbm_to_vmem [thread:$0]  (!%p6483_p5), %s6432_s11, 64, %s1040_s28, [#allocation35], %s7234_s26, %s7234_s26, %s7235_s1  }
 0x12a   : > { %s6283_s7 = smov [#allocation5]   ;;  %s6284_s3 = smov [#allocation9]  }
 0x12b   : > { %s801_s10 = sshll.u32 %s6283_s7, 4  ;;  %s823_s16 = sshll.u32 %s6284_s3, 4  ;;  %s802_s10 = int_to_ptr.vmem [resolvable:$true] %s801_s10  ;;  %s824_s16 = int_to_ptr.vmem [resolvable:$true] %s823_s16 }
 0x12c   : > { %s5846_s18 = scalar_lea.hbm %s6324_s17, 16 }
 0x12d   : > { %p5847_p11 = scmp.ne.s32.totalorder %s6324_s17, %s5846_s18  ;;  %p5853_p13 = scmp.lt.u32.totalorder %s5846_s18, %s6324_s17 }
 0x12f   : > { %p5849_p12 = pnand %p5847_p11, %p6495_p7 }
 0x131   : > { %p5850_p2 = pneg %p5849_p12 }
 0x133   : > { %p5855_p0 = pnand %p5853_p13, %p5850_p2 }
 0x135   : > { %5858 = shalt.err (!%p5855_p0)
}
 0x136   : > { %s5859_s5 = scalar_lea.vmem %s802_s10, 16  ;;  %s5866_s28 = scalar_lea.vmem %s802_s10, 32 }
 0x137   : > { %p5860_p3 = scmp.ne.s32.totalorder %s802_s10, %s5859_s5  ;;  %p5867_p6 = scmp.lt.s32.totalorder %s802_s10, %s802_s10 }
 0x138   : > { %p5868_p8 = scmp.lt.s32.totalorder %s5866_s28, %s5859_s5 }
 0x139   : > { %p5862_p1 = pnand %p5860_p3, %p6495_p7 }
 0x13a   : > { %p5869_p9 = por %p5868_p8, %p5867_p6 }
 0x13b   : > { %p5863_p4 = pneg %p5862_p1 }
 0x13d   : > { %p5870_p10 = pnand %p5869_p9, %p5863_p4 }
 0x13f   : > { %5873 = shalt.err (!%p5870_p10)
}
 0x140   : > { %5385 = dma.hbm_to_vmem [thread:$0]  (!%p6483_p5), %s6324_s17, 16, %s802_s10, [#allocation6]  }
 0x141   : > { %s5874_s7 = scalar_lea.hbm %s6334_s25, 16 }
 0x142   : > { %p5875_p11 = scmp.ne.s32.totalorder %s6334_s25, %s5874_s7  ;;  %p5881_p13 = scmp.lt.u32.totalorder %s5874_s7, %s6334_s25 }
 0x144   : > { %p5877_p12 = pnand %p5875_p11, %p6495_p7 }
 0x146   : > { %p5878_p2 = pneg %p5877_p12 }
 0x148   : > { %p5883_p0 = pnand %p5881_p13, %p5878_p2 }
 0x14a   : > { %5886 = shalt.err (!%p5883_p0)
}
 0x14b   : > { %s5887_s3 = scalar_lea.vmem %s824_s16, 16  ;;  %s5894_s18 = scalar_lea.vmem %s824_s16, 32 }
 0x14c   : > { %p5888_p3 = scmp.ne.s32.totalorder %s824_s16, %s5887_s3  ;;  %p5895_p6 = scmp.lt.s32.totalorder %s824_s16, %s824_s16 }
 0x14d   : > { %p5896_p8 = scmp.lt.s32.totalorder %s5894_s18, %s5887_s3 }
 0x14e   : > { %p5890_p1 = pnand %p5888_p3, %p6495_p7 }
 0x14f   : > { %p5897_p9 = por %p5896_p8, %p5895_p6 }
 0x150   : > { %p5891_p4 = pneg %p5890_p1 }
 0x152   : > { %p5898_p10 = pnand %p5897_p9, %p5891_p4 }
 0x154   : > { %5901 = shalt.err (!%p5898_p10)
}
 0x155   : > { %5391 = dma.hbm_to_vmem [thread:$0]  (!%p6483_p5), %s6334_s25, 16, %s824_s16, [#allocation8]  }
 0x156   : > { %s6285_s10 = smov [#allocation12]   ;;  %s6286_s28 = smov [#allocation15]  }
 0x157   : > { %s851_s5 = sshll.u32 %s6285_s10, 4  ;;  %s872_s7 = sshll.u32 %s6286_s28, 4  ;;  %s852_s5 = int_to_ptr.vmem [resolvable:$true] %s851_s5  ;;  %s873_s7 = int_to_ptr.vmem [resolvable:$true] %s872_s7 }
 0x158   : > { %s5902_s26 = scalar_lea.hbm %s7260_s8, 64 }
 0x159   : > { %p5903_p11 = scmp.ne.s32.totalorder %s7260_s8, %s5902_s26  ;;  %p5909_p13 = scmp.lt.u32.totalorder %s5902_s26, %s7260_s8 }
 0x15b   : > { %p5905_p12 = pnand %p5903_p11, %p6495_p7 }
 0x15d   : > { %p5906_p2 = pneg %p5905_p12 }
 0x15f   : > { %p5911_p0 = pnand %p5909_p13, %p5906_p2 }
 0x161   : > { %5914 = shalt.err (!%p5911_p0)
}
 0x162   : > { %s5915_s3 = scalar_lea.vmem %s852_s5, 64  ;;  %p5923_p6 = scmp.lt.s32.totalorder %s852_s5, %s852_s5 }
 0x163   : > { %p5916_p3 = scmp.ne.s32.totalorder %s852_s5, %s5915_s3  ;;  %p5924_p8 = scmp.lt.s32.totalorder %s5915_s3, %s5915_s3 }
 0x165   : > { %p5918_p1 = pnand %p5916_p3, %p6495_p7  ;;  %p5925_p9 = por %p5924_p8, %p5923_p6 }
 0x167   : > { %p5919_p4 = pneg %p5918_p1 }
 0x169   : > { %p5926_p10 = pnand %p5925_p9, %p5919_p4 }
 0x16b   : > { %5929 = shalt.err (!%p5926_p10)
}
 0x16c   : > { %5397 = dma.hbm_to_vmem [thread:$0]  (!%p6483_p5), %s7260_s8, 64, %s852_s5, [#allocation11]  }
 0x16d   : > { %s5930_s26 = scalar_lea.hbm %s6357_s19, 512 }
 0x16e   : > { %p5931_p11 = scmp.ne.s32.totalorder %s6357_s19, %s5930_s26  ;;  %p5937_p13 = scmp.lt.u32.totalorder %s5930_s26, %s6357_s19 }
 0x170   : > { %p5933_p12 = pnand %p5931_p11, %p6495_p7 }
 0x172   : > { %p5934_p2 = pneg %p5933_p12 }
 0x174   : > { %p5939_p0 = pnand %p5937_p13, %p5934_p2 }
 0x176   : > { %5942 = shalt.err (!%p5939_p0)
}
 0x177   : > { %s5943_s16 = scalar_lea.vmem %s873_s7, 512  ;;  %p5951_p6 = scmp.lt.s32.totalorder %s873_s7, %s873_s7 }
 0x178   : > { %p5944_p3 = scmp.ne.s32.totalorder %s873_s7, %s5943_s16  ;;  %p5952_p8 = scmp.lt.s32.totalorder %s5943_s16, %s5943_s16 }
 0x17a   : > { %p5946_p1 = pnand %p5944_p3, %p6495_p7  ;;  %p5953_p9 = por %p5952_p8, %p5951_p6 }
 0x17c   : > { %p5947_p4 = pneg %p5946_p1 }
 0x17e   : > { %p5954_p10 = pnand %p5953_p9, %p5947_p4 }
 0x180   : > { %5957 = shalt.err (!%p5954_p10)
}
 0x181   : > { %s7266_s18 = smov 128   ;;  %s7267_s10 = sld [smem:[#allocation55_spill]] }
 0x182   : > { %5403 = dma.hbm_to_vmem [thread:$0]  (!%p6483_p5), %s6357_s19, 512, %s873_s7, [#allocation14], %s7266_s18, %s7266_s18, %s7236_s0  }
 0x183   : > { %s6287_s5 = smov [#allocation18]   ;;  %s6288_s3 = smov [#allocation21]  }
 0x184   : > { %s897_s28 = sshll.u32 %s6287_s5, 4  ;;  %s922_s26 = sshll.u32 %s6288_s3, 4  ;;  %s898_s28 = int_to_ptr.vmem [resolvable:$true] %s897_s28  ;;  %s923_s26 = int_to_ptr.vmem [resolvable:$true] %s922_s26 }
 0x187   : > { %s5958_s16 = scalar_lea.hbm %s7267_s10, 64 }
 0x188   : > { %p5959_p11 = scmp.ne.s32.totalorder %s7267_s10, %s5958_s16  ;;  %p5965_p13 = scmp.lt.u32.totalorder %s5958_s16, %s7267_s10 }
 0x18a   : > { %p5961_p12 = pnand %p5959_p11, %p6495_p7 }
 0x18c   : > { %p5962_p2 = pneg %p5961_p12 }
 0x18e   : > { %p5967_p0 = pnand %p5965_p13, %p5962_p2 }
 0x190   : > { %5970 = shalt.err (!%p5967_p0)
}
 0x191   : > { %s5971_s1 = scalar_lea.vmem %s898_s28, 64  ;;  %p5979_p6 = scmp.lt.s32.totalorder %s898_s28, %s898_s28 }
 0x192   : > { %p5972_p3 = scmp.ne.s32.totalorder %s898_s28, %s5971_s1  ;;  %p5980_p8 = scmp.lt.s32.totalorder %s5971_s1, %s5971_s1 }
 0x194   : > { %p5974_p1 = pnand %p5972_p3, %p6495_p7  ;;  %p5981_p9 = por %p5980_p8, %p5979_p6 }
 0x196   : > { %p5975_p4 = pneg %p5974_p1 }
 0x198   : > { %p5982_p10 = pnand %p5981_p9, %p5975_p4 }
 0x19a   : > { %5985 = shalt.err (!%p5982_p10)
}
 0x19b   : > { %s7268_s7 = sld [smem:[#allocation58_spill]] }
 0x19c   : > { %5409 = dma.hbm_to_vmem [thread:$0]  (!%p6483_p5), %s7267_s10, 64, %s898_s28, [#allocation17]  }
 0x1a1   : > { %s5986_s5 = scalar_lea.hbm %s7268_s7, 16 }
 0x1a2   : > { %p5987_p11 = scmp.ne.s32.totalorder %s7268_s7, %s5986_s5  ;;  %p5993_p13 = scmp.lt.u32.totalorder %s5986_s5, %s7268_s7 }
 0x1a4   : > { %p5989_p12 = pnand %p5987_p11, %p6495_p7 }
 0x1a6   : > { %p5990_p2 = pneg %p5989_p12 }
 0x1a8   : > { %p5995_p0 = pnand %p5993_p13, %p5990_p2 }
 0x1aa   : > { %5998 = shalt.err (!%p5995_p0)
}
 0x1ab   : > { %s5999_s1 = scalar_lea.vmem %s923_s26, 16  ;;  %s6006_s3 = scalar_lea.vmem %s923_s26, 32 }
 0x1ac   : > { %p6000_p3 = scmp.ne.s32.totalorder %s923_s26, %s5999_s1  ;;  %p6007_p6 = scmp.lt.s32.totalorder %s923_s26, %s923_s26 }
 0x1ad   : > { %p6008_p8 = scmp.lt.s32.totalorder %s6006_s3, %s5999_s1 }
 0x1ae   : > { %p6002_p1 = pnand %p6000_p3, %p6495_p7 }
 0x1af   : > { %p6009_p9 = por %p6008_p8, %p6007_p6 }
 0x1b0   : > { %p6003_p4 = pneg %p6002_p1 }
 0x1b2   : > { %p6010_p10 = pnand %p6009_p9, %p6003_p4 }
 0x1b4   : > { %6013 = shalt.err (!%p6010_p10)
}
 0x1b5   : > { %s7269_s28 = sld [smem:[#allocation61_spill]]  ;;  %s6289_s16 = smov [#allocation24]  }
 0x1b6   : > { %5415 = dma.hbm_to_vmem [thread:$0]  (!%p6483_p5), %s7268_s7, 16, %s923_s26, [#allocation20]  }
 0x1b7   : > { %s948_s5 = sshll.u32 %s6289_s16, 4  ;;  %s6290_s0 = smov [#allocation27]   ;;  %s949_s5 = int_to_ptr.vmem [resolvable:$true] %s948_s5 }
 0x1b8   : > { %s974_s2 = sshll.u32 %s6290_s0, 4  ;;  %s975_s2 = int_to_ptr.vmem [resolvable:$true] %s974_s2 }
 0x1bb   : > { %s6014_s6 = scalar_lea.hbm %s7269_s28, 64 }
 0x1bc   : > { %p6015_p11 = scmp.ne.s32.totalorder %s7269_s28, %s6014_s6  ;;  %p6021_p13 = scmp.lt.u32.totalorder %s6014_s6, %s7269_s28 }
 0x1be   : > { %p6017_p12 = pnand %p6015_p11, %p6495_p7 }
 0x1c0   : > { %p6018_p2 = pneg %p6017_p12 }
 0x1c2   : > { %p6023_p0 = pnand %p6021_p13, %p6018_p2 }
 0x1c4   : > { %6026 = shalt.err (!%p6023_p0)
}
 0x1c5   : > { %s6027_s1 = scalar_lea.vmem %s949_s5, 64  ;;  %p6035_p6 = scmp.lt.s32.totalorder %s949_s5, %s949_s5 }
 0x1c6   : > { %p6028_p3 = scmp.ne.s32.totalorder %s949_s5, %s6027_s1  ;;  %p6036_p8 = scmp.lt.s32.totalorder %s6027_s1, %s6027_s1 }
 0x1c8   : > { %p6030_p1 = pnand %p6028_p3, %p6495_p7  ;;  %p6037_p9 = por %p6036_p8, %p6035_p6 }
 0x1ca   : > { %p6031_p4 = pneg %p6030_p1 }
 0x1cc   : > { %p6038_p10 = pnand %p6037_p9, %p6031_p4 }
 0x1ce   : > { %6041 = shalt.err (!%p6038_p10)
}
 0x1cf   : > { %s7270_s0 = smov 1   ;;  %s7271_s26 = smov 16  }
 0x1d0   : > { %s7272_s6 = sld [smem:[#allocation62_spill]] }
 0x1d1   : > { %5421 = dma.hbm_to_vmem [thread:$0]  (!%p6483_p5), %s7269_s28, 64, %s949_s5, [#allocation23], %s7271_s26, %s7271_s26, %s7270_s0  }
 0x1d6   : > { %s6042_s3 = scalar_lea.hbm %s7272_s6, 2048 }
 0x1d7   : > { %p6043_p11 = scmp.ne.s32.totalorder %s7272_s6, %s6042_s3  ;;  %p6049_p13 = scmp.lt.u32.totalorder %s6042_s3, %s7272_s6 }
 0x1d9   : > { %p6045_p12 = pnand %p6043_p11, %p6495_p7 }
 0x1db   : > { %p6046_p2 = pneg %p6045_p12 }
 0x1dd   : > { %p6051_p0 = pnand %p6049_p13, %p6046_p2 }
 0x1df   : > { %6054 = shalt.err (!%p6051_p0)
}
 0x1e0   : > { %s6055_s16 = scalar_lea.vmem %s975_s2, 2048  ;;  %p6063_p6 = scmp.lt.s32.totalorder %s975_s2, %s975_s2 }
 0x1e1   : > { %p6056_p3 = scmp.ne.s32.totalorder %s975_s2, %s6055_s16  ;;  %p6064_p8 = scmp.lt.s32.totalorder %s6055_s16, %s6055_s16 }
 0x1e3   : > { %p6058_p1 = pnand %p6056_p3, %p6495_p7  ;;  %p6065_p9 = por %p6064_p8, %p6063_p6 }
 0x1e5   : > { %p6059_p4 = pneg %p6058_p1 }
 0x1e7   : > { %p6066_p10 = pnand %p6065_p9, %p6059_p4 }
 0x1e9   : > { %6069 = shalt.err (!%p6066_p10)
}
 0x1ea   : > { %s7273_s5 = smov 8   ;;  %s7274_s1 = sld [smem:[#allocation63_spill]] }
 0x1eb   : > { %5427 = dma.hbm_to_vmem [thread:$0]  (!%p6483_p5), %s7272_s6, 2048, %s975_s2, [#allocation26], %s7266_s18, %s7266_s18, %s7273_s5  }
 0x1ec   : > { %s6291_s0 = smov [#allocation30]   ;;  %s6292_s3 = smov [#allocation33]  }
 0x1ed   : > { %s1000_s26 = sshll.u32 %s6291_s0, 4  ;;  %s1026_s7 = sshll.u32 %s6292_s3, 4  ;;  %s1001_s26 = int_to_ptr.vmem [resolvable:$true] %s1000_s26  ;;  %s1027_s7 = int_to_ptr.vmem [resolvable:$true] %s1026_s7 }
 0x1f0   : > { %s6070_s16 = scalar_lea.hbm %s7274_s1, 2048 }
 0x1f1   : > { %p6071_p11 = scmp.ne.s32.totalorder %s7274_s1, %s6070_s16  ;;  %p6077_p13 = scmp.lt.u32.totalorder %s6070_s16, %s7274_s1 }
 0x1f3   : > { %p6073_p12 = pnand %p6071_p11, %p6495_p7 }
 0x1f5   : > { %p6074_p2 = pneg %p6073_p12 }
 0x1f7   : > { %p6079_p0 = pnand %p6077_p13, %p6074_p2 }
 0x1f9   : > { %6082 = shalt.err (!%p6079_p0)
}
 0x1fa   : > { %s6083_s8 = scalar_lea.vmem %s1001_s26, 2048  ;;  %p6091_p6 = scmp.lt.s32.totalorder %s1001_s26, %s1001_s26 }
 0x1fb   : > { %p6084_p3 = scmp.ne.s32.totalorder %s1001_s26, %s6083_s8  ;;  %p6092_p8 = scmp.lt.s32.totalorder %s6083_s8, %s6083_s8 }
 0x1fd   : > { %p6086_p1 = pnand %p6084_p3, %p6495_p7  ;;  %p6093_p9 = por %p6092_p8, %p6091_p6 }
 0x1ff   : > { %p6087_p4 = pneg %p6086_p1 }
 0x201   : > { %p6094_p10 = pnand %p6093_p9, %p6087_p4 }
 0x203   : > { %6097 = shalt.err (!%p6094_p10)
}
 0x204   : > { %s7275_s2 = sld [smem:[#allocation64_spill]] }
 0x205   : > { %5433 = dma.hbm_to_vmem [thread:$0]  (!%p6483_p5), %s7274_s1, 2048, %s1001_s26, [#allocation29], %s7266_s18, %s7266_s18, %s7273_s5  }
 0x20a   : > { %s6098_s0 = scalar_lea.hbm %s7275_s2, 2048 }
 0x20b   : > { %p6099_p11 = scmp.ne.s32.totalorder %s7275_s2, %s6098_s0  ;;  %p6105_p13 = scmp.lt.u32.totalorder %s6098_s0, %s7275_s2 }
 0x20d   : > { %p6101_p12 = pnand %p6099_p11, %p6495_p7 }
 0x20f   : > { %p6102_p2 = pneg %p6101_p12 }
 0x211   : > { %p6107_p0 = pnand %p6105_p13, %p6102_p2 }
 0x213   : > { %6110 = shalt.err (!%p6107_p0)
}
 0x214   : > { %s6111_s8 = scalar_lea.vmem %s1027_s7, 2048  ;;  %p6119_p6 = scmp.lt.s32.totalorder %s1027_s7, %s1027_s7 }
 0x215   : > { %p6112_p3 = scmp.ne.s32.totalorder %s1027_s7, %s6111_s8  ;;  %p6120_p8 = scmp.lt.s32.totalorder %s6111_s8, %s6111_s8 }
 0x217   : > { %p6114_p1 = pnand %p6112_p3, %p6495_p7  ;;  %p6121_p9 = por %p6120_p8, %p6119_p6 }
 0x219   : > { %p6115_p4 = pneg %p6114_p1 }
 0x21b   : > { %p6122_p10 = pnand %p6121_p9, %p6115_p4 }
 0x21d   : > { %6125 = shalt.err (!%p6122_p10)
}
 0x21e   : > { %s7276_s26 = sld [smem:[#allocation65_spill]]  ;;  %s6293_s3 = smov [#allocation36]  }
 0x21f   : > { %5439 = dma.hbm_to_vmem [thread:$0]  (!%p6483_p5), %s7275_s2, 2048, %s1027_s7, [#allocation32], %s7266_s18, %s7266_s18, %s7273_s5  }
 0x220   : > { %s1052_s16 = sshll.u32 %s6293_s3, 4  ;;  %s6294_s0 = smov [#allocation37]   ;;  %s1053_s16 = int_to_ptr.vmem [resolvable:$true] %s1052_s16 }
 0x221   : > { %s1066_s1 = sshll.u32 %s6294_s0, 4  ;;  %s1067_s1 = int_to_ptr.vmem [resolvable:$true] %s1066_s1 }
 0x224   : > { %s6126_s8 = scalar_lea.hbm %s7276_s26, 512 }
 0x225   : > { %p6127_p11 = scmp.ne.s32.totalorder %s7276_s26, %s6126_s8  ;;  %p6133_p13 = scmp.lt.u32.totalorder %s6126_s8, %s7276_s26 }
 0x227   : > { %p6129_p12 = pnand %p6127_p11, %p6495_p7 }
 0x229   : > { %p6130_p2 = pneg %p6129_p12 }
 0x22b   : > { %p6135_p0 = pnand %p6133_p13, %p6130_p2 }
 0x22d   : > { %6138 = shalt.err (!%p6135_p0)
}
 0x22e   : > { %s6139_s6 = scalar_lea.vmem %s1053_s16, 512  ;;  %p6147_p6 = scmp.lt.s32.totalorder %s1053_s16, %s1053_s16 }
 0x22f   : > { %p6140_p3 = scmp.ne.s32.totalorder %s1053_s16, %s6139_s6  ;;  %p6148_p8 = scmp.lt.s32.totalorder %s6139_s6, %s6139_s6 }
 0x231   : > { %p6142_p1 = pnand %p6140_p3, %p6495_p7  ;;  %p6149_p9 = por %p6148_p8, %p6147_p6 }
 0x233   : > { %p6143_p4 = pneg %p6142_p1 }
 0x235   : > { %p6150_p10 = pnand %p6149_p9, %p6143_p4 }
 0x237   : > { %6153 = shalt.err (!%p6150_p10)
}
 0x238   : > { %s7277_s7 = sld [smem:[#allocation66_spill]] }
 0x239   : > { %5445 = dma.hbm_to_vmem [thread:$0]  (!%p6483_p5), %s7276_s26, 512, %s1053_s16, [#allocation35], %s7266_s18, %s7266_s18, %s7273_s5  }
 0x23e   : > { %s6154_s3 = scalar_lea.hbm %s7277_s7, 16 }
 0x23f   : > { %p6155_p11 = scmp.ne.s32.totalorder %s7277_s7, %s6154_s3  ;;  %p6161_p13 = scmp.lt.u32.totalorder %s6154_s3, %s7277_s7 }
 0x241   : > { %p6157_p12 = pnand %p6155_p11, %p6495_p7 }
 0x243   : > { %p6158_p2 = pneg %p6157_p12 }
 0x245   : > { %p6163_p0 = pnand %p6161_p13, %p6158_p2 }
 0x247   : > { %6166 = shalt.err (!%p6163_p0)
}
 0x248   : > { %s6167_s6 = scalar_lea.vmem %s1067_s1, 16  ;;  %s6174_s0 = scalar_lea.vmem %s1067_s1, 32 }
 0x249   : > { %p6168_p3 = scmp.ne.s32.totalorder %s1067_s1, %s6167_s6  ;;  %p6175_p6 = scmp.lt.s32.totalorder %s1067_s1, %s1067_s1 }
 0x24a   : > { %p6176_p8 = scmp.lt.s32.totalorder %s6174_s0, %s6167_s6 }
 0x24b   : > { %p6170_p1 = pnand %p6168_p3, %p6495_p7 }
 0x24c   : > { %p6177_p9 = por %p6176_p8, %p6175_p6 }
 0x24d   : > { %p6171_p4 = pneg %p6170_p1 }
 0x24f   : > { %p6178_p10 = pnand %p6177_p9, %p6171_p4 }
 0x251   : > { %6181 = shalt.err (!%p6178_p10)
}
 0x252   : > { %5448 = dma.hbm_to_vmem [thread:$0]  (!%p6483_p5), %s7277_s7, 16, %s1067_s1, [#allocation38]  }
 0x253   : > { %p7278_p11 = scmp.ne.s32.totalorder %s7263_s23, 0 }
 0x254   : > { %p7279_p12 = scmp.eq.s32.totalorder (!%p7278_p11), %s6466_s20, 0 }
 0x255   : > { %1106 = sbr.rel (%p7278_p11) target bundleno = 5324 (0x14cc), region = 144 }
 0x25c   : > { %6187 = dma.done.wait (%p7279_p12), [#allocation6], 16   ;;  %p7280_p2 = pmov %p7279_p12 }
 0x25e   : > { %6189 = vsyncadd (%p7280_p2), [#allocation6], 4294967280  ;;  %p7281_p7 = pmov %p7280_p2 }
 0x25f   : > { %p7282_p13 = pmov %p7280_p2 }
 0x260   : > { %6191 = dma.done.wait (%p7281_p7), [#allocation8], 32  }
 0x261   : > { %6193 = vsyncadd (%p7282_p13), [#allocation8], 4294967264  ;;  %p7283_p0 = pmov %p7280_p2 }
 0x263   : > { %6195 = dma.done.wait (%p7283_p0), [#allocation11], 80   ;;  %p7284_p5 = pmov %p7283_p0 }
 0x264   : > { %p7285_p3 = pmov %p7283_p0 }
 0x265   : > { %6197 = vsyncadd (%p7284_p5), [#allocation11], 4294967216 }
 0x266   : > { %6199 = dma.done.wait (%p7285_p3), [#allocation14], 528   ;;  %p7286_p1 = pmov %p7283_p0 }
 0x267   : > { %p7287_p4 = pmov %p7283_p0 }
 0x268   : > { %6201 = vsyncadd (%p7286_p1), [#allocation14], 4294966768 }
 0x269   : > { %6203 = dma.done.wait (%p7287_p4), [#allocation17], 80   ;;  %p7288_p6 = pmov %p7283_p0 }
 0x26a   : > { %p7289_p8 = pmov %p7283_p0 }
 0x26b   : > { %6205 = vsyncadd (%p7288_p6), [#allocation17], 4294967216 }
 0x26c   : > { %6207 = dma.done.wait (%p7289_p8), [#allocation20], 32   ;;  %p7290_p9 = pmov %p7283_p0 }
 0x26d   : > { %p7291_p10 = pmov %p7283_p0 }
 0x26e   : > { %6209 = vsyncadd (%p7290_p9), [#allocation20], 4294967264 }
 0x26f   : > { %6211 = dma.done.wait (%p7291_p10), [#allocation23], 128   ;;  %p7292_p11 = pmov %p7283_p0 }
 0x270   : > { %p7293_p12 = pmov %p7283_p0 }
 0x271   : > { %6213 = vsyncadd (%p7292_p11), [#allocation23], 4294967168 }
 0x272   : > { %6215 = dma.done.wait (%p7293_p12), [#allocation26], 4096   ;;  %p7294_p2 = pmov %p7283_p0 }
 0x273   : > { %p7295_p7 = pmov %p7283_p0 }
 0x274   : > { %6217 = vsyncadd (%p7294_p2), [#allocation26], 4294963200 }
 0x275   : > { %6219 = dma.done.wait (%p7295_p7), [#allocation29], 2112   ;;  %p7296_p13 = pmov %p7283_p0 }
 0x277   : > { %6221 = vsyncadd (%p7296_p13), [#allocation29], 4294965184 }
 0x278   : > { %6223 = dma.done.wait (%p7283_p0), [#allocation32], 2112   ;;  %p7297_p5 = pmov %p7283_p0 }
 0x279   : > { %p7298_p3 = pmov %p7283_p0 }
 0x27a   : > { %6225 = vsyncadd (%p7297_p5), [#allocation32], 4294965184 }
 0x27b   : > { %6227 = dma.done.wait (%p7298_p3), [#allocation35], 576   ;;  %p7299_p1 = pmov %p7283_p0 }
 0x27c   : > { %p7300_p4 = pmov %p7283_p0 }
 0x27d   : > { %6229 = vsyncadd (%p7299_p1), [#allocation35], 4294966720 }
 0x27e   : > { %6231 = dma.done.wait (%p7300_p4), [#allocation38], 16   ;;  %p7301_p6 = pmov %p7283_p0 }
 0x27f   : > { %s7302_s23 = sld [smem:[#allocation52_spill]]  ;;  %s7303_s4 = sld [smem:[#allocation51_spill]]  ;;  %v1400_v4 = vld [vmem:[#allocation12] sm:$0xf]  ;;  %vm1417_vm0 = vcmask 1043456   ;;  %v6295_v6 = vmov 0.0   ;;  %v1911_v35 = vlaneseq }
 0x280   : > { %6233 = vsyncadd (%p7301_p6), [#allocation38], 4294967280  ;;  %p1276_p8 = scmp.lt.s32.totalorder %s6466_s20, 1  ;;  %4876 = vmatprep.subr.mxu1 %v6295_v6  ;;  %vm6296_vm1 = vmmov 0   ;;  %v4684_v7 = vld [vmem:[#allocation5] ss:$0 sm:$0xff]  ;;  %4892 = vmatprep.subr.mxu0 %v6295_v6 }
 0x281   : > { %4878 = vmatprep.mubr.msk.f32.mxu1 %vm6296_vm1, %v6295_v6  ;;  %v4685_v8 = vld [vmem:[#allocation7] ss:$0 sm:$0xff]  ;;  %4877 = vmatpush3.msk.msra.mxu1 %vm1417_vm0, %v1400_v4  ;;  %v6297_v10 = vmov 0   ;;  %vm1413_vm2 = vcmask 31744   ;;  %vm1350_vm3 = vcmask 64512   ;;  %v1402_v19 = vld [vmem:[#allocation15] sm:$0xff] }
 0x282   : > { %s7308_s20 = smov (!%p1276_p8, %s6466_s20), 1  ;;  %5564 = vset.pattern.permute.xlu1 %v6297_v10  ;;  %4894 = vmatprep.mubr.msk.f32.mxu0 %vm6296_vm1, %v6295_v6  ;;  %v4682_v16 = vld [vmem:[#allocation2] ss:$0 sm:$0xff]  ;;  %v4683_v17 = vld [vmem:[#allocation3] ss:$0 sm:$0xff]  ;;  %v6298_v21 = vmov 0.0|0.0  }
 0x283   : > { %s6826_s15 = sshll.u32 %s7308_s20, 3  ;;  %v1573_v18 = vld [vmem:[#allocation18] sm:$0xf]  ;;  %v1403_v20 = vld [vmem:[#allocation15 + $0x8] sm:$0xff]  ;;  %5150 = vmatprep.subr.bf16.mxu1 %v6298_v21  ;;  %v1404_v23 = vld [vmem:[#allocation15 + $0x10] sm:$0xff]  ;;  %vm1498_vm4 = vcmask 261120  }
 0x284   : > { %4893 = vmatpush3.msk.msra.mxu0 %vm1417_vm0, %v1573_v18  ;;  %v5151_v22 = vpack.c.bf16 %v1403_v20, %v1402_v19  ;;  %v1405_v24 = vld [vmem:[#allocation15 + $0x18] sm:$0xff]  ;;  %vm1362_vm5 = vcmask 7168   ;;  %vm1364_vm6 = vcmask 15360   ;;  %vm1366_vm7 = vcmask 23552   ;;  %v4686_v36 = vld [vmem:[#allocation9] ss:$0 sm:$0xff]  ;;  %s1291_s6 = scalar_lea.vmem %s6452_s30, %s6826_s15 }
 0x285   : > { %s1283_s18 = scalar_lea.vmem %s7302_s23, %s6826_s15  ;;  %s1279_s5 = scalar_lea.vmem %s7303_s4, %s6826_s15  ;;  %5156 = vmatprep.subr.bf16.mxu0 %v6298_v21  ;;  %v5154_v25 = vpack.c.bf16 %v1405_v24, %v1404_v23  ;;  %v4688_v26 = vld [vmem:[#allocation13] ss:$0 sm:$0xff]  ;;  %v4687_v39 = vld [vmem:[#allocation10] ss:$0 sm:$0xff]  ;;  %v6854_v42 = vshrl.u32 %v1911_v35, 7 }
 0x286   : > { %v6830_v3 = vld [vmem:[%s1283_s18] sm:$0xff]  ;;  %s7304_s20 = sld [smem:[#allocation57_spill]]  ;;  %s7305_s1 = sld [smem:[#allocation59_spill]]  ;;  %v4693_v19 = vld [vmem:[#allocation19] ss:$0 sm:$0xff] }
 0x287   : > { %1296 = vxpose.xlu0.b32.start.end [1/1] (short) (narrow) %v6830_v3, 8  ;;  %v1292_v5 = vld [vmem:[%s1279_s5] sm:$0xff]  ;;  %v6861_v46 = vsub.s32 0, %v6854_v42  ;;  %v2041_v47 = vsub.s32 5, %v6854_v42  ;;  %v2013_v52 = vsub.s32 1, %v6854_v42  ;;  %v2020_v54 = vsub.s32 2, %v6854_v42 }
 0x288   : > { %v1375_v9 = vadd.f32 %v4684_v7, %v1292_v5  ;;  %v2027_v56 = vsub.s32 3, %v6854_v42  ;;  %v2034_v58 = vsub.s32 4, %v6854_v42  ;;  %v2048_v63 = vsub.s32 6, %v6854_v42  ;;  %v1828_v20 = vld [vmem:[#allocation25] sm:$0xff]  ;;  %s6299_s16 = smov 96   ;;  %s7306_s8 = sld [smem:[#allocation53_spill]] }
 0x289   : > { %v2055_v1 = vsub.s32 7, %v6854_v42 }
 0x28a   : > { %v1383_v11 = vmul.f32 %v4685_v8, %v1375_v9 }
 0x28c   : > { %4879 = vmatmul.mubr.msk.f32.vlgmr.msra.gmra.mrb[0].mxu1 %vm1413_vm2, %v1383_v11  ;;  %v1575_v59 = vld [vmem:[%s7304_s20] sm:$0xff]  ;;  %v1576_v60 = vld [vmem:[%s7304_s20 + $0x8] sm:$0xff]  ;;  %v1577_v4 = vld [vmem:[%s7304_s20 + $0x10] sm:$0xff] }
 0x28d   : > { %4889 = vmatprep.mubr.msk.f32.mxu1 %vm6296_vm1, %v6295_v6  ;;  %5152 = vmatpush3.bf16.msra.mxu1 %v5151_v22  ;;  %v5157_v61 = vpack.c.bf16 %v1576_v60, %v1575_v59  ;;  %v1578_v5 = vld [vmem:[%s7304_s20 + $0x18] sm:$0xff]  ;;  %v1743_v8 = vld [vmem:[%s7305_s1] sm:$0xff]  ;;  %v1744_v9 = vld [vmem:[%s7305_s1 + $0x8] sm:$0xff]  ;;  %v6300_v60 = vmov 1966171168  }
 0x28e   : > { %5153 = vmatprep.subr.bf16.mxu1 %v6298_v21  ;;  %v5160_v7 = vpack.c.bf16 %v1578_v5, %v1577_v4  ;;  %v1745_v11 = vld [vmem:[%s7305_s1 + $0x10] sm:$0xff]  ;;  %v4699_v4 = vld [vmem:[#allocation22] ss:$0 sm:$0xff]  ;;  %s1287_s3 = scalar_lea.vmem %s7306_s8, %s6826_s15 }
 0x28f   : > { %v1829_v22 = vld [vmem:[#allocation25 + $0x8] sm:$0xff] }
 0x291   : > { %5155 = vmatpush3.bf16.msra.mxu1 %v5154_v25 }
 0x292   : > { %5162 = vmatprep.subr.bf16.mxu1 %v6298_v21 }
 0x2b0   : > { %5565 = vset.pattern.permute.xlu0 %v6297_v10  ;;  %v5163_v10 = vpack.c.bf16 %v1744_v9, %v1743_v8  ;;  %v4701_v9 = vld [vmem:[#allocation24] ss:$0 sm:$0xff] }
 0x307   : > { %v1312_v12 = vpop.trf.xlu0 }
 0x308   : > { %v1356_v13 = vsel %vm1350_vm3, %v1312_v12, -inf  ;;  %v1351_v14 = vsel %vm1350_vm3, %v1312_v12, 0.0  ;;  %v1359_v15 = vsel %vm1350_vm3, %v1312_v12, inf }
 0x309   : > { %1357 = vmax.xlane.f32.xlu1 %v1356_v13  ;;  %1352 = vadd.xlane.f32.xlu0 %v1351_v14  ;;  %v4691_v14 = vld [vmem:[#allocation16] ss:$0 sm:$0xff] }
 0x30d   : > { %1360 = vmin.xlane.f32.xlu1 %v1359_v15 }
 0x31e   : > { %1334 = vperm.xlu1 %5564, %v4682_v16  }
 0x322   : > { %1344 = vperm.xlu1 %5564, %v4683_v17  }
 0x35f   : > { %v1487_v27 = vpop.f32.mrb[0].mxu1 }
 0x360   : > { %v1488_v28 = vadd.f32 %v4688_v26, %v1487_v27  ;;  %v4880_v29 = vpop.f32.mrb[1].mxu1  ;;  %v5169_v26 = vpack.c.bf16 %v1829_v22, %v1828_v20 }
 0x361   : > { %v1830_v29 = vld [vmem:[#allocation25 + $0x10] sm:$0xff] }
 0x362   : > { %v1491_v30 = vmax.f32 %v1488_v28, 0.0 }
 0x364   : > { %4890 = vmatmul.mubr.msk.f32.vlgmr.msra.gmra.mrb[2].mxu1 %vm1498_vm4, %v1491_v30  ;;  %v1831_v30 = vld [vmem:[#allocation25 + $0x18] sm:$0xff] }
 0x365   : > { %4916 = vmatprep.mubr.msk.f32.mxu1 %vm6296_vm1, %v6295_v6  ;;  %5164 = vmatpush3.bf16.msra.mxu1 %v5163_v10 }
 0x366   : > { %5165 = vmatprep.subr.bf16.mxu1 %v6298_v21 }
 0x396   : > { %v1358_v31 = vpop.xlane.xlu1 %1357  ;;  %v1353_v32 = vpop.xlane.xlu0 %1352 }
 0x397   : > { %v1355_v33 = vmul.f32 0.125, %v1353_v32 }
 0x399   : > { %v1363_v34 = vsel %vm1362_vm5, %v1355_v33, %v1358_v31  ;;  %v5172_v31 = vpack.c.bf16 %v1831_v30, %v1830_v29 }
 0x39a   : > { %v1361_v37 = vpop.xlane.xlu1 %1360 }
 0x39b   : > { %v1365_v38 = vsel %vm1364_vm6, %v1363_v34, %v1361_v37 }
 0x39c   : > { %v1367_v40 = vsel %vm1366_vm7, %v1365_v38, %v1353_v32 }
 0x39d   : > { %v1391_v41 = vadd.f32 %v4686_v36, %v1367_v40 }
 0x39e   : > { %v6856_v43 = vpop.permute.xlu1 %1334 }
 0x39f   : > { %v1399_v44 = vmul.f32 %v4687_v39, %v1391_v41  ;;  %v1348_v45 = vadd.f32 %v6856_v43, %v1312_v12  ;;  %v1746_v12 = vld [vmem:[%s7305_s1 + $0x18] sm:$0xff]  ;;  %v1337_v28 = vadd.f32 %v6856_v43, %v6830_v3 }
 0x3a0   : > { %v5166_v13 = vpack.c.bf16 %v1746_v12, %v1745_v11  ;;  %v4696_v43 = vld [vmem:[#allocation21] ss:$0 sm:$0xff] }
 0x3a1   : > { %4895 = vmatmul.mubr.msk.f32.vlgmr.msra.gmra.mrb[0].mxu0 %vm1413_vm2, %v1399_v44 }
 0x3a2   : > { %v6864_v48 = vpop.permute.xlu1 %1344  ;;  %4905 = vmatprep.mubr.msk.f32.mxu0 %vm6296_vm1, %v6295_v6  ;;  %5158 = vmatpush3.bf16.msra.mxu0 %v5157_v61  ;;  %v1909_v61 = vunpack.c.l.s4 %v6300_v60 }
 0x3a3   : > { %v1349_v49 = vmul.f32 %v1348_v45, %v6864_v48  ;;  %5159 = vmatprep.subr.bf16.mxu0 %v6298_v21  ;;  %5167 = vmatpush3.bf16.msra.mxu1 %v5166_v13  ;;  %v1347_v32 = vmul.f32 %v6864_v48, %v1337_v28 }
 0x3a4   : > { %5174 = vmatprep.subr.bf16.mxu1 %v6298_v21 }
 0x3a5   : > { %v2007_v50 = vrot.slane %v1349_v49, %v6861_v46  ;;  %v2042_v51 = vrot.slane %v1349_v49, %v2041_v47  ;;  %v2014_v53 = vrot.slane %v1349_v49, %v2013_v52  ;;  %v2021_v55 = vrot.slane %v1349_v49, %v2020_v54 }
 0x3a6   : > { %v2028_v57 = vrot.slane %v1349_v49, %v2027_v56  ;;  %v2035_v62 = vrot.slane %v1349_v49, %v2034_v58  ;;  %v2049_v0 = vrot.slane %v1349_v49, %v2048_v63  ;;  %v2056_v2 = vrot.slane %v1349_v49, %v2055_v1  ;;  %5161 = vmatpush3.bf16.msra.mxu0 %v5160_v7  ;;  %v2105_v49 = vld [vmem:[#allocation27] sm:$0xff] }
 0x3a7   : > { %2009 = vbcast.lane.b32.xlu1 %v2007_v50, 256  ;;  %2044 = vbcast.lane.b32.xlu0 %v2042_v51, 256  ;;  %v2650_v33 = vrot.slane %v1347_v32, %v2027_v56  ;;  %v2664_v34 = vrot.slane %v1347_v32, %v2041_v47  ;;  %v2678_v35 = vrot.slane %v1347_v32, %v2055_v1  ;;  %v2106_v50 = vld [vmem:[#allocation27 + $0x8] sm:$0xff] }
 0x3a8   : > { %5168 = vmatprep.subr.bf16.mxu0 %v6298_v21  ;;  %v2629_v3 = vrot.slane %v1347_v32, %v6861_v46  ;;  %v2636_v38 = vrot.slane %v1347_v32, %v2013_v52  ;;  %v2643_v39 = vrot.slane %v1347_v32, %v2020_v54  ;;  %v2657_v40 = vrot.slane %v1347_v32, %v2034_v58  ;;  %v2107_v52 = vld [vmem:[#allocation27 + $0x10] sm:$0xff] }
 0x3a9   : > { %v2671_v41 = vrot.slane %v1347_v32, %v2048_v63  ;;  %v5175_v51 = vpack.c.bf16 %v2106_v50, %v2105_v49  ;;  %v2191_v56 = vld [vmem:[#allocation30 + $0x8] sm:$0xff]  ;;  %v1910_v63 = vunpack.c.0.s8 %v1909_v61 }
 0x3ab   : > { %2016 = vbcast.lane.b32.xlu1 %v2014_v53, 256  ;;  %2652 = vbcast.lane.b32.xlu0 %v2650_v33, 256  ;;  %v2108_v53 = vld [vmem:[#allocation27 + $0x18] sm:$0xff]  ;;  %v6941_v1 = vsub.s32 %v1910_v63, %v6854_v42 }
 0x3ac   : > { %v5178_v54 = vpack.c.bf16 %v2108_v53, %v2107_v52 }
 0x3af   : > { %2023 = vbcast.lane.b32.xlu1 %v2021_v55, 256  ;;  %2666 = vbcast.lane.b32.xlu0 %v2664_v34, 256  ;;  %v2190_v55 = vld [vmem:[#allocation30] sm:$0xff] }
 0x3b3   : > { %2030 = vbcast.lane.b32.xlu1 %v2028_v57, 256  ;;  %2680 = vbcast.lane.b32.xlu0 %v2678_v35, 256  ;;  %v5181_v57 = vpack.c.bf16 %v2191_v56, %v2190_v55 }
 0x3b7   : > { %2037 = vbcast.lane.b32.xlu1 %v2035_v62, 256 }
 0x3bb   : > { %2051 = vbcast.lane.b32.xlu1 %v2049_v0, 256 }
 0x3bf   : > { %2058 = vbcast.lane.b32.xlu1 %v2056_v2, 256 }
 0x419   : > { %v6932_v58 = vpop.permute.xlu1 %2009 }
 0x41a   : > { %v2066_v20 = vmul.f32 %v4701_v9, %v6932_v58 }
 0x41d   : > { %v6934_v59 = vpop.permute.xlu1 %2016 }
 0x41e   : > { %v2067_v22 = vmul.f32 %v4701_v9, %v6934_v59 }
 0x421   : > { %v6936_v62 = vpop.permute.xlu1 %2023 }
 0x425   : > { %v6938_v0 = vpop.permute.xlu1 %2030 }
 0x426   : > { %v2069_v29 = vmul.f32 %v4701_v9, %v6938_v0 }
 0x429   : > { %v6944_v10 = vpop.permute.xlu1 %2037 }
 0x42d   : > { %v6959_v33 = vpop.permute.xlu1 %2051 }
 0x42e   : > { %v2072_v60 = vmul.f32 %v4701_v9, %v6959_v33 }
 0x431   : > { %v6970_v61 = vpop.permute.xlu1 %2058 }
 0x437   : > { %v1568_v15 = vpop.f32.mrb[2].mxu1 }
 0x438   : > { %v6898_v16 = vadd.f32 %v4691_v14, %v1568_v15  ;;  %v4891_v17 = vpop.f32.mrb[3].mxu1 }
 0x43a   : > { %v1572_v18 = vmax.f32 %v6898_v16, 0.0 }
 0x43c   : > { %4917 = vmatmul.mubr.msk.f32.vlgmr.msra.gmra.mrb[4].mxu1 %vm1498_vm4, %v1572_v18 }
 0x43d   : > { %4938 = vmatprep.mubr.msk.f32.mxu1 %vm6296_vm1, %v6295_v6  ;;  %5176 = vmatpush3.bf16.msra.mxu1 %v5175_v51 }
 0x43e   : > { %5177 = vmatprep.subr.bf16.mxu1 %v6298_v21 }
 0x441   : > { %5179 = vmatpush3.bf16.msra.mxu1 %v5178_v54 }
 0x442   : > { %5186 = vmatprep.subr.bf16.mxu1 %v6298_v21 }
 0x474   : > { %v1658_v23 = vpop.f32.mrb[0].mxu0 }
 0x475   : > { %v1659_v24 = vadd.f32 %v4693_v19, %v1658_v23  ;;  %v4896_v25 = vpop.f32.mrb[1].mxu0  ;;  %v2068_v23 = vmul.f32 %v4701_v9, %v6936_v62 }
 0x477   : > { %v1662_v27 = vmax.f32 %v1659_v24, 0.0 }
 0x479   : > { %4906 = vmatmul.mubr.msk.f32.vlgmr.msra.gmra.mrb[2].mxu0 %vm1498_vm4, %v1662_v27 }
 0x47a   : > { %5170 = vmatpush3.bf16.msra.mxu0 %v5169_v26  ;;  %4927 = vmatprep.mubr.msk.f32.mxu0 %vm6296_vm1, %v6295_v6 }
 0x47b   : > { %5171 = vmatprep.subr.bf16.mxu0 %v6298_v21 }
 0x47e   : > { %5173 = vmatpush3.bf16.msra.mxu0 %v5172_v31 }
 0x47f   : > { %5180 = vmatprep.subr.bf16.mxu0 %v6298_v21 }
 0x50f   : > { %v1816_v36 = vpop.f32.mrb[4].mxu1 }
 0x510   : > { %2195 = vrot.lane.b32.xlu1 %v1816_v36, %s6299_s16  ;;  %v4918_v37 = vpop.f32.mrb[5].mxu1  ;;  %v1827_v14 = vadd.f32 %v4699_v4, %v1816_v36 }
 0x514   : > { %2631 = vbcast.lane.b32.xlu1 %v2629_v3, 256 }
 0x518   : > { %2638 = vbcast.lane.b32.xlu1 %v2636_v38, 256 }
 0x51c   : > { %2645 = vbcast.lane.b32.xlu1 %v2643_v39, 256 }
 0x520   : > { %2659 = vbcast.lane.b32.xlu1 %v2657_v40, 256 }
 0x524   : > { %2673 = vbcast.lane.b32.xlu1 %v2671_v41, 256  ;;  %v6964_v41 = vpop.permute.xlu0 %2044 }
 0x525   : > { %v2071_v54 = vmul.f32 %v4701_v9, %v6964_v41 }
 0x54c   : > { %v1738_v44 = vpop.f32.mrb[2].mxu0 }
 0x54d   : > { %v1739_v45 = vadd.f32 %v4696_v43, %v1738_v44  ;;  %v4907_v47 = vpop.f32.mrb[3].mxu0 }
 0x54f   : > { %v1742_v48 = vmax.f32 %v1739_v45, 0.0 }
 0x551   : > { %4928 = vmatmul.mubr.msk.f32.vlgmr.msra.gmra.mrb[4].mxu0 %vm1498_vm4, %v1742_v48  ;;  %v2070_v48 = vmul.f32 %v4701_v9, %v6944_v10 }
 0x552   : > { %4949 = vmatprep.mubr.msk.f32.mxu0 %vm6296_vm1, %v6295_v6  ;;  %5182 = vmatpush3.bf16.msra.mxu0 %v5181_v57 }
 0x553   : > { %5183 = vmatprep.subr.bf16.mxu0 %v6298_v21 }
 0x624   : > { %v1901_v2 = vpop.f32.mrb[4].mxu0 }
 0x625   : > { %v1907_v5 = vcombine.high %v1901_v2, %v1901_v2  ;;  %v1914_v7 = vrot.slane %v1901_v2, %v6941_v1  ;;  %v4929_v8 = vpop.f32.mrb[5].mxu0 }
 0x626   : > { %v2073_v8 = vmul.f32 %v4701_v9, %v6970_v61 }
 0x627   : > { %v1921_v11 = vrot.slane %v1907_v5, %v6941_v1  ;;  %v1922_v12 = vcombine.high %v1914_v7, %v1914_v7  ;;  %v1930_v13 = vrot.slane %v1914_v7, %v6941_v1 }
 0x629   : > { %v1923_v15 = vcombine.high %v1921_v11, %v1921_v11  ;;  %v1937_v17 = vrot.slane %v1921_v11, %v6941_v1  ;;  %v1944_v42 = vrot.slane %v1922_v12, %v6941_v1  ;;  %v1952_v19 = vcombine.high %v1930_v13, %v1930_v13 }
 0x62a   : > { %v1959_v24 = vrot.slane %v1930_v13, %v6861_v46 }
 0x62b   : > { %v1951_v25 = vrot.slane %v1923_v15, %v6941_v1  ;;  %v1953_v26 = vcombine.high %v1937_v17, %v1937_v17  ;;  %v1954_v27 = vcombine.high %v1944_v42, %v1944_v42  ;;  %v1963_v28 = vrot.slane %v1944_v42, %v6861_v46 }
 0x62c   : > { %v1967_v30 = vrot.slane %v1952_v19, %v6861_v46  ;;  %v1975_v31 = vrot.slane %v1937_v17, %v6861_v46  ;;  %v1996_v32 = vadd.f32 %v1959_v24, %v1827_v14 }
 0x62d   : > { %v1955_v34 = vcombine.high %v1951_v25, %v1951_v25  ;;  %v1971_v35 = vrot.slane %v1954_v27, %v6861_v46  ;;  %v1979_v36 = vrot.slane %v1951_v25, %v6861_v46  ;;  %v1983_v3 = vrot.slane %v1953_v26, %v6861_v46 }
 0x62e   : > { %v1997_v37 = vadd.f32 %v1963_v28, %v1827_v14  ;;  %v1998_v38 = vadd.f32 %v1967_v30, %v1827_v14  ;;  %v2000_v39 = vadd.f32 %v1975_v31, %v1827_v14  ;;  %v2074_v40 = vadd.f32 %v2066_v20, %v1996_v32  ;;  %v2192_v30 = vld [vmem:[#allocation30 + $0x10] sm:$0xff]  ;;  %v2193_v31 = vld [vmem:[#allocation30 + $0x18] sm:$0xff] }
 0x62f   : > { %v1987_v43 = vrot.slane %v1955_v34, %v6861_v46  ;;  %v1999_v44 = vadd.f32 %v1971_v35, %v1827_v14  ;;  %v2001_v45 = vadd.f32 %v1979_v36, %v1827_v14  ;;  %v2002_v47 = vadd.f32 %v1983_v3, %v1827_v14  ;;  %v2280_v34 = vld [vmem:[#allocation33] sm:$0xff]  ;;  %v2281_v35 = vld [vmem:[#allocation33 + $0x8] sm:$0xff]  ;;  %v2109_v3 = vld [vmem:[#allocation28] sm:$0x1] }
 0x630   : > { %v2075_v49 = vadd.f32 %v2067_v22, %v1997_v37  ;;  %v2076_v50 = vadd.f32 %v2068_v23, %v1998_v38  ;;  %v2082_v51 = vmax.f32 %v2074_v40, 0.0  ;;  %v2078_v55 = vadd.f32 %v2070_v48, %v2000_v39  ;;  %v4707_v48 = vld [vmem:[%s7305_s1 + $0x20] sm:$0xff] }
 0x631   : > { %v2003_v52 = vadd.f32 %v1987_v43, %v1827_v14  ;;  %v2077_v53 = vadd.f32 %v2069_v29, %v1999_v44  ;;  %v2079_v63 = vadd.f32 %v2071_v54, %v2001_v45  ;;  %v2080_v11 = vadd.f32 %v2072_v60, %v2002_v47  ;;  %v2282_v44 = vld [vmem:[#allocation33 + $0x10] sm:$0xff]  ;;  %v2283_v45 = vld [vmem:[#allocation33 + $0x18] sm:$0xff] }
 0x632   : > { %v2083_v56 = vmax.f32 %v2075_v49, 0.0  ;;  %v2084_v57 = vmax.f32 %v2076_v50, 0.0  ;;  %v2090_v4 = vsel %vm1498_vm4, %v2082_v51, 0.0  ;;  %v2086_v12 = vmax.f32 %v2078_v55, 0.0  ;;  %v4708_v49 = vld [vmem:[%s7305_s1 + $0x28] sm:$0xff]  ;;  %v2196_v51 = vpop.permute.xlu1 %2195 }
 0x633   : > { %v2085_v2 = vmax.f32 %v2077_v53, 0.0  ;;  %v2087_v15 = vmax.f32 %v2079_v63, 0.0  ;;  %v2081_v42 = vadd.f32 %v2073_v8, %v2003_v52  ;;  %v2088_v20 = vmax.f32 %v2080_v11, 0.0  ;;  %v4704_v53 = vld [vmem:[#allocation31] ss:$0 sm:$0xff]  ;;  %v4709_v8 = vld [vmem:[%s7305_s1 + $0x30] sm:$0xff] }
 0x634   : > { %v2091_v5 = vsel %vm1498_vm4, %v2083_v56, 0.0  ;;  %v2093_v13 = vsel %vm1498_vm4, %v2084_v57, 0.0  ;;  %v2097_v22 = vsel %vm1498_vm4, %v2086_v12, 0.0  ;;  %v5184_v32 = vpack.c.bf16 %v2193_v31, %v2192_v30  ;;  %v2452_v56 = vld [vmem:[#allocation25 + $0x20] sm:$0xff]  ;;  %v2453_v57 = vld [vmem:[#allocation25 + $0x28] sm:$0xff]  ;;  %v4710_v11 = vld [vmem:[%s7305_s1 + $0x38] sm:$0xff] }
 0x635   : > { %v2092_v7 = vadd.f32 %v2091_v5, %v2090_v4  ;;  %v2095_v17 = vsel %vm1498_vm4, %v2085_v2, 0.0  ;;  %v2099_v24 = vsel %vm1498_vm4, %v2087_v15, 0.0  ;;  %v2089_v25 = vmax.f32 %v2081_v42, 0.0  ;;  %v2454_v4 = vld [vmem:[#allocation25 + $0x30] sm:$0xff]  ;;  %v2455_v5 = vld [vmem:[#allocation25 + $0x38] sm:$0xff]  ;;  %v2728_v42 = vld [vmem:[#allocation27 + $0x20] sm:$0xff] }
 0x636   : > { %v2101_v9 = vsel %vm1498_vm4, %v2088_v20, 0.0  ;;  %5185 = vmatpush3.bf16.msra.mxu0 %v5184_v32  ;;  %v5187_v36 = vpack.c.bf16 %v2281_v35, %v2280_v34  ;;  %v2110_v37 = vmul.f32 8.0, %v2109_v3  ;;  %v5190_v47 = vpack.c.bf16 %v2283_v45, %v2282_v44  ;;  %v2730_v20 = vld [vmem:[#allocation27 + $0x30] sm:$0xff] }
 0x637   : > { %v2094_v14 = vadd.f32 %v2093_v13, %v2092_v7  ;;  %v2103_v28 = vsel %vm1498_vm4, %v2089_v25, 0.0  ;;  %5192 = vmatprep.subr.bf16.mxu0 %v6298_v21  ;;  %v5193_v50 = vpack.c.bf16 %v4708_v49, %v4707_v48  ;;  %v5199_v63 = vpack.c.bf16 %v2453_v57, %v2452_v56  ;;  %v4705_v13 = vld [vmem:[#allocation34] ss:$0 sm:$0xff]  ;;  %v7015_v25 = vpop.permute.xlu1 %2631  ;;  %v2816_v30 = vld [vmem:[#allocation30 + $0x28] sm:$0xff]  ;;  %v4712_v48 = vld [vmem:[#allocation22 + $0x1] ss:$0 sm:$0xff] }
 0x638   : > { %v2115_v38 = vrot.slane %v2110_v37, %v6861_v46  ;;  %v5202_v7 = vpack.c.bf16 %v2455_v5, %v2454_v4  ;;  %v5196_v12 = vpack.c.bf16 %v4710_v11, %v4709_v8 }
 0x639   : > { %v2096_v19 = vadd.f32 %v2095_v17, %v2094_v14 }
 0x63b   : > { %v2098_v23 = vadd.f32 %v2097_v22, %v2096_v19  ;;  %v2729_v19 = vld [vmem:[#allocation27 + $0x28] sm:$0xff] }
 0x63c   : > { %v5205_v22 = vpack.c.bf16 %v2729_v19, %v2728_v42 }
 0x63d   : > { %v2100_v26 = vadd.f32 %v2099_v24, %v2098_v23  ;;  %v2731_v23 = vld [vmem:[#allocation27 + $0x38] sm:$0xff] }
 0x63e   : > { %v5208_v24 = vpack.c.bf16 %v2731_v23, %v2730_v20 }
 0x63f   : > { %v2102_v27 = vadd.f32 %v2101_v9, %v2100_v26 }
 0x641   : > { %v2104_v29 = vadd.f32 %v2103_v28, %v2102_v27  ;;  %v7019_v28 = vpop.permute.xlu1 %2638 }
 0x643   : > { %4939 = vmatmul.mubr.msk.f32.vlgmr.msra.gmra.mrb[6].mxu1 %vm1498_vm4, %v2104_v29  ;;  %v2815_v29 = vld [vmem:[#allocation30 + $0x20] sm:$0xff] }
 0x644   : > { %4960 = vmatprep.mubr.msk.f32.mxu1 %vm6296_vm1, %v6295_v6  ;;  %5188 = vmatpush3.bf16.msra.mxu1 %v5187_v36  ;;  %v5211_v31 = vpack.c.bf16 %v2816_v30, %v2815_v29 }
 0x645   : > { %5189 = vmatprep.subr.bf16.mxu1 %v6298_v21  ;;  %v7022_v35 = vpop.permute.xlu1 %2645 }
 0x648   : > { %5191 = vmatpush3.bf16.msra.mxu1 %v5190_v47 }
 0x649   : > { %5198 = vmatprep.subr.bf16.mxu1 %v6298_v21 }
 0x716   : > { %v2186_v39 = vpop.f32.mrb[6].mxu1 }
 0x717   : > { %v2187_v40 = vadd.f32 %v2186_v39, %v2115_v38  ;;  %v4940_v43 = vpop.f32.mrb[7].mxu1  ;;  %v4714_v39 = vld [vmem:[#allocation24 + $0x1] ss:$0 sm:$0xff] }
 0x718   : > { %v2688_v49 = vmul.f32 %v4714_v39, %v7015_v25 }
 0x719   : > { %4950 = vmatmul.mubr.msk.f32.vlgmr.msra.gmra.mrb[6].mxu0 %vm1498_vm4, %v2187_v40  ;;  %v7028_v40 = vpop.permute.xlu0 %2652 }
 0x71a   : > { %4971 = vmatprep.mubr.msk.f32.mxu0 %vm6296_vm1, %v6295_v6  ;;  %5194 = vmatpush3.bf16.msra.mxu0 %v5193_v50  ;;  %v2691_v50 = vmul.f32 %v4714_v39, %v7028_v40 }
 0x71b   : > { %5195 = vmatprep.subr.bf16.mxu0 %v6298_v21 }
 0x71d   : > { %v7042_v5 = vpop.permute.xlu0 %2666 }
 0x71e   : > { %5197 = vmatpush3.bf16.msra.mxu0 %v5196_v12 }
 0x71f   : > { %5204 = vmatprep.subr.bf16.mxu0 %v6298_v21 }
 0x7ec   : > { %v2267_v52 = vpop.f32.mrb[6].mxu0 }
 0x7ed   : > { %v2268_v54 = vadd.f32 %v2267_v52, %v2196_v51  ;;  %v4951_v55 = vpop.f32.mrb[7].mxu0  ;;  %v7032_v51 = vpop.permute.xlu1 %2659  ;;  %v2689_v52 = vmul.f32 %v4714_v39, %v7019_v28 }
 0x7ef   : > { %v2278_v60 = vadd.f32 %v4704_v53, %v2268_v54  ;;  %v2690_v53 = vmul.f32 %v4714_v39, %v7022_v35  ;;  %v2692_v54 = vmul.f32 %v4714_v39, %v7032_v51 }
 0x7f1   : > { %v2279_v2 = vmax.f32 %v2278_v60, 0.0 }
 0x7f3   : > { %4961 = vmatmul.mubr.msk.f32.vlgmr.msra.gmra.mrb[8].mxu1 %vm1498_vm4, %v2279_v2 }
 0x7f4   : > { %5200 = vmatpush3.bf16.msra.mxu1 %v5199_v63  ;;  %4982 = vmatprep.mubr.msk.f32.mxu1 %vm6296_vm1, %v6295_v6 }
 0x7f5   : > { %5201 = vmatprep.subr.bf16.mxu1 %v6298_v21 }
 0x7f8   : > { %5203 = vmatpush3.bf16.msra.mxu1 %v5202_v7 }
 0x7f9   : > { %5210 = vmatprep.subr.bf16.mxu1 %v6298_v21 }
 0x7fb   : > { %4983 = vmatmul.mubr.msk.f32.vlgmr.msra.gmra.mrb[10].mxu1 %vm1498_vm4, %v1572_v18 }
 0x7fc   : > { %5004 = vmatprep.mubr.msk.f32.mxu1 %vm6296_vm1, %v6295_v6  ;;  %5212 = vmatpush3.bf16.msra.mxu1 %v5211_v31 }
 0x7fd   : > { %5213 = vmatprep.subr.bf16.mxu1 %v6298_v21 }
 0x8c6   : > { %v2360_v14 = vpop.f32.mrb[8].mxu1 }
 0x8c7   : > { %v7007_v15 = vadd.f32 %v4705_v13, %v2360_v14  ;;  %v4962_v17 = vpop.f32.mrb[9].mxu1 }
 0x8c9   : > { %4972 = vmatmul.mubr.msk.f32.vlgmr.msra.gmra.mrb[8].mxu0 %vm1498_vm4, %v7007_v15 }
 0x8ca   : > { %4993 = vmatprep.mubr.msk.f32.mxu0 %vm6296_vm1, %v6295_v6  ;;  %5206 = vmatpush3.bf16.msra.mxu0 %v5205_v22  ;;  %v7048_v22 = vpop.permute.xlu1 %2673 }
 0x8cb   : > { %5207 = vmatprep.subr.bf16.mxu0 %v6298_v21 }
 0x8ce   : > { %v2522_v16 = vpop.f32.mrb[10].mxu1  ;;  %5209 = vmatpush3.bf16.msra.mxu0 %v5208_v24 }
 0x8cf   : > { %v4984_v18 = vpop.f32.mrb[11].mxu1  ;;  %5216 = vmatprep.subr.bf16.mxu0 %v6298_v21  ;;  %v2529_v26 = vcombine.high %v2522_v16, %v2522_v16  ;;  %v2536_v9 = vrot.slane %v2522_v16, %v6941_v1 }
 0x8d1   : > { %v2543_v27 = vrot.slane %v2529_v26, %v6941_v1  ;;  %v2544_v32 = vcombine.high %v2536_v9, %v2536_v9  ;;  %v2552_v36 = vrot.slane %v2536_v9, %v6941_v1 }
 0x8d3   : > { %v2545_v34 = vcombine.high %v2543_v27, %v2543_v27  ;;  %v2566_v3 = vrot.slane %v2544_v32, %v6941_v1  ;;  %v2559_v37 = vrot.slane %v2543_v27, %v6941_v1  ;;  %v2574_v43 = vcombine.high %v2552_v36, %v2552_v36 }
 0x8d4   : > { %v2581_v55 = vrot.slane %v2552_v36, %v6861_v46  ;;  %v2693_v27 = vmul.f32 %v4714_v39, %v7042_v5  ;;  %v2694_v36 = vmul.f32 %v4714_v39, %v7048_v22 }
 0x8d5   : > { %v2573_v38 = vrot.slane %v2545_v34, %v6941_v1  ;;  %v2576_v44 = vcombine.high %v2566_v3, %v2566_v3  ;;  %v2575_v45 = vcombine.high %v2559_v37, %v2559_v37  ;;  %v2585_v57 = vrot.slane %v2566_v3, %v6861_v46  ;;  %v7051_v34 = vpop.permute.xlu0 %2680 }
 0x8d6   : > { %v2589_v60 = vrot.slane %v2574_v43, %v6861_v46  ;;  %v2597_v7 = vrot.slane %v2559_v37, %v6861_v46 }
 0x8d7   : > { %v2577_v47 = vcombine.high %v2573_v38, %v2573_v38  ;;  %v2593_v63 = vrot.slane %v2576_v44, %v6861_v46  ;;  %v2601_v8 = vrot.slane %v2573_v38, %v6861_v46  ;;  %v2605_v11 = vrot.slane %v2575_v45, %v6861_v46 }
 0x8d8   : > { %v2695_v45 = vmul.f32 %v4714_v39, %v7051_v34 }
 0x8d9   : > { %v2609_v12 = vrot.slane %v2577_v47, %v6861_v46 }
 0x99c   : > { %v2438_v56 = vpop.f32.mrb[8].mxu0 }
 0x99d   : > { %v2450_v2 = vadd.f32 %v4712_v48, %v2438_v56  ;;  %2820 = vrot.lane.b32.xlu1 %v2438_v56, %s6299_s16  ;;  %v4973_v4 = vpop.f32.mrb[9].mxu0 }
 0x99f   : > { %v2618_v13 = vadd.f32 %v2581_v55, %v2450_v2  ;;  %v2619_v14 = vadd.f32 %v2585_v57, %v2450_v2  ;;  %v2620_v17 = vadd.f32 %v2589_v60, %v2450_v2  ;;  %v2621_v16 = vadd.f32 %v2593_v63, %v2450_v2 }
 0x9a0   : > { %v2622_v18 = vadd.f32 %v2597_v7, %v2450_v2  ;;  %v2623_v42 = vadd.f32 %v2601_v8, %v2450_v2  ;;  %v2624_v19 = vadd.f32 %v2605_v11, %v2450_v2  ;;  %v2625_v20 = vadd.f32 %v2609_v12, %v2450_v2  ;;  %v2817_v12 = vld [vmem:[#allocation30 + $0x30] sm:$0xff] }
 0x9a1   : > { %v2696_v23 = vadd.f32 %v2688_v49, %v2618_v13  ;;  %v2697_v24 = vadd.f32 %v2689_v52, %v2619_v14  ;;  %v2698_v26 = vadd.f32 %v2690_v53, %v2620_v17  ;;  %v2699_v9 = vadd.f32 %v2691_v50, %v2621_v16  ;;  %v2818_v13 = vld [vmem:[#allocation30 + $0x38] sm:$0xff]  ;;  %v2907_v17 = vld [vmem:[#allocation33 + $0x20] sm:$0xff]  ;;  %v2908_v16 = vld [vmem:[#allocation33 + $0x28] sm:$0xff] }
 0x9a2   : > { %v2700_v29 = vadd.f32 %v2692_v54, %v2622_v18  ;;  %v2701_v3 = vadd.f32 %v2693_v27, %v2623_v42  ;;  %v2702_v47 = vadd.f32 %v2694_v36, %v2624_v19  ;;  %v2703_v52 = vadd.f32 %v2695_v45, %v2625_v20  ;;  %v2733_v42 = vld [vmem:[#allocation28 + $0x1] sm:$0x1]  ;;  %v3081_v45 = vld [vmem:[#allocation25 + $0x48] sm:$0xff] }
 0x9a3   : > { %v2704_v30 = vmax.f32 %v2696_v23, 0.0  ;;  %v2705_v31 = vmax.f32 %v2697_v24, 0.0  ;;  %v2706_v32 = vmax.f32 %v2698_v26, 0.0  ;;  %v2707_v37 = vmax.f32 %v2699_v9, 0.0  ;;  %v2909_v9 = vld [vmem:[#allocation33 + $0x30] sm:$0xff]  ;;  %v2910_v27 = vld [vmem:[#allocation33 + $0x38] sm:$0xff] }
 0x9a4   : > { %v2708_v48 = vmax.f32 %v2700_v29, 0.0  ;;  %v2709_v53 = vmax.f32 %v2701_v3, 0.0  ;;  %v2710_v56 = vmax.f32 %v2702_v47, 0.0  ;;  %v2711_v63 = vmax.f32 %v2703_v52, 0.0  ;;  %v3083_v52 = vld [vmem:[#allocation25 + $0x58] sm:$0xff] }
 0x9a5   : > { %v2712_v38 = vsel %vm1498_vm4, %v2704_v30, 0.0  ;;  %v2713_v43 = vsel %vm1498_vm4, %v2705_v31, 0.0  ;;  %v2715_v49 = vsel %vm1498_vm4, %v2706_v32, 0.0  ;;  %v2717_v54 = vsel %vm1498_vm4, %v2707_v37, 0.0  ;;  %v4720_v30 = vld [vmem:[%s7305_s1 + $0x40] sm:$0xff]  ;;  %v4721_v31 = vld [vmem:[%s7305_s1 + $0x48] sm:$0xff] }
 0x9a6   : > { %v2714_v44 = vadd.f32 %v2713_v43, %v2712_v38  ;;  %v2719_v57 = vsel %vm1498_vm4, %v2708_v48, 0.0  ;;  %v2721_v2 = vsel %vm1498_vm4, %v2709_v53, 0.0  ;;  %v2723_v39 = vsel %vm1498_vm4, %v2710_v56, 0.0  ;;  %v4717_v37 = vld [vmem:[#allocation31 + $0x1] ss:$0 sm:$0xff] }
 0x9a7   : > { %v2725_v8 = vsel %vm1498_vm4, %v2711_v63, 0.0  ;;  %v5214_v14 = vpack.c.bf16 %v2818_v13, %v2817_v12  ;;  %v5217_v18 = vpack.c.bf16 %v2908_v16, %v2907_v17  ;;  %v2734_v19 = vmul.f32 8.0, %v2733_v42  ;;  %v3303_v12 = vld [vmem:[#allocation27 + $0x58] sm:$0xff]  ;;  %v3388_v42 = vld [vmem:[#allocation30 + $0x48] sm:$0xff] }
 0x9a8   : > { %v2716_v50 = vadd.f32 %v2715_v49, %v2714_v44  ;;  %v5220_v29 = vpack.c.bf16 %v2910_v27, %v2909_v9  ;;  %v5223_v32 = vpack.c.bf16 %v4721_v31, %v4720_v30  ;;  %v3080_v44 = vld [vmem:[#allocation25 + $0x40] sm:$0xff] }
 0x9a9   : > { %5215 = vmatpush3.bf16.msra.mxu1 %v5214_v14  ;;  %v2739_v20 = vrot.slane %v2734_v19, %v6861_v46  ;;  %v5229_v48 = vpack.c.bf16 %v3081_v45, %v3080_v44 }
 0x9aa   : > { %v2718_v55 = vadd.f32 %v2717_v54, %v2716_v50  ;;  %5222 = vmatprep.subr.bf16.mxu1 %v6298_v21  ;;  %v3082_v50 = vld [vmem:[#allocation25 + $0x50] sm:$0xff] }
 0x9ab   : > { %v5232_v53 = vpack.c.bf16 %v3083_v52, %v3082_v50  ;;  %v4722_v54 = vld [vmem:[%s7305_s1 + $0x50] sm:$0xff] }
 0x9ac   : > { %v2720_v60 = vadd.f32 %v2719_v57, %v2718_v55  ;;  %v4723_v55 = vld [vmem:[%s7305_s1 + $0x58] sm:$0xff]  ;;  %v4718_v57 = vld [vmem:[#allocation34 + $0x1] ss:$0 sm:$0xff] }
 0x9ad   : > { %v5226_v56 = vpack.c.bf16 %v4723_v55, %v4722_v54 }
 0x9ae   : > { %v2722_v4 = vadd.f32 %v2721_v2, %v2720_v60 }
 0x9b0   : > { %v2724_v7 = vadd.f32 %v2723_v39, %v2722_v4  ;;  %v3300_v39 = vld [vmem:[#allocation27 + $0x40] sm:$0xff] }
 0x9b2   : > { %v2726_v11 = vadd.f32 %v2725_v8, %v2724_v7  ;;  %v3301_v7 = vld [vmem:[#allocation27 + $0x48] sm:$0xff]  ;;  %v3302_v8 = vld [vmem:[#allocation27 + $0x50] sm:$0xff] }
 0x9b3   : > { %v5238_v13 = vpack.c.bf16 %v3303_v12, %v3302_v8 }
 0x9b4   : > { %4994 = vmatmul.mubr.msk.f32.vlgmr.msra.gmra.mrb[10].mxu0 %vm1498_vm4, %v2726_v11  ;;  %v5235_v11 = vpack.c.bf16 %v3301_v7, %v3300_v39 }
 0x9b5   : > { %5015 = vmatprep.mubr.msk.f32.mxu0 %vm6296_vm1, %v6295_v6  ;;  %5218 = vmatpush3.bf16.msra.mxu0 %v5217_v18  ;;  %v3387_v18 = vld [vmem:[#allocation30 + $0x40] sm:$0xff] }
 0x9b6   : > { %5219 = vmatprep.subr.bf16.mxu0 %v6298_v21  ;;  %v5241_v19 = vpack.c.bf16 %v3388_v42, %v3387_v18 }
 0x9b9   : > { %5221 = vmatpush3.bf16.msra.mxu0 %v5220_v29  ;;  %v4727_v29 = vld [vmem:[#allocation24 + $0x2] ss:$0 sm:$0xff] }
 0x9ba   : > { %5228 = vmatprep.subr.bf16.mxu0 %v6298_v21  ;;  %v3263_v44 = vmul.f32 %v4727_v29, %v6938_v0  ;;  %v3264_v45 = vmul.f32 %v4727_v29, %v6944_v10 }
 0xa0f   : > { %v2821_v36 = vpop.permute.xlu1 %2820 }
 0xa87   : > { %v2810_v23 = vpop.f32.mrb[10].mxu0 }
 0xa88   : > { %v2811_v24 = vadd.f32 %v2810_v23, %v2739_v20  ;;  %v4995_v26 = vpop.f32.mrb[11].mxu0 }
 0xa8a   : > { %5005 = vmatmul.mubr.msk.f32.vlgmr.msra.gmra.mrb[12].mxu1 %vm1498_vm4, %v2811_v24 }
 0xa8b   : > { %5026 = vmatprep.mubr.msk.f32.mxu1 %vm6296_vm1, %v6295_v6  ;;  %5224 = vmatpush3.bf16.msra.mxu1 %v5223_v32 }
 0xa8c   : > { %5225 = vmatprep.subr.bf16.mxu1 %v6298_v21 }
 0xa8f   : > { %5227 = vmatpush3.bf16.msra.mxu1 %v5226_v56 }
 0xa90   : > { %5234 = vmatprep.subr.bf16.mxu1 %v6298_v21 }
 0xb5d   : > { %v2892_v3 = vpop.f32.mrb[12].mxu1 }
 0xb5e   : > { %v2893_v38 = vadd.f32 %v2892_v3, %v2821_v36  ;;  %v5006_v43 = vpop.f32.mrb[13].mxu1  ;;  %v4725_v3 = vld [vmem:[#allocation22 + $0x2] ss:$0 sm:$0xff] }
 0xb5f   : > { %v3262_v43 = vmul.f32 %v4727_v29, %v6936_v62 }
 0xb60   : > { %v2904_v47 = vadd.f32 %v4717_v37, %v2893_v38  ;;  %v3260_v37 = vmul.f32 %v4727_v29, %v6932_v58  ;;  %v3261_v38 = vmul.f32 %v4727_v29, %v6934_v59 }
 0xb62   : > { %v2905_v49 = vmax.f32 %v2904_v47, 0.0  ;;  %v3266_v47 = vmul.f32 %v4727_v29, %v6959_v33 }
 0xb64   : > { %5016 = vmatmul.mubr.msk.f32.vlgmr.msra.gmra.mrb[12].mxu0 %vm1498_vm4, %v2905_v49 }
 0xb65   : > { %5230 = vmatpush3.bf16.msra.mxu0 %v5229_v48  ;;  %5037 = vmatprep.mubr.msk.f32.mxu0 %vm6296_vm1, %v6295_v6 }
 0xb66   : > { %5231 = vmatprep.subr.bf16.mxu0 %v6298_v21 }
 0xb69   : > { %5233 = vmatpush3.bf16.msra.mxu0 %v5232_v53 }
 0xb6a   : > { %5240 = vmatprep.subr.bf16.mxu0 %v6298_v21 }
 0xb6c   : > { %5038 = vmatmul.mubr.msk.f32.vlgmr.msra.gmra.mrb[14].mxu0 %vm1498_vm4, %v7007_v15 }
 0xb6d   : > { %5059 = vmatprep.mubr.msk.f32.mxu0 %vm6296_vm1, %v6295_v6  ;;  %5242 = vmatpush3.bf16.msra.mxu0 %v5241_v19 }
 0xb6e   : > { %5243 = vmatprep.subr.bf16.mxu0 %v6298_v21 }
 0xc37   : > { %v2988_v60 = vpop.f32.mrb[12].mxu0 }
 0xc38   : > { %v7088_v63 = vadd.f32 %v4718_v57, %v2988_v60  ;;  %v5017_v2 = vpop.f32.mrb[13].mxu0 }
 0xc3a   : > { %5027 = vmatmul.mubr.msk.f32.vlgmr.msra.gmra.mrb[14].mxu1 %vm1498_vm4, %v7088_v63 }
 0xc3b   : > { %5048 = vmatprep.mubr.msk.f32.mxu1 %vm6296_vm1, %v6295_v6  ;;  %5236 = vmatpush3.bf16.msra.mxu1 %v5235_v11 }
 0xc3c   : > { %5237 = vmatprep.subr.bf16.mxu1 %v6298_v21 }
 0xc3f   : > { %v3150_v15 = vpop.f32.mrb[14].mxu0  ;;  %5239 = vmatpush3.bf16.msra.mxu1 %v5238_v13 }
 0xc40   : > { %v5039_v4 = vpop.f32.mrb[15].mxu0  ;;  %5246 = vmatprep.subr.bf16.mxu1 %v6298_v21  ;;  %v3157_v14 = vcombine.high %v3150_v15, %v3150_v15  ;;  %v3164_v17 = vrot.slane %v3150_v15, %v6941_v1 }
 0xc42   : > { %v3171_v16 = vrot.slane %v3157_v14, %v6941_v1  ;;  %v3172_v20 = vcombine.high %v3164_v17, %v3164_v17  ;;  %v3180_v24 = vrot.slane %v3164_v17, %v6941_v1  ;;  %v3265_v14 = vmul.f32 %v4727_v29, %v6964_v41 }
 0xc44   : > { %v3173_v23 = vcombine.high %v3171_v16, %v3171_v16  ;;  %v3194_v26 = vrot.slane %v3172_v20, %v6941_v1  ;;  %v3187_v9 = vrot.slane %v3171_v16, %v6941_v1  ;;  %v3202_v30 = vcombine.high %v3180_v24, %v3180_v24 }
 0xc45   : > { %v3209_v48 = vrot.slane %v3180_v24, %v6861_v46 }
 0xc46   : > { %v3201_v27 = vrot.slane %v3173_v23, %v6941_v1  ;;  %v3204_v31 = vcombine.high %v3194_v26, %v3194_v26  ;;  %v3203_v32 = vcombine.high %v3187_v9, %v3187_v9  ;;  %v3213_v50 = vrot.slane %v3194_v26, %v6861_v46 }
 0xc47   : > { %v3217_v52 = vrot.slane %v3202_v30, %v6861_v46  ;;  %v3225_v62 = vrot.slane %v3187_v9, %v6861_v46  ;;  %v3267_v26 = vmul.f32 %v4727_v29, %v6970_v61 }
 0xc48   : > { %v3205_v36 = vcombine.high %v3201_v27, %v3201_v27  ;;  %v3221_v53 = vrot.slane %v3204_v31, %v6861_v46  ;;  %v3229_v0 = vrot.slane %v3201_v27, %v6861_v46  ;;  %v3233_v10 = vrot.slane %v3203_v32, %v6861_v46 }
 0xc4a   : > { %v3237_v33 = vrot.slane %v3205_v36, %v6861_v46 }
 0xd0d   : > { %v3066_v49 = vpop.f32.mrb[14].mxu1 }
 0xd0e   : > { %v3078_v58 = vadd.f32 %v4725_v3, %v3066_v49  ;;  %3392 = vrot.lane.b32.xlu0 %v3066_v49, %s6299_s16  ;;  %v5028_v59 = vpop.f32.mrb[15].mxu1  ;;  %v3389_v49 = vld [vmem:[#allocation30 + $0x50] sm:$0xff] }
 0xd10   : > { %v3246_v54 = vadd.f32 %v3209_v48, %v3078_v58  ;;  %v3247_v55 = vadd.f32 %v3213_v50, %v3078_v58  ;;  %v3248_v56 = vadd.f32 %v3217_v52, %v3078_v58  ;;  %v3249_v57 = vadd.f32 %v3221_v53, %v3078_v58  ;;  %v3390_v50 = vld [vmem:[#allocation30 + $0x58] sm:$0xff]  ;;  %v3479_v53 = vld [vmem:[#allocation33 + $0x40] sm:$0xff] }
 0xd11   : > { %v3250_v60 = vadd.f32 %v3225_v62, %v3078_v58  ;;  %v3251_v2 = vadd.f32 %v3229_v0, %v3078_v58  ;;  %v3252_v15 = vadd.f32 %v3233_v10, %v3078_v58  ;;  %v3253_v4 = vadd.f32 %v3237_v33, %v3078_v58  ;;  %v3480_v58 = vld [vmem:[#allocation33 + $0x48] sm:$0xff]  ;;  %v3305_v62 = vld [vmem:[#allocation28 + $0x2] sm:$0x1] }
 0xd12   : > { %v3268_v39 = vadd.f32 %v3260_v37, %v3246_v54  ;;  %v3269_v7 = vadd.f32 %v3261_v38, %v3247_v55  ;;  %v3270_v8 = vadd.f32 %v3262_v43, %v3248_v56  ;;  %v3271_v11 = vadd.f32 %v3263_v44, %v3249_v57  ;;  %v3481_v56 = vld [vmem:[#allocation33 + $0x50] sm:$0xff]  ;;  %v3482_v57 = vld [vmem:[#allocation33 + $0x58] sm:$0xff] }
 0xd13   : > { %v3272_v12 = vadd.f32 %v3264_v45, %v3250_v60  ;;  %v3274_v13 = vadd.f32 %v3266_v47, %v3252_v15  ;;  %v3273_v42 = vadd.f32 %v3265_v14, %v3251_v2  ;;  %v3275_v31 = vadd.f32 %v3267_v26, %v3253_v4  ;;  %v4733_v2 = vld [vmem:[%s7305_s1 + $0x60] sm:$0xff]  ;;  %v4734_v15 = vld [vmem:[%s7305_s1 + $0x68] sm:$0xff] }
 0xd14   : > { %v3276_v17 = vmax.f32 %v3268_v39, 0.0  ;;  %v3277_v16 = vmax.f32 %v3269_v7, 0.0  ;;  %v3278_v18 = vmax.f32 %v3270_v8, 0.0  ;;  %v3279_v19 = vmax.f32 %v3271_v11, 0.0  ;;  %v4730_v8 = vld [vmem:[#allocation31 + $0x2] ss:$0 sm:$0xff] }
 0xd15   : > { %v3280_v9 = vmax.f32 %v3272_v12, 0.0  ;;  %v3281_v32 = vmax.f32 %v3273_v42, 0.0  ;;  %v3282_v3 = vmax.f32 %v3274_v13, 0.0  ;;  %v3283_v43 = vmax.f32 %v3275_v31, 0.0  ;;  %v3652_v13 = vld [vmem:[#allocation25 + $0x60] sm:$0xff]  ;;  %v3653_v14 = vld [vmem:[#allocation25 + $0x68] sm:$0xff] }
 0xd16   : > { %v3284_v20 = vsel %vm1498_vm4, %v3276_v17, 0.0  ;;  %v3285_v23 = vsel %vm1498_vm4, %v3277_v16, 0.0  ;;  %v3287_v27 = vsel %vm1498_vm4, %v3278_v18, 0.0  ;;  %v3289_v41 = vsel %vm1498_vm4, %v3279_v19, 0.0  ;;  %v3654_v42 = vld [vmem:[#allocation25 + $0x70] sm:$0xff]  ;;  %v3655_v19 = vld [vmem:[#allocation25 + $0x78] sm:$0xff] }
 0xd17   : > { %v3286_v24 = vadd.f32 %v3285_v23, %v3284_v20  ;;  %v3291_v37 = vsel %vm1498_vm4, %v3280_v9, 0.0  ;;  %v3293_v44 = vsel %vm1498_vm4, %v3281_v32, 0.0  ;;  %v3295_v47 = vsel %vm1498_vm4, %v3282_v3, 0.0  ;;  %v4735_v23 = vld [vmem:[%s7305_s1 + $0x70] sm:$0xff]  ;;  %v4731_v9 = vld [vmem:[#allocation34 + $0x2] ss:$0 sm:$0xff] }
 0xd18   : > { %v3297_v29 = vsel %vm1498_vm4, %v3283_v43, 0.0  ;;  %v5244_v52 = vpack.c.bf16 %v3390_v50, %v3389_v49  ;;  %v5247_v59 = vpack.c.bf16 %v3480_v58, %v3479_v53  ;;  %v3306_v0 = vmul.f32 8.0, %v3305_v62  ;;  %v3874_v3 = vld [vmem:[#allocation27 + $0x70] sm:$0xff]  ;;  %v4740_v62 = vld [vmem:[#allocation24 + $0x3] ss:$0 sm:$0xff] }
 0xd19   : > { %v3288_v30 = vadd.f32 %v3287_v27, %v3286_v24  ;;  %v5250_v60 = vpack.c.bf16 %v3482_v57, %v3481_v56  ;;  %v5253_v4 = vpack.c.bf16 %v4734_v15, %v4733_v2  ;;  %v5259_v16 = vpack.c.bf16 %v3653_v14, %v3652_v13  ;;  %v4736_v24 = vld [vmem:[%s7305_s1 + $0x78] sm:$0xff] }
 0xd1a   : > { %5245 = vmatpush3.bf16.msra.mxu0 %v5244_v52  ;;  %v3311_v10 = vrot.slane %v3306_v0, %v6861_v46  ;;  %v5262_v20 = vpack.c.bf16 %v3655_v19, %v3654_v42  ;;  %v5256_v26 = vpack.c.bf16 %v4736_v24, %v4735_v23  ;;  %v3832_v56 = vmul.f32 %v4740_v62, %v7015_v25 }
 0xd1b   : > { %v3290_v36 = vadd.f32 %v3289_v41, %v3288_v30  ;;  %5252 = vmatprep.subr.bf16.mxu0 %v6298_v21  ;;  %v3872_v41 = vld [vmem:[#allocation27 + $0x60] sm:$0xff]  ;;  %v3835_v57 = vmul.f32 %v4740_v62, %v7028_v40  ;;  %v3833_v2 = vmul.f32 %v4740_v62, %v7019_v28  ;;  %v3834_v15 = vmul.f32 %v4740_v62, %v7022_v35 }
 0xd1d   : > { %v3292_v38 = vadd.f32 %v3291_v37, %v3290_v36  ;;  %v3873_v36 = vld [vmem:[#allocation27 + $0x68] sm:$0xff] }
 0xd1e   : > { %v5265_v37 = vpack.c.bf16 %v3873_v36, %v3872_v41 }
 0xd1f   : > { %v3294_v45 = vadd.f32 %v3293_v44, %v3292_v38  ;;  %v3875_v38 = vld [vmem:[#allocation27 + $0x78] sm:$0xff] }
 0xd20   : > { %v5268_v43 = vpack.c.bf16 %v3875_v38, %v3874_v3  ;;  %v3839_v38 = vmul.f32 %v4740_v62, %v7051_v34 }
 0xd21   : > { %v3296_v61 = vadd.f32 %v3295_v47, %v3294_v45 }
 0xd23   : > { %v3298_v48 = vadd.f32 %v3297_v29, %v3296_v61  ;;  %v3959_v61 = vld [vmem:[#allocation30 + $0x60] sm:$0xff]  ;;  %v3960_v29 = vld [vmem:[#allocation30 + $0x68] sm:$0xff] }
 0xd25   : > { %5049 = vmatmul.mubr.msk.f32.vlgmr.msra.gmra.mrb[16].mxu1 %vm1498_vm4, %v3298_v48  ;;  %v5271_v48 = vpack.c.bf16 %v3960_v29, %v3959_v61 }
 0xd26   : > { %5070 = vmatprep.mubr.msk.f32.mxu1 %vm6296_vm1, %v6295_v6  ;;  %5248 = vmatpush3.bf16.msra.mxu1 %v5247_v59 }
 0xd27   : > { %5249 = vmatprep.subr.bf16.mxu1 %v6298_v21 }
 0xd2a   : > { %5251 = vmatpush3.bf16.msra.mxu1 %v5250_v60  ;;  %v3837_v60 = vmul.f32 %v4740_v62, %v7042_v5 }
 0xd2b   : > { %5258 = vmatprep.subr.bf16.mxu1 %v6298_v21 }
 0xd80   : > { %v3393_v39 = vpop.permute.xlu0 %3392 }
 0xdf8   : > { %v3382_v33 = vpop.f32.mrb[16].mxu1 }
 0xdf9   : > { %v3383_v54 = vadd.f32 %v3382_v33, %v3311_v10  ;;  %v5050_v55 = vpop.f32.mrb[17].mxu1 }
 0xdfa   : > { %v4738_v55 = vld [vmem:[#allocation22 + $0x3] ss:$0 sm:$0xff] }
 0xdfb   : > { %5060 = vmatmul.mubr.msk.f32.vlgmr.msra.gmra.mrb[16].mxu0 %vm1498_vm4, %v3383_v54 }
 0xdfc   : > { %5081 = vmatprep.mubr.msk.f32.mxu0 %vm6296_vm1, %v6295_v6  ;;  %5254 = vmatpush3.bf16.msra.mxu0 %v5253_v4  ;;  %v3836_v4 = vmul.f32 %v4740_v62, %v7032_v51 }
 0xdfd   : > { %5255 = vmatprep.subr.bf16.mxu0 %v6298_v21 }
 0xe00   : > { %5257 = vmatpush3.bf16.msra.mxu0 %v5256_v26 }
 0xe01   : > { %5264 = vmatprep.subr.bf16.mxu0 %v6298_v21 }
 0xece   : > { %v3464_v7 = vpop.f32.mrb[16].mxu0 }
 0xecf   : > { %v3465_v11 = vadd.f32 %v3464_v7, %v3393_v39  ;;  %v5061_v12 = vpop.f32.mrb[17].mxu0 }
 0xed1   : > { %v3476_v17 = vadd.f32 %v4730_v8, %v3465_v11 }
 0xed3   : > { %v3477_v18 = vmax.f32 %v3476_v17, 0.0 }
 0xed5   : > { %5071 = vmatmul.mubr.msk.f32.vlgmr.msra.gmra.mrb[18].mxu1 %vm1498_vm4, %v3477_v18 }
 0xed6   : > { %5260 = vmatpush3.bf16.msra.mxu1 %v5259_v16  ;;  %5092 = vmatprep.mubr.msk.f32.mxu1 %vm6296_vm1, %v6295_v6 }
 0xed7   : > { %5261 = vmatprep.subr.bf16.mxu1 %v6298_v21 }
 0xeda   : > { %5263 = vmatpush3.bf16.msra.mxu1 %v5262_v20 }
 0xedb   : > { %5270 = vmatprep.subr.bf16.mxu1 %v6298_v21 }
 0xedd   : > { %5093 = vmatmul.mubr.msk.f32.vlgmr.msra.gmra.mrb[20].mxu1 %vm1498_vm4, %v7088_v63 }
 0xede   : > { %5114 = vmatprep.mubr.msk.f32.mxu1 %vm6296_vm1, %v6295_v6  ;;  %5272 = vmatpush3.bf16.msra.mxu1 %v5271_v48 }
 0xedf   : > { %5273 = vmatprep.subr.bf16.mxu1 %v6298_v21 }
 0xfa8   : > { %v3560_v27 = vpop.f32.mrb[18].mxu1 }
 0xfa9   : > { %v3561_v30 = vadd.f32 %v4731_v9, %v3560_v27  ;;  %v5072_v31 = vpop.f32.mrb[19].mxu1 }
 0xfab   : > { %5082 = vmatmul.mubr.msk.f32.vlgmr.msra.gmra.mrb[18].mxu0 %vm1498_vm4, %v3561_v30 }
 0xfac   : > { %5103 = vmatprep.mubr.msk.f32.mxu0 %vm6296_vm1, %v6295_v6  ;;  %5266 = vmatpush3.bf16.msra.mxu0 %v5265_v37 }
 0xfad   : > { %5267 = vmatprep.subr.bf16.mxu0 %v6298_v21 }
 0xfb0   : > { %v3722_v32 = vpop.f32.mrb[20].mxu1  ;;  %5269 = vmatpush3.bf16.msra.mxu0 %v5268_v43 }
 0xfb1   : > { %v5094_v63 = vpop.f32.mrb[21].mxu1  ;;  %5276 = vmatprep.subr.bf16.mxu0 %v6298_v21  ;;  %v3729_v44 = vcombine.high %v3722_v32, %v3722_v32  ;;  %v3736_v45 = vrot.slane %v3722_v32, %v6941_v1 }
 0xfb2   : > { %v3838_v63 = vmul.f32 %v4740_v62, %v7048_v22 }
 0xfb3   : > { %v3743_v47 = vrot.slane %v3729_v44, %v6941_v1  ;;  %v3744_v49 = vcombine.high %v3736_v45, %v3736_v45  ;;  %v3752_v52 = vrot.slane %v3736_v45, %v6941_v1 }
 0xfb5   : > { %v3745_v50 = vcombine.high %v3743_v47, %v3743_v47  ;;  %v3766_v53 = vrot.slane %v3744_v49, %v6941_v1  ;;  %v3759_v58 = vrot.slane %v3743_v47, %v6941_v1  ;;  %v3774_v0 = vcombine.high %v3752_v52, %v3752_v52 }
 0xfb7   : > { %v3773_v59 = vrot.slane %v3745_v50, %v6941_v1  ;;  %v3776_v10 = vcombine.high %v3766_v53, %v3766_v53  ;;  %v3775_v33 = vcombine.high %v3759_v58, %v3759_v58  ;;  %v3781_v1 = vrot.slane %v3752_v52, %v6861_v46 }
 0xfb8   : > { %v3785_v7 = vrot.slane %v3766_v53, %v6861_v46  ;;  %v3789_v8 = vrot.slane %v3774_v0, %v6861_v46  ;;  %v3797_v5 = vrot.slane %v3759_v58, %v6861_v46 }
 0xfb9   : > { %v3777_v54 = vcombine.high %v3773_v59, %v3773_v59  ;;  %v3793_v11 = vrot.slane %v3776_v10, %v6861_v46  ;;  %v3801_v28 = vrot.slane %v3773_v59, %v6861_v46  ;;  %v3805_v35 = vrot.slane %v3775_v33, %v6861_v46  ;;  %v3961_v33 = vld [vmem:[#allocation30 + $0x70] sm:$0xff] }
 0xfbb   : > { %v3809_v51 = vrot.slane %v3777_v54, %v6861_v46  ;;  %v3962_v54 = vld [vmem:[#allocation30 + $0x78] sm:$0xff] }
0x107e   : > { %v3638_v39 = vpop.f32.mrb[18].mxu0 }
0x107f   : > { %v3650_v25 = vadd.f32 %v4738_v55, %v3638_v39  ;;  %3964 = vrot.lane.b32.xlu1 %v3638_v39, %s6299_s16  ;;  %v5083_v40 = vpop.f32.mrb[19].mxu0  ;;  %v5274_v55 = vpack.c.bf16 %v3962_v54, %v3961_v33  ;;  %v4052_v39 = vld [vmem:[#allocation33 + $0x68] sm:$0xff] }
0x1080   : > { %v4136_v40 = vld [vmem:[#allocation36] sm:$0xff] }
0x1081   : > { %v3818_v12 = vadd.f32 %v3781_v1, %v3650_v25  ;;  %v3819_v13 = vadd.f32 %v3785_v7, %v3650_v25  ;;  %v3820_v14 = vadd.f32 %v3789_v8, %v3650_v25  ;;  %v3821_v17 = vadd.f32 %v3793_v11, %v3650_v25  ;;  %5275 = vmatpush3.bf16.msra.mxu1 %v5274_v55  ;;  %v4051_v1 = vld [vmem:[#allocation33 + $0x60] sm:$0xff]  ;;  %v4053_v8 = vld [vmem:[#allocation33 + $0x70] sm:$0xff]  ;;  %v4054_v11 = vld [vmem:[#allocation33 + $0x78] sm:$0xff] }
0x1082   : > { %v3822_v16 = vadd.f32 %v3797_v5, %v3650_v25  ;;  %v3823_v18 = vadd.f32 %v3801_v28, %v3650_v25  ;;  %v3824_v42 = vadd.f32 %v3805_v35, %v3650_v25  ;;  %v3825_v19 = vadd.f32 %v3809_v51, %v3650_v25  ;;  %5282 = vmatprep.subr.bf16.mxu1 %v6298_v21  ;;  %v4743_v51 = vld [vmem:[#allocation31 + $0x3] ss:$0 sm:$0xff] }
0x1083   : > { %v3840_v20 = vadd.f32 %v3832_v56, %v3818_v12  ;;  %v3841_v23 = vadd.f32 %v3833_v2, %v3819_v13  ;;  %v3842_v24 = vadd.f32 %v3834_v15, %v3820_v14  ;;  %v3843_v26 = vadd.f32 %v3835_v57, %v3821_v17  ;;  %v3877_v56 = vld [vmem:[#allocation28 + $0x3] sm:$0x1] }
0x1084   : > { %v3844_v9 = vadd.f32 %v3836_v4, %v3822_v16  ;;  %v3845_v27 = vadd.f32 %v3837_v60, %v3823_v18  ;;  %v3846_v43 = vadd.f32 %v3838_v63, %v3824_v42  ;;  %v3847_v61 = vadd.f32 %v3839_v38, %v3825_v19  ;;  %v4138_v16 = vld [vmem:[#allocation36 + $0x10] sm:$0xff]  ;;  %v4139_v18 = vld [vmem:[#allocation36 + $0x18] sm:$0xff] }
0x1085   : > { %v3848_v30 = vmax.f32 %v3840_v20, 0.0  ;;  %v3849_v31 = vmax.f32 %v3841_v23, 0.0  ;;  %v3850_v32 = vmax.f32 %v3842_v24, 0.0  ;;  %v3851_v41 = vmax.f32 %v3843_v26, 0.0  ;;  %v4221_v19 = vld [vmem:[%s6447_s27] sm:$0xff]  ;;  %v4222_v20 = vld [vmem:[%s6447_s27 + $0x8] sm:$0xff] }
0x1086   : > { %v3852_v44 = vmax.f32 %v3844_v9, 0.0  ;;  %v3853_v29 = vmax.f32 %v3845_v27, 0.0  ;;  %v3854_v50 = vmax.f32 %v3846_v43, 0.0  ;;  %v3855_v53 = vmax.f32 %v3847_v61, 0.0  ;;  %v4744_v24 = vld [vmem:[#allocation34 + $0x3] ss:$0 sm:$0xff] }
0x1087   : > { %v3856_v36 = vsel %vm1498_vm4, %v3848_v30, 0.0  ;;  %v3857_v3 = vsel %vm1498_vm4, %v3849_v31, 0.0  ;;  %v3859_v45 = vsel %vm1498_vm4, %v3850_v32, 0.0  ;;  %v3861_v48 = vsel %vm1498_vm4, %v3851_v41, 0.0  ;;  %v4224_v30 = vld [vmem:[%s6447_s27 + $0x18] sm:$0xff] }
0x1088   : > { %v3858_v37 = vadd.f32 %v3857_v3, %v3856_v36  ;;  %v3863_v22 = vsel %vm1498_vm4, %v3852_v44, 0.0  ;;  %v3865_v58 = vsel %vm1498_vm4, %v3853_v29, 0.0  ;;  %v3867_v34 = vsel %vm1498_vm4, %v3854_v50, 0.0  ;;  %v4746_v32 = vld [vmem:[#allocation37] ss:$0 sm:$0xff] }
0x1089   : > { %v3869_v0 = vsel %vm1498_vm4, %v3855_v53, 0.0  ;;  %v3878_v57 = vmul.f32 8.0, %v3877_v56  ;;  %v5277_v7 = vpack.c.bf16 %v4052_v39, %v4051_v1  ;;  %v5280_v25 = vpack.c.bf16 %v4054_v11, %v4053_v8 }
0x108a   : > { %v3860_v47 = vadd.f32 %v3859_v45, %v3858_v37  ;;  %v5286_v42 = vpack.c.bf16 %v4139_v18, %v4138_v16  ;;  %v5289_v23 = vpack.c.bf16 %v4222_v20, %v4221_v19  ;;  %v4748_v37 = vld [vmem:[#allocation4] ss:$0 sm:$0xff] }
0x108b   : > { %v3883_v60 = vrot.slane %v3878_v57, %v6861_v46  ;;  %v4137_v46 = vld [vmem:[#allocation36 + $0x8] sm:$0xff] }
0x108c   : > { %v3862_v49 = vadd.f32 %v3861_v48, %v3860_v47  ;;  %v5283_v5 = vpack.c.bf16 %v4137_v46, %v4136_v40 }
0x108e   : > { %v3864_v52 = vadd.f32 %v3863_v22, %v3862_v49 }
0x1090   : > { %v3866_v59 = vadd.f32 %v3865_v58, %v3864_v52 }
0x1092   : > { %v3868_v62 = vadd.f32 %v3867_v34, %v3866_v59 }
0x1094   : > { %v3870_v10 = vadd.f32 %v3869_v0, %v3868_v62 }
0x1096   : > { %5104 = vmatmul.mubr.msk.f32.vlgmr.msra.gmra.mrb[20].mxu0 %vm1498_vm4, %v3870_v10 }
0x1097   : > { %5125 = vmatprep.mubr.msk.f32.mxu0 %vm6296_vm1, %v6295_v6  ;;  %5278 = vmatpush3.bf16.msra.mxu0 %v5277_v7 }
0x1098   : > { %5279 = vmatprep.subr.bf16.mxu0 %v6298_v21 }
0x109b   : > { %5281 = vmatpush3.bf16.msra.mxu0 %v5280_v25 }
0x109c   : > { %5288 = vmatprep.subr.bf16.mxu0 %v6298_v21 }
0x10f1   : > { %v3965_v28 = vpop.permute.xlu1 %3964 }
0x1169   : > { %v3954_v2 = vpop.f32.mrb[20].mxu0 }
0x116a   : > { %v3955_v15 = vadd.f32 %v3954_v2, %v3883_v60  ;;  %v5105_v4 = vpop.f32.mrb[21].mxu0 }
0x116c   : > { %5115 = vmatmul.mubr.msk.f32.vlgmr.msra.gmra.mrb[22].mxu1 %vm1498_vm4, %v3955_v15 }
0x116d   : > { %5136 = vmatprep.mubr.msk.f32.mxu1 %vm6296_vm1, %v6295_v6  ;;  %5284 = vmatpush3.bf16.msra.mxu1 %v5283_v5 }
0x116e   : > { %5285 = vmatprep.subr.bf16.mxu1 %v6298_v21 }
0x1171   : > { %5287 = vmatpush3.bf16.msra.mxu1 %v5286_v42 }
0x123f   : > { %v4036_v35 = vpop.f32.mrb[22].mxu1 }
0x1240   : > { %v4037_v12 = vadd.f32 %v4036_v35, %v3965_v28  ;;  %v5116_v13 = vpop.f32.mrb[23].mxu1 }
0x1242   : > { %v4048_v14 = vadd.f32 %v4743_v51, %v4037_v12 }
0x1244   : > { %v4049_v17 = vmax.f32 %v4048_v14, 0.0 }
0x1246   : > { %5126 = vmatmul.mubr.msk.f32.vlgmr.msra.gmra.mrb[22].mxu0 %vm1498_vm4, %v4049_v17 }
0x1247   : > { %5147 = vmatprep.mubr.msk.f32.mxu0 %vm6296_vm1, %v6295_v6  ;;  %5290 = vmatpush3.bf16.msra.mxu0 %v5289_v23  ;;  %v4223_v6 = vld [vmem:[%s6447_s27 + $0x10] sm:$0xff] }
0x1248   : > { %5291 = vmatprep.subr.bf16.mxu0 %v6298_v21  ;;  %v5292_v31 = vpack.c.bf16 %v4224_v30, %v4223_v6  ;;  %v4305_v21 = vld [vmem:[%s1287_s3] sm:$0xff] }
0x1249   : > { %vm4306_vm8 = vcmp.gt.f32.partialorder %v4305_v21, 0.5 }
0x124b   : > { %5293 = vmatpush3.bf16.msra.mxu0 %v5292_v31 }
0x1319   : > { %v4132_v26 = vpop.f32.mrb[22].mxu0 }
0x131a   : > { %v4133_v9 = vadd.f32 %v4744_v24, %v4132_v26  ;;  %v5127_v27 = vpop.f32.mrb[23].mxu0 }
0x131c   : > { %5137 = vmatmul.mubr.msk.f32.vlgmr.msra.gmra.mrb[24].mxu1 %vm1498_vm4, %v4133_v9 }
0x13ef   : > { %v4216_v63 = vpop.f32.mrb[24].mxu1 }
0x13f0   : > { %v4217_v41 = vadd.f32 %v4746_v32, %v4216_v63  ;;  %v5138_v36 = vpop.f32.mrb[25].mxu1 }
0x13f2   : > { %v4220_v3 = vmax.f32 %v4217_v41, 0.0 }
0x13f4   : > { %5148 = vmatmul.mubr.msk.f32.vlgmr.msra.gmra.mrb[24].mxu0 %vm1498_vm4, %v4220_v3 }
0x14c7   : > { %v4301_v38 = vpop.f32.mrb[24].mxu0 }
0x14c8   : > { %v4302_v43 = vadd.f32 %v4748_v37, %v4301_v38  ;;  %v5149_v44 = vpop.f32.mrb[25].mxu0 }
0x14ca   : > { %v4307_v45 = vsel %vm4306_vm8, -inf, %v4302_v43 }
0x14cb   : > { %4308 = vst.msk [vmem:[%s1291_s6] sm:$0xff] %vm1362_vm5, %v4307_v45 }
0x14cc PF: > { %s91_s22 = sadd.s32 1, %s6236_s22  }
0x14cd   : > { %p88_p9 = scmp.ge.s32.totalorder %s91_s22, 4  }
0x14cf   :  { %90 = sbr.rel (!%p88_p9) target bundleno = 69 (0x45), region = 330 }
0x14d6   :  { %4328 = vsyncpa [#allocation6], 1 }
0x14d7   :  { %4330 = vsyncpa [#allocation6 + $0x1], 1 }
0x14d8   :  { %4331 = vsyncpa [#allocation8], 1 }
0x14d9   :  { %4332 = vsyncpa [#allocation11], 1 }
0x14da   :  { %4333 = vsyncpa [#allocation14], 1 }
0x14db   :  { %4334 = vsyncpa [#allocation17], 1 }
0x14dc   :  { %4335 = vsyncpa [#allocation20], 1 }
0x14dd   :  { %4336 = vsyncpa [#allocation23], 1 }
0x14de   :  { %4337 = vsyncpa [#allocation26], 1 }
0x14df   :  { %4338 = vsyncpa [#allocation29], 1 }
0x14e0   :  { %4339 = vsyncpa [#allocation32], 1 }
0x14e1   :  { %4340 = vsyncpa [#allocation35], 1 }
0x14e2   :  { %4341 = vsyncpa [#allocation38], 1 }

</bundles_post_ra>
